<compile_context>
chip_gen: v5e
topology: v5e:2x2
jax: 0.10.0
libtpu: 0.0.40
codegen_flags: <defaults>
</compile_context>

<pallas_src>
import numpy as np

import jax
import jax.numpy as jnp
from jax.experimental import pallas as pl
from jax.experimental.pallas import tpu as pltpu

NEG_SLOPE = 0.2
BN_EPS = 1e-5
KW = 4      # PatchGAN kernel size
PADW = 1    # PatchGAN padding


# ----------------------------- model structure ------------------------------

def layer_configs(input_nc=3, ndf=8, n_layers=3):
    """Mirrors NLayerDiscriminator.__init__ with norm_layer=BatchNorm2d
    (so use_bias=False on the BatchNorm'd convs)."""
    cfgs = [dict(cin=input_nc, cout=ndf, stride=2,
                 use_bias=True, use_bn=False, use_act=True)]
    nf = 1
    for n in range(1, n_layers):
        nf_prev, nf = nf, min(2 ** n, 8)
        cfgs.append(dict(cin=ndf * nf_prev, cout=ndf * nf, stride=2,
                         use_bias=False, use_bn=True, use_act=True))
    nf_prev, nf = nf, min(2 ** n_layers, 8)
    cfgs.append(dict(cin=ndf * nf_prev, cout=ndf * nf, stride=1,
                     use_bias=False, use_bn=True, use_act=True))
    cfgs.append(dict(cin=ndf * nf, cout=1, stride=1,
                     use_bias=True, use_bn=False, use_act=False))
    return cfgs


def init_params(key, cfgs):
    params = []
    for cfg in cfgs:
        cin, cout = cfg["cin"], cfg["cout"]
        key, k1, k2, k3, k4 = jax.random.split(key, 5)
        w = 0.02 * jax.random.normal(k1, (KW, KW, cin, cout), jnp.float32)
        b = (0.01 * jax.random.normal(k2, (cout,), jnp.float32)
             if cfg["use_bias"] else None)
        gamma = (1.0 + 0.1 * jax.random.normal(k3, (cout,), jnp.float32)
                 if cfg["use_bn"] else None)
        beta = (0.05 * jax.random.normal(k4, (cout,), jnp.float32)
                if cfg["use_bn"] else None)
        params.append(dict(w=w, b=b, gamma=gamma, beta=beta))
    return params


# --------------------- host-side (amortizable) weight prep ------------------

def _build_layer_constants(cfgs, params, batch, height, width):
    """Selection matrices + kron-expanded weights, one-time host preprocessing.

    Activation convention inside the kernel: a 2-D slab of shape
    (batch * Hpad, Wpad * Cin) with element [n*Hpad + h, w*Cin + ci].
    """
    const_inputs = []
    layers = []
    scratch_shapes = []
    h, w = height, width
    for cfg, p in zip(cfgs, params):
        cin, cout, s = cfg["cin"], cfg["cout"], cfg["stride"]
        hp, wp = h + 2 * PADW, w + 2 * PADW
        oh = (h + 2 * PADW - KW) // s + 1
        ow = (w + 2 * PADW - KW) // s + 1

        # Row-select: rsel[ki] picks padded row (s*o + ki) of image n into
        # output row (n*oh + o).  Shape (KW, batch*oh, batch*hp), 0/1 values.
        rsel = np.zeros((KW, batch * oh, batch * hp), np.float32)
        for ki in range(KW):
            for n in range(batch):
                for o in range(oh):
                    rsel[ki, n * oh + o, n * hp + s * o + ki] = 1.0

        # Column-select: scol[kj][s*o + kj, o] = 1.  Shape (KW, wp, ow).
        scol = np.zeros((KW, wp, ow), np.float32)
        for kj in range(KW):
            for o in range(ow):
                scol[kj, s * o + kj, o] = 1.0

        # Kron-expanded weights: Wmat[ki] = sum_kj kron(scol[kj], W[ki, kj]),
        # shape (wp*cin, ow*cout); maps flattened (w, ci) columns of the padded
        # slab to flattened (ow, co) output columns.
        wmats = []
        for ki in range(KW):
            m = jnp.zeros((wp * cin, ow * cout), jnp.float32)
            for kj in range(KW):
                m = m + jnp.kron(jnp.asarray(scol[kj]), p["w"][ki, kj])
            wmats.append(m)
        wmat = jnp.stack(wmats, axis=0).astype(jnp.bfloat16)

        const_inputs += [jnp.asarray(rsel, jnp.bfloat16), wmat]
        if cfg["use_bias"]:
            bias_row = jnp.tile(p["b"].reshape(1, cout), (1, ow)).astype(jnp.float32)
            const_inputs.append(bias_row)
        if cfg["use_bn"]:
            g = np.tile(np.eye(cout, dtype=np.float32), (ow, 1))   # (ow*cout, cout)
            const_inputs += [jnp.asarray(g), jnp.asarray(g.T.copy()),
                             p["gamma"].reshape(1, cout).astype(jnp.float32),
                             p["beta"].reshape(1, cout).astype(jnp.float32)]

        layers.append(dict(hin=h, win=w, hp=hp, wp=wp, oh=oh, ow=ow,
                           cin=cin, cout=cout,
                           use_bias=cfg["use_bias"], use_bn=cfg["use_bn"],
                           use_act=cfg["use_act"]))
        scratch_shapes.append(pltpu.VMEM((batch * hp, wp * cin), jnp.float32))
        h, w = oh, ow
    return const_inputs, layers, scratch_shapes, (h, w)


# ------------------------------ fused kernel --------------------------------

def _make_kernel(layers, batch, n_inputs):
    def kernel(*refs):
        in_refs = refs[:n_inputs]
        out_ref = refs[n_inputs]
        scratch = refs[n_inputs + 1:]

        # Stage the (unpadded) input rows into the zero-padded layer-0 slab.
        x_ref = in_refs[0]
        L0 = layers[0]
        h0, w0, c0, hp0 = L0["hin"], L0["win"], L0["cin"], L0["hp"]
        a0 = scratch[0]
        a0[...] = jnp.zeros(a0.shape, a0.dtype)
        for n in range(batch):
            a0[n * hp0 + PADW: n * hp0 + PADW + h0, c0: (w0 + 1) * c0] = (
                x_ref[n * h0: (n + 1) * h0, :])

        idx = 1
        for li, L in enumerate(layers):
            rsel_ref = in_refs[idx]
            wmat_ref = in_refs[idx + 1]
            idx += 2
            bias_ref = g_ref = gt_ref = gamma_ref = beta_ref = None
            if L["use_bias"]:
                bias_ref = in_refs[idx]
                idx += 1
            if L["use_bn"]:
                g_ref, gt_ref, gamma_ref, beta_ref = (
                    in_refs[idx], in_refs[idx + 1],
                    in_refs[idx + 2], in_refs[idx + 3])
                idx += 4

            oh, ow, cout = L["oh"], L["ow"], L["cout"]
            a = scratch[li][...].astype(jnp.bfloat16)        # (batch*hp, wp*cin)

            # Conv: sum over the 4 kernel rows of (row-select @ A) @ Wmat[ki].
            acc = jnp.zeros((batch * oh, ow * cout), jnp.float32)
            for ki in range(KW):
                rows = jnp.dot(rsel_ref[ki], a,
                               preferred_element_type=jnp.float32)
                acc = acc + jnp.dot(rows.astype(jnp.bfloat16), wmat_ref[ki],
                                    preferred_element_type=jnp.float32)

            if L["use_bias"]:
                acc = acc + bias_ref[...]

            if L["use_bn"]:
                # Training-mode batch stats; centered (two-pass) variance.
                g = g_ref[...]                               # (ow*cout, cout)
                gt = gt_ref[...]                             # (cout, ow*cout)
                m = float(batch * oh * ow)
                mean_c = jnp.dot(jnp.sum(acc, axis=0, keepdims=True), g,
                                 preferred_element_type=jnp.float32) / m
                mean_row = jnp.dot(mean_c, gt,
                                   preferred_element_type=jnp.float32)
                cen = acc - mean_row
                var_c = jnp.dot(jnp.sum(cen * cen, axis=0, keepdims=True), g,
                                preferred_element_type=jnp.float32) / m
                var_c = jnp.maximum(var_c, 0.0)
                scale_c = jax.lax.rsqrt(var_c + BN_EPS) * gamma_ref[...]
                scale_row = jnp.dot(scale_c, gt,
                                    preferred_element_type=jnp.float32)
                beta_row = jnp.dot(beta_ref[...], gt,
                                   preferred_element_type=jnp.float32)
                acc = cen * scale_row + beta_row

            if L["use_act"]:
                acc = jnp.where(acc >= 0, acc, NEG_SLOPE * acc)

            if li + 1 < len(layers):
                # Write zero-padded slab for the next layer (stays in VMEM).
                nxt = scratch[li + 1]
                hpn = oh + 2 * PADW
                nxt[...] = jnp.zeros(nxt.shape, nxt.dtype)
                for n in range(batch):
                    nxt[n * hpn + PADW: n * hpn + PADW + oh,
                        cout: (ow + 1) * cout] = acc[n * oh: (n + 1) * oh, :]
            else:
                out_ref[...] = acc

    return kernel


# --------------------------------- wrapper ----------------------------------

def make_discriminator_forward(params, cfgs, batch, height, width):
    input_nc = cfgs[0]["cin"]
    cout_last = cfgs[-1]["cout"]
    const_inputs, layers, scratch_shapes, (oh_last, ow_last) = (
        _build_layer_constants(cfgs, params, batch, height, width))
    n_inputs = 1 + len(const_inputs)
    kernel = _make_kernel(layers, batch, n_inputs)

    call = pl.pallas_call(
        kernel,
        out_shape=jax.ShapeDtypeStruct((batch * oh_last, ow_last * cout_last),
                                       jnp.float32),
        scratch_shapes=scratch_shapes,
    )

    @jax.jit
    def forward(x_nchw):
        x = jnp.transpose(x_nchw, (0, 2, 3, 1)).astype(jnp.float32)  # -> NHWC
        x2d = x.reshape(batch * height, width * input_nc)            # (N*H, W*C)
        y = call(x2d, *const_inputs)
        y = y.reshape(batch, oh_last, ow_last, cout_last)
        return jnp.transpose(y, (0, 3, 1, 2))                        # -> NCHW

    return forward


if __name__ == "__main__":
    key = jax.random.PRNGKey(0)
    kx, kp = jax.random.split(key)

    # Small PatchGAN: batch=2, input_nc=3, ndf=8, n_layers=3, 32x32 images.
    batch, input_nc, height, width = 2, 3, 32, 32
    ndf, n_layers = 8, 3

    x = jax.random.normal(kx, (batch, input_nc, height, width), jnp.float32)
    cfgs = layer_configs(input_nc, ndf, n_layers)
    params = init_params(kp, cfgs)

    forward = make_discriminator_forward(params, cfgs, batch, height, width)
    out = forward(x)
    jax.block_until_ready(out)

    # 32 -> 16 -> 8 -> 4 -> 3 -> 2 spatially, 1 output channel.
    assert out.shape == (2, 1, 2, 2), out.shape
    assert bool(jnp.all(jnp.isfinite(out)))
    print("KERNEL_OK")
</pallas_src>

<mosaic_0001>
module attributes {stable_mosaic.version = 11 : i64} {
  func.func @kernel(%arg0: memref<64x96xf32, #tpu.memory_space<vmem>>, %arg1: memref<4x32x68xbf16, #tpu.memory_space<vmem>>, %arg2: memref<4x102x128xbf16, #tpu.memory_space<vmem>>, %arg3: memref<1x128xf32, #tpu.memory_space<vmem>>, %arg4: memref<4x16x36xbf16, #tpu.memory_space<vmem>>, %arg5: memref<4x144x128xbf16, #tpu.memory_space<vmem>>, %arg6: memref<128x16xf32, #tpu.memory_space<vmem>>, %arg7: memref<16x128xf32, #tpu.memory_space<vmem>>, %arg8: memref<1x16xf32, #tpu.memory_space<vmem>>, %arg9: memref<1x16xf32, #tpu.memory_space<vmem>>, %arg10: memref<4x8x20xbf16, #tpu.memory_space<vmem>>, %arg11: memref<4x160x128xbf16, #tpu.memory_space<vmem>>, %arg12: memref<128x32xf32, #tpu.memory_space<vmem>>, %arg13: memref<32x128xf32, #tpu.memory_space<vmem>>, %arg14: memref<1x32xf32, #tpu.memory_space<vmem>>, %arg15: memref<1x32xf32, #tpu.memory_space<vmem>>, %arg16: memref<4x6x12xbf16, #tpu.memory_space<vmem>>, %arg17: memref<4x192x192xbf16, #tpu.memory_space<vmem>>, %arg18: memref<192x64xf32, #tpu.memory_space<vmem>>, %arg19: memref<64x192xf32, #tpu.memory_space<vmem>>, %arg20: memref<1x64xf32, #tpu.memory_space<vmem>>, %arg21: memref<1x64xf32, #tpu.memory_space<vmem>>, %arg22: memref<4x4x10xbf16, #tpu.memory_space<vmem>>, %arg23: memref<4x320x2xbf16, #tpu.memory_space<vmem>>, %arg24: memref<1x2xf32, #tpu.memory_space<vmem>>, %arg25: memref<4x2xf32, #tpu.memory_space<vmem>>, %arg26: memref<68x102xf32, #tpu.memory_space<vmem>>, %arg27: memref<36x144xf32, #tpu.memory_space<vmem>>, %arg28: memref<20x160xf32, #tpu.memory_space<vmem>>, %arg29: memref<12x192xf32, #tpu.memory_space<vmem>>, %arg30: memref<10x320xf32, #tpu.memory_space<vmem>>) attributes {dimension_semantics = [], scalar_prefetch = 0 : i64, scratch_operands = 5 : i64, tpu.core_type = #tpu.core_type<tc>} {
    %cst = arith.constant 0.000000e+00 : f32
    %0 = vector.broadcast %cst : f32 to vector<68x102xf32>
    %c0 = arith.constant 0 : index
    %c0_0 = arith.constant 0 : index
    %1 = vector.load %arg26[%c0, %c0_0] : memref<68x102xf32, #tpu.memory_space<vmem>>, vector<68x102xf32>
    tpu.vector_store %arg26[%c0, %c0_0], %0 {strides = array<i32>} : memref<68x102xf32, #tpu.memory_space<vmem>>, vector<68x102xf32>,
    %c0_1 = arith.constant 0 : index
    %c0_2 = arith.constant 0 : index
    %2 = vector.load %arg0[%c0_1, %c0_2] : memref<64x96xf32, #tpu.memory_space<vmem>>, vector<32x96xf32>
    %c1 = arith.constant 1 : index
    %c3 = arith.constant 3 : index
    %3 = vector.load %arg26[%c1, %c3] : memref<68x102xf32, #tpu.memory_space<vmem>>, vector<32x96xf32>
    tpu.vector_store %arg26[%c1, %c3], %2 {strides = array<i32>} : memref<68x102xf32, #tpu.memory_space<vmem>>, vector<32x96xf32>,
    %c32 = arith.constant 32 : index
    %c0_3 = arith.constant 0 : index
    %4 = vector.load %arg0[%c32, %c0_3] : memref<64x96xf32, #tpu.memory_space<vmem>>, vector<32x96xf32>
    %c35 = arith.constant 35 : index
    %c3_4 = arith.constant 3 : index
    %5 = vector.load %arg26[%c35, %c3_4] : memref<68x102xf32, #tpu.memory_space<vmem>>, vector<32x96xf32>
    tpu.vector_store %arg26[%c35, %c3_4], %4 {strides = array<i32>} : memref<68x102xf32, #tpu.memory_space<vmem>>, vector<32x96xf32>,
    %c0_5 = arith.constant 0 : index
    %c0_6 = arith.constant 0 : index
    %6 = vector.load %arg26[%c0_5, %c0_6] : memref<68x102xf32, #tpu.memory_space<vmem>>, vector<68x102xf32>
    %7 = arith.truncf %6 : vector<68x102xf32> to vector<68x102xbf16>
    %cst_7 = arith.constant 0.000000e+00 : f32
    %8 = vector.broadcast %cst_7 : f32 to vector<32x128xf32>
    %c0_8 = arith.constant 0 : index
    %c0_9 = arith.constant 0 : index
    %c0_10 = arith.constant 0 : index
    %9 = vector.load %arg1[%c0_8, %c0_9, %c0_10] : memref<4x32x68xbf16, #tpu.memory_space<vmem>>, vector<1x32x68xbf16>
    %10 = vector.shape_cast %9 : vector<1x32x68xbf16> to vector<32x68xbf16>
    %cst_11 = arith.constant dense<0.000000e+00> : vector<32x102xf32>
    %11 = tpu.matmul %10, %7, %cst_11 {dimension_numbers = #tpu.dot_dimension_numbers<[1], [0], [0], [1], [0, 0, 1, 1], [], []>} : vector<32x68xbf16>, vector<68x102xbf16>, vector<32x102xf32> -> vector<32x102xf32>
    %12 = arith.truncf %11 : vector<32x102xf32> to vector<32x102xbf16>
    %c0_12 = arith.constant 0 : index
    %c0_13 = arith.constant 0 : index
    %c0_14 = arith.constant 0 : index
    %13 = vector.load %arg2[%c0_12, %c0_13, %c0_14] : memref<4x102x128xbf16, #tpu.memory_space<vmem>>, vector<1x102x128xbf16>
    %14 = vector.shape_cast %13 : vector<1x102x128xbf16> to vector<102x128xbf16>
    %cst_15 = arith.constant dense<0.000000e+00> : vector<32x128xf32>
    %15 = tpu.matmul %12, %14, %cst_15 {dimension_numbers = #tpu.dot_dimension_numbers<[1], [0], [0], [1], [0, 0, 1, 1], [], []>} : vector<32x102xbf16>, vector<102x128xbf16>, vector<32x128xf32> -> vector<32x128xf32>
    %16 = arith.addf %8, %15 : vector<32x128xf32>
    %c1_16 = arith.constant 1 : index
    %c0_17 = arith.constant 0 : index
    %c0_18 = arith.constant 0 : index
    %17 = vector.load %arg1[%c1_16, %c0_17, %c0_18] : memref<4x32x68xbf16, #tpu.memory_space<vmem>>, vector<1x32x68xbf16>
    %18 = vector.shape_cast %17 : vector<1x32x68xbf16> to vector<32x68xbf16>
    %cst_19 = arith.constant dense<0.000000e+00> : vector<32x102xf32>
    %19 = tpu.matmul %18, %7, %cst_19 {dimension_numbers = #tpu.dot_dimension_numbers<[1], [0], [0], [1], [0, 0, 1, 1], [], []>} : vector<32x68xbf16>, vector<68x102xbf16>, vector<32x102xf32> -> vector<32x102xf32>
    %20 = arith.truncf %19 : vector<32x102xf32> to vector<32x102xbf16>
    %c1_20 = arith.constant 1 : index
    %c0_21 = arith.constant 0 : index
    %c0_22 = arith.constant 0 : index
    %21 = vector.load %arg2[%c1_20, %c0_21, %c0_22] : memref<4x102x128xbf16, #tpu.memory_space<vmem>>, vector<1x102x128xbf16>
    %22 = vector.shape_cast %21 : vector<1x102x128xbf16> to vector<102x128xbf16>
    %cst_23 = arith.constant dense<0.000000e+00> : vector<32x128xf32>
    %23 = tpu.matmul %20, %22, %cst_23 {dimension_numbers = #tpu.dot_dimension_numbers<[1], [0], [0], [1], [0, 0, 1, 1], [], []>} : vector<32x102xbf16>, vector<102x128xbf16>, vector<32x128xf32> -> vector<32x128xf32>
    %24 = arith.addf %16, %23 : vector<32x128xf32>
    %c2 = arith.constant 2 : index
    %c0_24 = arith.constant 0 : index
    %c0_25 = arith.constant 0 : index
    %25 = vector.load %arg1[%c2, %c0_24, %c0_25] : memref<4x32x68xbf16, #tpu.memory_space<vmem>>, vector<1x32x68xbf16>
    %26 = vector.shape_cast %25 : vector<1x32x68xbf16> to vector<32x68xbf16>
    %cst_26 = arith.constant dense<0.000000e+00> : vector<32x102xf32>
    %27 = tpu.matmul %26, %7, %cst_26 {dimension_numbers = #tpu.dot_dimension_numbers<[1], [0], [0], [1], [0, 0, 1, 1], [], []>} : vector<32x68xbf16>, vector<68x102xbf16>, vector<32x102xf32> -> vector<32x102xf32>
    %28 = arith.truncf %27 : vector<32x102xf32> to vector<32x102xbf16>
    %c2_27 = arith.constant 2 : index
    %c0_28 = arith.constant 0 : index
    %c0_29 = arith.constant 0 : index
    %29 = vector.load %arg2[%c2_27, %c0_28, %c0_29] : memref<4x102x128xbf16, #tpu.memory_space<vmem>>, vector<1x102x128xbf16>
    %30 = vector.shape_cast %29 : vector<1x102x128xbf16> to vector<102x128xbf16>
    %cst_30 = arith.constant dense<0.000000e+00> : vector<32x128xf32>
    %31 = tpu.matmul %28, %30, %cst_30 {dimension_numbers = #tpu.dot_dimension_numbers<[1], [0], [0], [1], [0, 0, 1, 1], [], []>} : vector<32x102xbf16>, vector<102x128xbf16>, vector<32x128xf32> -> vector<32x128xf32>
    %32 = arith.addf %24, %31 : vector<32x128xf32>
    %c3_31 = arith.constant 3 : index
    %c0_32 = arith.constant 0 : index
    %c0_33 = arith.constant 0 : index
    %33 = vector.load %arg1[%c3_31, %c0_32, %c0_33] : memref<4x32x68xbf16, #tpu.memory_space<vmem>>, vector<1x32x68xbf16>
    %34 = vector.shape_cast %33 : vector<1x32x68xbf16> to vector<32x68xbf16>
    %cst_34 = arith.constant dense<0.000000e+00> : vector<32x102xf32>
    %35 = tpu.matmul %34, %7, %cst_34 {dimension_numbers = #tpu.dot_dimension_numbers<[1], [0], [0], [1], [0, 0, 1, 1], [], []>} : vector<32x68xbf16>, vector<68x102xbf16>, vector<32x102xf32> -> vector<32x102xf32>
    %36 = arith.truncf %35 : vector<32x102xf32> to vector<32x102xbf16>
    %c3_35 = arith.constant 3 : index
    %c0_36 = arith.constant 0 : index
    %c0_37 = arith.constant 0 : index
    %37 = vector.load %arg2[%c3_35, %c0_36, %c0_37] : memref<4x102x128xbf16, #tpu.memory_space<vmem>>, vector<1x102x128xbf16>
    %38 = vector.shape_cast %37 : vector<1x102x128xbf16> to vector<102x128xbf16>
    %cst_38 = arith.constant dense<0.000000e+00> : vector<32x128xf32>
    %39 = tpu.matmul %36, %38, %cst_38 {dimension_numbers = #tpu.dot_dimension_numbers<[1], [0], [0], [1], [0, 0, 1, 1], [], []>} : vector<32x102xbf16>, vector<102x128xbf16>, vector<32x128xf32> -> vector<32x128xf32>
    %40 = arith.addf %32, %39 : vector<32x128xf32>
    %c0_39 = arith.constant 0 : index
    %c0_40 = arith.constant 0 : index
    %41 = vector.load %arg3[%c0_39, %c0_40] : memref<1x128xf32, #tpu.memory_space<vmem>>, vector<1x128xf32>
    %42 = vector.broadcast %41 : vector<1x128xf32> to vector<32x128xf32>
    %43 = arith.addf %40, %42 : vector<32x128xf32>
    %cst_41 = arith.constant 0.000000e+00 : f32
    %44 = vector.broadcast %cst_41 : f32 to vector<32x128xf32>
    %45 = arith.cmpf oge, %43, %44 : vector<32x128xf32>
    %cst_42 = arith.constant 2.000000e-01 : f32
    %46 = vector.broadcast %cst_42 : f32 to vector<32x128xf32>
    %47 = arith.mulf %46, %43 : vector<32x128xf32>
    %48 = arith.select %45, %43, %47 : vector<32x128xi1>, vector<32x128xf32>
    %cst_43 = arith.constant 0.000000e+00 : f32
    %49 = vector.broadcast %cst_43 : f32 to vector<36x144xf32>
    %c0_44 = arith.constant 0 : index
    %c0_45 = arith.constant 0 : index
    %50 = vector.load %arg27[%c0_44, %c0_45] : memref<36x144xf32, #tpu.memory_space<vmem>>, vector<36x144xf32>
    tpu.vector_store %arg27[%c0_44, %c0_45], %49 {strides = array<i32>} : memref<36x144xf32, #tpu.memory_space<vmem>>, vector<36x144xf32>,
    %51 = vector.extract_strided_slice %48 {offsets = [0, 0], sizes = [16, 128], strides = [1, 1]} : vector<32x128xf32> to vector<16x128xf32>
    %c1_46 = arith.constant 1 : index
    %c8 = arith.constant 8 : index
    %52 = vector.load %arg27[%c1_46, %c8] : memref<36x144xf32, #tpu.memory_space<vmem>>, vector<16x128xf32>
    tpu.vector_store %arg27[%c1_46, %c8], %51 {strides = array<i32>} : memref<36x144xf32, #tpu.memory_space<vmem>>, vector<16x128xf32>,
    %53 = vector.extract_strided_slice %48 {offsets = [16, 0], sizes = [16, 128], strides = [1, 1]} : vector<32x128xf32> to vector<16x128xf32>
    %c19 = arith.constant 19 : index
    %c8_47 = arith.constant 8 : index
    %54 = vector.load %arg27[%c19, %c8_47] : memref<36x144xf32, #tpu.memory_space<vmem>>, vector<16x128xf32>
    tpu.vector_store %arg27[%c19, %c8_47], %53 {strides = array<i32>} : memref<36x144xf32, #tpu.memory_space<vmem>>, vector<16x128xf32>,
    %c0_48 = arith.constant 0 : index
    %c0_49 = arith.constant 0 : index
    %55 = vector.load %arg27[%c0_48, %c0_49] : memref<36x144xf32, #tpu.memory_space<vmem>>, vector<36x144xf32>
    %56 = arith.truncf %55 : vector<36x144xf32> to vector<36x144xbf16>
    %cst_50 = arith.constant 0.000000e+00 : f32
    %57 = vector.broadcast %cst_50 : f32 to vector<16x128xf32>
    %c0_51 = arith.constant 0 : index
    %c0_52 = arith.constant 0 : index
    %c0_53 = arith.constant 0 : index
    %58 = vector.load %arg4[%c0_51, %c0_52, %c0_53] : memref<4x16x36xbf16, #tpu.memory_space<vmem>>, vector<1x16x36xbf16>
    %59 = vector.shape_cast %58 : vector<1x16x36xbf16> to vector<16x36xbf16>
    %cst_54 = arith.constant dense<0.000000e+00> : vector<16x144xf32>
    %60 = tpu.matmul %59, %56, %cst_54 {dimension_numbers = #tpu.dot_dimension_numbers<[1], [0], [0], [1], [0, 0, 1, 1], [], []>} : vector<16x36xbf16>, vector<36x144xbf16>, vector<16x144xf32> -> vector<16x144xf32>
    %61 = arith.truncf %60 : vector<16x144xf32> to vector<16x144xbf16>
    %c0_55 = arith.constant 0 : index
    %c0_56 = arith.constant 0 : index
    %c0_57 = arith.constant 0 : index
    %62 = vector.load %arg5[%c0_55, %c0_56, %c0_57] : memref<4x144x128xbf16, #tpu.memory_space<vmem>>, vector<1x144x128xbf16>
    %63 = vector.shape_cast %62 : vector<1x144x128xbf16> to vector<144x128xbf16>
    %cst_58 = arith.constant dense<0.000000e+00> : vector<16x128xf32>
    %64 = tpu.matmul %61, %63, %cst_58 {dimension_numbers = #tpu.dot_dimension_numbers<[1], [0], [0], [1], [0, 0, 1, 1], [], []>} : vector<16x144xbf16>, vector<144x128xbf16>, vector<16x128xf32> -> vector<16x128xf32>
    %65 = arith.addf %57, %64 : vector<16x128xf32>
    %c1_59 = arith.constant 1 : index
    %c0_60 = arith.constant 0 : index
    %c0_61 = arith.constant 0 : index
    %66 = vector.load %arg4[%c1_59, %c0_60, %c0_61] : memref<4x16x36xbf16, #tpu.memory_space<vmem>>, vector<1x16x36xbf16>
    %67 = vector.shape_cast %66 : vector<1x16x36xbf16> to vector<16x36xbf16>
    %cst_62 = arith.constant dense<0.000000e+00> : vector<16x144xf32>
    %68 = tpu.matmul %67, %56, %cst_62 {dimension_numbers = #tpu.dot_dimension_numbers<[1], [0], [0], [1], [0, 0, 1, 1], [], []>} : vector<16x36xbf16>, vector<36x144xbf16>, vector<16x144xf32> -> vector<16x144xf32>
    %69 = arith.truncf %68 : vector<16x144xf32> to vector<16x144xbf16>
    %c1_63 = arith.constant 1 : index
    %c0_64 = arith.constant 0 : index
    %c0_65 = arith.constant 0 : index
    %70 = vector.load %arg5[%c1_63, %c0_64, %c0_65] : memref<4x144x128xbf16, #tpu.memory_space<vmem>>, vector<1x144x128xbf16>
    %71 = vector.shape_cast %70 : vector<1x144x128xbf16> to vector<144x128xbf16>
    %cst_66 = arith.constant dense<0.000000e+00> : vector<16x128xf32>
    %72 = tpu.matmul %69, %71, %cst_66 {dimension_numbers = #tpu.dot_dimension_numbers<[1], [0], [0], [1], [0, 0, 1, 1], [], []>} : vector<16x144xbf16>, vector<144x128xbf16>, vector<16x128xf32> -> vector<16x128xf32>
    %73 = arith.addf %65, %72 : vector<16x128xf32>
    %c2_67 = arith.constant 2 : index
    %c0_68 = arith.constant 0 : index
    %c0_69 = arith.constant 0 : index
    %74 = vector.load %arg4[%c2_67, %c0_68, %c0_69] : memref<4x16x36xbf16, #tpu.memory_space<vmem>>, vector<1x16x36xbf16>
    %75 = vector.shape_cast %74 : vector<1x16x36xbf16> to vector<16x36xbf16>
    %cst_70 = arith.constant dense<0.000000e+00> : vector<16x144xf32>
    %76 = tpu.matmul %75, %56, %cst_70 {dimension_numbers = #tpu.dot_dimension_numbers<[1], [0], [0], [1], [0, 0, 1, 1], [], []>} : vector<16x36xbf16>, vector<36x144xbf16>, vector<16x144xf32> -> vector<16x144xf32>
    %77 = arith.truncf %76 : vector<16x144xf32> to vector<16x144xbf16>
    %c2_71 = arith.constant 2 : index
    %c0_72 = arith.constant 0 : index
    %c0_73 = arith.constant 0 : index
    %78 = vector.load %arg5[%c2_71, %c0_72, %c0_73] : memref<4x144x128xbf16, #tpu.memory_space<vmem>>, vector<1x144x128xbf16>
    %79 = vector.shape_cast %78 : vector<1x144x128xbf16> to vector<144x128xbf16>
    %cst_74 = arith.constant dense<0.000000e+00> : vector<16x128xf32>
    %80 = tpu.matmul %77, %79, %cst_74 {dimension_numbers = #tpu.dot_dimension_numbers<[1], [0], [0], [1], [0, 0, 1, 1], [], []>} : vector<16x144xbf16>, vector<144x128xbf16>, vector<16x128xf32> -> vector<16x128xf32>
    %81 = arith.addf %73, %80 : vector<16x128xf32>
    %c3_75 = arith.constant 3 : index
    %c0_76 = arith.constant 0 : index
    %c0_77 = arith.constant 0 : index
    %82 = vector.load %arg4[%c3_75, %c0_76, %c0_77] : memref<4x16x36xbf16, #tpu.memory_space<vmem>>, vector<1x16x36xbf16>
    %83 = vector.shape_cast %82 : vector<1x16x36xbf16> to vector<16x36xbf16>
    %cst_78 = arith.constant dense<0.000000e+00> : vector<16x144xf32>
    %84 = tpu.matmul %83, %56, %cst_78 {dimension_numbers = #tpu.dot_dimension_numbers<[1], [0], [0], [1], [0, 0, 1, 1], [], []>} : vector<16x36xbf16>, vector<36x144xbf16>, vector<16x144xf32> -> vector<16x144xf32>
    %85 = arith.truncf %84 : vector<16x144xf32> to vector<16x144xbf16>
    %c3_79 = arith.constant 3 : index
    %c0_80 = arith.constant 0 : index
    %c0_81 = arith.constant 0 : index
    %86 = vector.load %arg5[%c3_79, %c0_80, %c0_81] : memref<4x144x128xbf16, #tpu.memory_space<vmem>>, vector<1x144x128xbf16>
    %87 = vector.shape_cast %86 : vector<1x144x128xbf16> to vector<144x128xbf16>
    %cst_82 = arith.constant dense<0.000000e+00> : vector<16x128xf32>
    %88 = tpu.matmul %85, %87, %cst_82 {dimension_numbers = #tpu.dot_dimension_numbers<[1], [0], [0], [1], [0, 0, 1, 1], [], []>} : vector<16x144xbf16>, vector<144x128xbf16>, vector<16x128xf32> -> vector<16x128xf32>
    %89 = arith.addf %81, %88 : vector<16x128xf32>
    %c0_83 = arith.constant 0 : index
    %c0_84 = arith.constant 0 : index
    %90 = vector.load %arg6[%c0_83, %c0_84] : memref<128x16xf32, #tpu.memory_space<vmem>>, vector<128x16xf32>
    %c0_85 = arith.constant 0 : index
    %c0_86 = arith.constant 0 : index
    %91 = vector.load %arg7[%c0_85, %c0_86] : memref<16x128xf32, #tpu.memory_space<vmem>>, vector<16x128xf32>
    %cst_87 = arith.constant dense<0.000000e+00> : vector<128xf32>
    %92 = vector.multi_reduction <add>, %89, %cst_87 [0] : vector<16x128xf32> to vector<128xf32>
    %93 = vector.shape_cast %92 : vector<128xf32> to vector<1x128xf32>
    %cst_88 = arith.constant dense<0.000000e+00> : vector<1x16xf32>
    %94 = tpu.matmul %93, %90, %cst_88 {dimension_numbers = #tpu.dot_dimension_numbers<[1], [0], [0], [1], [0, 0, 1, 1], [], []>} : vector<1x128xf32>, vector<128x16xf32>, vector<1x16xf32> -> vector<1x16xf32>
    %cst_89 = arith.constant 1.280000e+02 : f32
    %95 = vector.broadcast %cst_89 : f32 to vector<1x16xf32>
    %96 = arith.divf %94, %95 : vector<1x16xf32>
    %cst_90 = arith.constant dense<0.000000e+00> : vector<1x128xf32>
    %97 = tpu.matmul %96, %91, %cst_90 {dimension_numbers = #tpu.dot_dimension_numbers<[1], [0], [0], [1], [0, 0, 1, 1], [], []>} : vector<1x16xf32>, vector<16x128xf32>, vector<1x128xf32> -> vector<1x128xf32>
    %98 = vector.broadcast %97 : vector<1x128xf32> to vector<16x128xf32>
    %99 = arith.subf %89, %98 : vector<16x128xf32>
    %100 = arith.mulf %99, %99 : vector<16x128xf32>
    %cst_91 = arith.constant dense<0.000000e+00> : vector<128xf32>
    %101 = vector.multi_reduction <add>, %100, %cst_91 [0] : vector<16x128xf32> to vector<128xf32>
    %102 = vector.shape_cast %101 : vector<128xf32> to vector<1x128xf32>
    %cst_92 = arith.constant dense<0.000000e+00> : vector<1x16xf32>
    %103 = tpu.matmul %102, %90, %cst_92 {dimension_numbers = #tpu.dot_dimension_numbers<[1], [0], [0], [1], [0, 0, 1, 1], [], []>} : vector<1x128xf32>, vector<128x16xf32>, vector<1x16xf32> -> vector<1x16xf32>
    %cst_93 = arith.constant 1.280000e+02 : f32
    %104 = vector.broadcast %cst_93 : f32 to vector<1x16xf32>
    %105 = arith.divf %103, %104 : vector<1x16xf32>
    %cst_94 = arith.constant 0.000000e+00 : f32
    %106 = vector.broadcast %cst_94 : f32 to vector<1x16xf32>
    %107 = arith.maximumf %105, %106 : vector<1x16xf32>
    %cst_95 = arith.constant 9.99999974E-6 : f32
    %108 = vector.broadcast %cst_95 : f32 to vector<1x16xf32>
    %109 = arith.addf %107, %108 : vector<1x16xf32>
    %110 = math.rsqrt %109 : vector<1x16xf32>
    %c0_96 = arith.constant 0 : index
    %c0_97 = arith.constant 0 : index
    %111 = vector.load %arg8[%c0_96, %c0_97] : memref<1x16xf32, #tpu.memory_space<vmem>>, vector<1x16xf32>
    %112 = arith.mulf %110, %111 : vector<1x16xf32>
    %cst_98 = arith.constant dense<0.000000e+00> : vector<1x128xf32>
    %113 = tpu.matmul %112, %91, %cst_98 {dimension_numbers = #tpu.dot_dimension_numbers<[1], [0], [0], [1], [0, 0, 1, 1], [], []>} : vector<1x16xf32>, vector<16x128xf32>, vector<1x128xf32> -> vector<1x128xf32>
    %c0_99 = arith.constant 0 : index
    %c0_100 = arith.constant 0 : index
    %114 = vector.load %arg9[%c0_99, %c0_100] : memref<1x16xf32, #tpu.memory_space<vmem>>, vector<1x16xf32>
    %cst_101 = arith.constant dense<0.000000e+00> : vector<1x128xf32>
    %115 = tpu.matmul %114, %91, %cst_101 {dimension_numbers = #tpu.dot_dimension_numbers<[1], [0], [0], [1], [0, 0, 1, 1], [], []>} : vector<1x16xf32>, vector<16x128xf32>, vector<1x128xf32> -> vector<1x128xf32>
    %116 = vector.broadcast %113 : vector<1x128xf32> to vector<16x128xf32>
    %117 = arith.mulf %99, %116 : vector<16x128xf32>
    %118 = vector.broadcast %115 : vector<1x128xf32> to vector<16x128xf32>
    %119 = arith.addf %117, %118 : vector<16x128xf32>
    %cst_102 = arith.constant 0.000000e+00 : f32
    %120 = vector.broadcast %cst_102 : f32 to vector<16x128xf32>
    %121 = arith.cmpf oge, %119, %120 : vector<16x128xf32>
    %cst_103 = arith.constant 2.000000e-01 : f32
    %122 = vector.broadcast %cst_103 : f32 to vector<16x128xf32>
    %123 = arith.mulf %122, %119 : vector<16x128xf32>
    %124 = arith.select %121, %119, %123 : vector<16x128xi1>, vector<16x128xf32>
    %cst_104 = arith.constant 0.000000e+00 : f32
    %125 = vector.broadcast %cst_104 : f32 to vector<20x160xf32>
    %c0_105 = arith.constant 0 : index
    %c0_106 = arith.constant 0 : index
    %126 = vector.load %arg28[%c0_105, %c0_106] : memref<20x160xf32, #tpu.memory_space<vmem>>, vector<20x160xf32>
    tpu.vector_store %arg28[%c0_105, %c0_106], %125 {strides = array<i32>} : memref<20x160xf32, #tpu.memory_space<vmem>>, vector<20x160xf32>,
    %127 = vector.extract_strided_slice %124 {offsets = [0, 0], sizes = [8, 128], strides = [1, 1]} : vector<16x128xf32> to vector<8x128xf32>
    %c1_107 = arith.constant 1 : index
    %c16 = arith.constant 16 : index
    %128 = vector.load %arg28[%c1_107, %c16] : memref<20x160xf32, #tpu.memory_space<vmem>>, vector<8x128xf32>
    tpu.vector_store %arg28[%c1_107, %c16], %127 {strides = array<i32>} : memref<20x160xf32, #tpu.memory_space<vmem>>, vector<8x128xf32>,
    %129 = vector.extract_strided_slice %124 {offsets = [8, 0], sizes = [8, 128], strides = [1, 1]} : vector<16x128xf32> to vector<8x128xf32>
    %c11 = arith.constant 11 : index
    %c16_108 = arith.constant 16 : index
    %130 = vector.load %arg28[%c11, %c16_108] : memref<20x160xf32, #tpu.memory_space<vmem>>, vector<8x128xf32>
    tpu.vector_store %arg28[%c11, %c16_108], %129 {strides = array<i32>} : memref<20x160xf32, #tpu.memory_space<vmem>>, vector<8x128xf32>,
    %c0_109 = arith.constant 0 : index
    %c0_110 = arith.constant 0 : index
    %131 = vector.load %arg28[%c0_109, %c0_110] : memref<20x160xf32, #tpu.memory_space<vmem>>, vector<20x160xf32>
    %132 = arith.truncf %131 : vector<20x160xf32> to vector<20x160xbf16>
    %cst_111 = arith.constant 0.000000e+00 : f32
    %133 = vector.broadcast %cst_111 : f32 to vector<8x128xf32>
    %c0_112 = arith.constant 0 : index
    %c0_113 = arith.constant 0 : index
    %c0_114 = arith.constant 0 : index
    %134 = vector.load %arg10[%c0_112, %c0_113, %c0_114] : memref<4x8x20xbf16, #tpu.memory_space<vmem>>, vector<1x8x20xbf16>
    %135 = vector.shape_cast %134 : vector<1x8x20xbf16> to vector<8x20xbf16>
    %cst_115 = arith.constant dense<0.000000e+00> : vector<8x160xf32>
    %136 = tpu.matmul %135, %132, %cst_115 {dimension_numbers = #tpu.dot_dimension_numbers<[1], [0], [0], [1], [0, 0, 1, 1], [], []>} : vector<8x20xbf16>, vector<20x160xbf16>, vector<8x160xf32> -> vector<8x160xf32>
    %137 = arith.truncf %136 : vector<8x160xf32> to vector<8x160xbf16>
    %c0_116 = arith.constant 0 : index
    %c0_117 = arith.constant 0 : index
    %c0_118 = arith.constant 0 : index
    %138 = vector.load %arg11[%c0_116, %c0_117, %c0_118] : memref<4x160x128xbf16, #tpu.memory_space<vmem>>, vector<1x160x128xbf16>
    %139 = vector.shape_cast %138 : vector<1x160x128xbf16> to vector<160x128xbf16>
    %cst_119 = arith.constant dense<0.000000e+00> : vector<8x128xf32>
    %140 = tpu.matmul %137, %139, %cst_119 {dimension_numbers = #tpu.dot_dimension_numbers<[1], [0], [0], [1], [0, 0, 1, 1], [], []>} : vector<8x160xbf16>, vector<160x128xbf16>, vector<8x128xf32> -> vector<8x128xf32>
    %141 = arith.addf %133, %140 : vector<8x128xf32>
    %c1_120 = arith.constant 1 : index
    %c0_121 = arith.constant 0 : index
    %c0_122 = arith.constant 0 : index
    %142 = vector.load %arg10[%c1_120, %c0_121, %c0_122] : memref<4x8x20xbf16, #tpu.memory_space<vmem>>, vector<1x8x20xbf16>
    %143 = vector.shape_cast %142 : vector<1x8x20xbf16> to vector<8x20xbf16>
    %cst_123 = arith.constant dense<0.000000e+00> : vector<8x160xf32>
    %144 = tpu.matmul %143, %132, %cst_123 {dimension_numbers = #tpu.dot_dimension_numbers<[1], [0], [0], [1], [0, 0, 1, 1], [], []>} : vector<8x20xbf16>, vector<20x160xbf16>, vector<8x160xf32> -> vector<8x160xf32>
    %145 = arith.truncf %144 : vector<8x160xf32> to vector<8x160xbf16>
    %c1_124 = arith.constant 1 : index
    %c0_125 = arith.constant 0 : index
    %c0_126 = arith.constant 0 : index
    %146 = vector.load %arg11[%c1_124, %c0_125, %c0_126] : memref<4x160x128xbf16, #tpu.memory_space<vmem>>, vector<1x160x128xbf16>
    %147 = vector.shape_cast %146 : vector<1x160x128xbf16> to vector<160x128xbf16>
    %cst_127 = arith.constant dense<0.000000e+00> : vector<8x128xf32>
    %148 = tpu.matmul %145, %147, %cst_127 {dimension_numbers = #tpu.dot_dimension_numbers<[1], [0], [0], [1], [0, 0, 1, 1], [], []>} : vector<8x160xbf16>, vector<160x128xbf16>, vector<8x128xf32> -> vector<8x128xf32>
    %149 = arith.addf %141, %148 : vector<8x128xf32>
    %c2_128 = arith.constant 2 : index
    %c0_129 = arith.constant 0 : index
    %c0_130 = arith.constant 0 : index
    %150 = vector.load %arg10[%c2_128, %c0_129, %c0_130] : memref<4x8x20xbf16, #tpu.memory_space<vmem>>, vector<1x8x20xbf16>
    %151 = vector.shape_cast %150 : vector<1x8x20xbf16> to vector<8x20xbf16>
    %cst_131 = arith.constant dense<0.000000e+00> : vector<8x160xf32>
    %152 = tpu.matmul %151, %132, %cst_131 {dimension_numbers = #tpu.dot_dimension_numbers<[1], [0], [0], [1], [0, 0, 1, 1], [], []>} : vector<8x20xbf16>, vector<20x160xbf16>, vector<8x160xf32> -> vector<8x160xf32>
    %153 = arith.truncf %152 : vector<8x160xf32> to vector<8x160xbf16>
    %c2_132 = arith.constant 2 : index
    %c0_133 = arith.constant 0 : index
    %c0_134 = arith.constant 0 : index
    %154 = vector.load %arg11[%c2_132, %c0_133, %c0_134] : memref<4x160x128xbf16, #tpu.memory_space<vmem>>, vector<1x160x128xbf16>
    %155 = vector.shape_cast %154 : vector<1x160x128xbf16> to vector<160x128xbf16>
    %cst_135 = arith.constant dense<0.000000e+00> : vector<8x128xf32>
    %156 = tpu.matmul %153, %155, %cst_135 {dimension_numbers = #tpu.dot_dimension_numbers<[1], [0], [0], [1], [0, 0, 1, 1], [], []>} : vector<8x160xbf16>, vector<160x128xbf16>, vector<8x128xf32> -> vector<8x128xf32>
    %157 = arith.addf %149, %156 : vector<8x128xf32>
    %c3_136 = arith.constant 3 : index
    %c0_137 = arith.constant 0 : index
    %c0_138 = arith.constant 0 : index
    %158 = vector.load %arg10[%c3_136, %c0_137, %c0_138] : memref<4x8x20xbf16, #tpu.memory_space<vmem>>, vector<1x8x20xbf16>
    %159 = vector.shape_cast %158 : vector<1x8x20xbf16> to vector<8x20xbf16>
    %cst_139 = arith.constant dense<0.000000e+00> : vector<8x160xf32>
    %160 = tpu.matmul %159, %132, %cst_139 {dimension_numbers = #tpu.dot_dimension_numbers<[1], [0], [0], [1], [0, 0, 1, 1], [], []>} : vector<8x20xbf16>, vector<20x160xbf16>, vector<8x160xf32> -> vector<8x160xf32>
    %161 = arith.truncf %160 : vector<8x160xf32> to vector<8x160xbf16>
    %c3_140 = arith.constant 3 : index
    %c0_141 = arith.constant 0 : index
    %c0_142 = arith.constant 0 : index
    %162 = vector.load %arg11[%c3_140, %c0_141, %c0_142] : memref<4x160x128xbf16, #tpu.memory_space<vmem>>, vector<1x160x128xbf16>
    %163 = vector.shape_cast %162 : vector<1x160x128xbf16> to vector<160x128xbf16>
    %cst_143 = arith.constant dense<0.000000e+00> : vector<8x128xf32>
    %164 = tpu.matmul %161, %163, %cst_143 {dimension_numbers = #tpu.dot_dimension_numbers<[1], [0], [0], [1], [0, 0, 1, 1], [], []>} : vector<8x160xbf16>, vector<160x128xbf16>, vector<8x128xf32> -> vector<8x128xf32>
    %165 = arith.addf %157, %164 : vector<8x128xf32>
    %c0_144 = arith.constant 0 : index
    %c0_145 = arith.constant 0 : index
    %166 = vector.load %arg12[%c0_144, %c0_145] : memref<128x32xf32, #tpu.memory_space<vmem>>, vector<128x32xf32>
    %c0_146 = arith.constant 0 : index
    %c0_147 = arith.constant 0 : index
    %167 = vector.load %arg13[%c0_146, %c0_147] : memref<32x128xf32, #tpu.memory_space<vmem>>, vector<32x128xf32>
    %cst_148 = arith.constant dense<0.000000e+00> : vector<128xf32>
    %168 = vector.multi_reduction <add>, %165, %cst_148 [0] : vector<8x128xf32> to vector<128xf32>
    %169 = vector.shape_cast %168 : vector<128xf32> to vector<1x128xf32>
    %cst_149 = arith.constant dense<0.000000e+00> : vector<1x32xf32>
    %170 = tpu.matmul %169, %166, %cst_149 {dimension_numbers = #tpu.dot_dimension_numbers<[1], [0], [0], [1], [0, 0, 1, 1], [], []>} : vector<1x128xf32>, vector<128x32xf32>, vector<1x32xf32> -> vector<1x32xf32>
    %cst_150 = arith.constant 3.200000e+01 : f32
    %171 = vector.broadcast %cst_150 : f32 to vector<1x32xf32>
    %172 = arith.divf %170, %171 : vector<1x32xf32>
    %cst_151 = arith.constant dense<0.000000e+00> : vector<1x128xf32>
    %173 = tpu.matmul %172, %167, %cst_151 {dimension_numbers = #tpu.dot_dimension_numbers<[1], [0], [0], [1], [0, 0, 1, 1], [], []>} : vector<1x32xf32>, vector<32x128xf32>, vector<1x128xf32> -> vector<1x128xf32>
    %174 = vector.broadcast %173 : vector<1x128xf32> to vector<8x128xf32>
    %175 = arith.subf %165, %174 : vector<8x128xf32>
    %176 = arith.mulf %175, %175 : vector<8x128xf32>
    %cst_152 = arith.constant dense<0.000000e+00> : vector<128xf32>
    %177 = vector.multi_reduction <add>, %176, %cst_152 [0] : vector<8x128xf32> to vector<128xf32>
    %178 = vector.shape_cast %177 : vector<128xf32> to vector<1x128xf32>
    %cst_153 = arith.constant dense<0.000000e+00> : vector<1x32xf32>
    %179 = tpu.matmul %178, %166, %cst_153 {dimension_numbers = #tpu.dot_dimension_numbers<[1], [0], [0], [1], [0, 0, 1, 1], [], []>} : vector<1x128xf32>, vector<128x32xf32>, vector<1x32xf32> -> vector<1x32xf32>
    %cst_154 = arith.constant 3.200000e+01 : f32
    %180 = vector.broadcast %cst_154 : f32 to vector<1x32xf32>
    %181 = arith.divf %179, %180 : vector<1x32xf32>
    %cst_155 = arith.constant 0.000000e+00 : f32
    %182 = vector.broadcast %cst_155 : f32 to vector<1x32xf32>
    %183 = arith.maximumf %181, %182 : vector<1x32xf32>
    %cst_156 = arith.constant 9.99999974E-6 : f32
    %184 = vector.broadcast %cst_156 : f32 to vector<1x32xf32>
    %185 = arith.addf %183, %184 : vector<1x32xf32>
    %186 = math.rsqrt %185 : vector<1x32xf32>
    %c0_157 = arith.constant 0 : index
    %c0_158 = arith.constant 0 : index
    %187 = vector.load %arg14[%c0_157, %c0_158] : memref<1x32xf32, #tpu.memory_space<vmem>>, vector<1x32xf32>
    %188 = arith.mulf %186, %187 : vector<1x32xf32>
    %cst_159 = arith.constant dense<0.000000e+00> : vector<1x128xf32>
    %189 = tpu.matmul %188, %167, %cst_159 {dimension_numbers = #tpu.dot_dimension_numbers<[1], [0], [0], [1], [0, 0, 1, 1], [], []>} : vector<1x32xf32>, vector<32x128xf32>, vector<1x128xf32> -> vector<1x128xf32>
    %c0_160 = arith.constant 0 : index
    %c0_161 = arith.constant 0 : index
    %190 = vector.load %arg15[%c0_160, %c0_161] : memref<1x32xf32, #tpu.memory_space<vmem>>, vector<1x32xf32>
    %cst_162 = arith.constant dense<0.000000e+00> : vector<1x128xf32>
    %191 = tpu.matmul %190, %167, %cst_162 {dimension_numbers = #tpu.dot_dimension_numbers<[1], [0], [0], [1], [0, 0, 1, 1], [], []>} : vector<1x32xf32>, vector<32x128xf32>, vector<1x128xf32> -> vector<1x128xf32>
    %192 = vector.broadcast %189 : vector<1x128xf32> to vector<8x128xf32>
    %193 = arith.mulf %175, %192 : vector<8x128xf32>
    %194 = vector.broadcast %191 : vector<1x128xf32> to vector<8x128xf32>
    %195 = arith.addf %193, %194 : vector<8x128xf32>
    %cst_163 = arith.constant 0.000000e+00 : f32
    %196 = vector.broadcast %cst_163 : f32 to vector<8x128xf32>
    %197 = arith.cmpf oge, %195, %196 : vector<8x128xf32>
    %cst_164 = arith.constant 2.000000e-01 : f32
    %198 = vector.broadcast %cst_164 : f32 to vector<8x128xf32>
    %199 = arith.mulf %198, %195 : vector<8x128xf32>
    %200 = arith.select %197, %195, %199 : vector<8x128xi1>, vector<8x128xf32>
    %cst_165 = arith.constant 0.000000e+00 : f32
    %201 = vector.broadcast %cst_165 : f32 to vector<12x192xf32>
    %c0_166 = arith.constant 0 : index
    %c0_167 = arith.constant 0 : index
    %202 = vector.load %arg29[%c0_166, %c0_167] : memref<12x192xf32, #tpu.memory_space<vmem>>, vector<12x192xf32>
    tpu.vector_store %arg29[%c0_166, %c0_167], %201 {strides = array<i32>} : memref<12x192xf32, #tpu.memory_space<vmem>>, vector<12x192xf32>,
    %203 = vector.extract_strided_slice %200 {offsets = [0, 0], sizes = [4, 128], strides = [1, 1]} : vector<8x128xf32> to vector<4x128xf32>
    %c1_168 = arith.constant 1 : index
    %c32_169 = arith.constant 32 : index
    %204 = vector.load %arg29[%c1_168, %c32_169] : memref<12x192xf32, #tpu.memory_space<vmem>>, vector<4x128xf32>
    tpu.vector_store %arg29[%c1_168, %c32_169], %203 {strides = array<i32>} : memref<12x192xf32, #tpu.memory_space<vmem>>, vector<4x128xf32>,
    %205 = vector.extract_strided_slice %200 {offsets = [4, 0], sizes = [4, 128], strides = [1, 1]} : vector<8x128xf32> to vector<4x128xf32>
    %c7 = arith.constant 7 : index
    %c32_170 = arith.constant 32 : index
    %206 = vector.load %arg29[%c7, %c32_170] : memref<12x192xf32, #tpu.memory_space<vmem>>, vector<4x128xf32>
    tpu.vector_store %arg29[%c7, %c32_170], %205 {strides = array<i32>} : memref<12x192xf32, #tpu.memory_space<vmem>>, vector<4x128xf32>,
    %c0_171 = arith.constant 0 : index
    %c0_172 = arith.constant 0 : index
    %207 = vector.load %arg29[%c0_171, %c0_172] : memref<12x192xf32, #tpu.memory_space<vmem>>, vector<12x192xf32>
    %208 = arith.truncf %207 : vector<12x192xf32> to vector<12x192xbf16>
    %cst_173 = arith.constant 0.000000e+00 : f32
    %209 = vector.broadcast %cst_173 : f32 to vector<6x192xf32>
    %c0_174 = arith.constant 0 : index
    %c0_175 = arith.constant 0 : index
    %c0_176 = arith.constant 0 : index
    %210 = vector.load %arg16[%c0_174, %c0_175, %c0_176] : memref<4x6x12xbf16, #tpu.memory_space<vmem>>, vector<1x6x12xbf16>
    %211 = vector.shape_cast %210 : vector<1x6x12xbf16> to vector<6x12xbf16>
    %cst_177 = arith.constant dense<0.000000e+00> : vector<6x192xf32>
    %212 = tpu.matmul %211, %208, %cst_177 {dimension_numbers = #tpu.dot_dimension_numbers<[1], [0], [0], [1], [0, 0, 1, 1], [], []>} : vector<6x12xbf16>, vector<12x192xbf16>, vector<6x192xf32> -> vector<6x192xf32>
    %213 = arith.truncf %212 : vector<6x192xf32> to vector<6x192xbf16>
    %c0_178 = arith.constant 0 : index
    %c0_179 = arith.constant 0 : index
    %c0_180 = arith.constant 0 : index
    %214 = vector.load %arg17[%c0_178, %c0_179, %c0_180] : memref<4x192x192xbf16, #tpu.memory_space<vmem>>, vector<1x192x192xbf16>
    %215 = vector.shape_cast %214 : vector<1x192x192xbf16> to vector<192x192xbf16>
    %cst_181 = arith.constant dense<0.000000e+00> : vector<6x192xf32>
    %216 = tpu.matmul %213, %215, %cst_181 {dimension_numbers = #tpu.dot_dimension_numbers<[1], [0], [0], [1], [0, 0, 1, 1], [], []>} : vector<6x192xbf16>, vector<192x192xbf16>, vector<6x192xf32> -> vector<6x192xf32>
    %217 = arith.addf %209, %216 : vector<6x192xf32>
    %c1_182 = arith.constant 1 : index
    %c0_183 = arith.constant 0 : index
    %c0_184 = arith.constant 0 : index
    %218 = vector.load %arg16[%c1_182, %c0_183, %c0_184] : memref<4x6x12xbf16, #tpu.memory_space<vmem>>, vector<1x6x12xbf16>
    %219 = vector.shape_cast %218 : vector<1x6x12xbf16> to vector<6x12xbf16>
    %cst_185 = arith.constant dense<0.000000e+00> : vector<6x192xf32>
    %220 = tpu.matmul %219, %208, %cst_185 {dimension_numbers = #tpu.dot_dimension_numbers<[1], [0], [0], [1], [0, 0, 1, 1], [], []>} : vector<6x12xbf16>, vector<12x192xbf16>, vector<6x192xf32> -> vector<6x192xf32>
    %221 = arith.truncf %220 : vector<6x192xf32> to vector<6x192xbf16>
    %c1_186 = arith.constant 1 : index
    %c0_187 = arith.constant 0 : index
    %c0_188 = arith.constant 0 : index
    %222 = vector.load %arg17[%c1_186, %c0_187, %c0_188] : memref<4x192x192xbf16, #tpu.memory_space<vmem>>, vector<1x192x192xbf16>
    %223 = vector.shape_cast %222 : vector<1x192x192xbf16> to vector<192x192xbf16>
    %cst_189 = arith.constant dense<0.000000e+00> : vector<6x192xf32>
    %224 = tpu.matmul %221, %223, %cst_189 {dimension_numbers = #tpu.dot_dimension_numbers<[1], [0], [0], [1], [0, 0, 1, 1], [], []>} : vector<6x192xbf16>, vector<192x192xbf16>, vector<6x192xf32> -> vector<6x192xf32>
    %225 = arith.addf %217, %224 : vector<6x192xf32>
    %c2_190 = arith.constant 2 : index
    %c0_191 = arith.constant 0 : index
    %c0_192 = arith.constant 0 : index
    %226 = vector.load %arg16[%c2_190, %c0_191, %c0_192] : memref<4x6x12xbf16, #tpu.memory_space<vmem>>, vector<1x6x12xbf16>
    %227 = vector.shape_cast %226 : vector<1x6x12xbf16> to vector<6x12xbf16>
    %cst_193 = arith.constant dense<0.000000e+00> : vector<6x192xf32>
    %228 = tpu.matmul %227, %208, %cst_193 {dimension_numbers = #tpu.dot_dimension_numbers<[1], [0], [0], [1], [0, 0, 1, 1], [], []>} : vector<6x12xbf16>, vector<12x192xbf16>, vector<6x192xf32> -> vector<6x192xf32>
    %229 = arith.truncf %228 : vector<6x192xf32> to vector<6x192xbf16>
    %c2_194 = arith.constant 2 : index
    %c0_195 = arith.constant 0 : index
    %c0_196 = arith.constant 0 : index
    %230 = vector.load %arg17[%c2_194, %c0_195, %c0_196] : memref<4x192x192xbf16, #tpu.memory_space<vmem>>, vector<1x192x192xbf16>
    %231 = vector.shape_cast %230 : vector<1x192x192xbf16> to vector<192x192xbf16>
    %cst_197 = arith.constant dense<0.000000e+00> : vector<6x192xf32>
    %232 = tpu.matmul %229, %231, %cst_197 {dimension_numbers = #tpu.dot_dimension_numbers<[1], [0], [0], [1], [0, 0, 1, 1], [], []>} : vector<6x192xbf16>, vector<192x192xbf16>, vector<6x192xf32> -> vector<6x192xf32>
    %233 = arith.addf %225, %232 : vector<6x192xf32>
    %c3_198 = arith.constant 3 : index
    %c0_199 = arith.constant 0 : index
    %c0_200 = arith.constant 0 : index
    %234 = vector.load %arg16[%c3_198, %c0_199, %c0_200] : memref<4x6x12xbf16, #tpu.memory_space<vmem>>, vector<1x6x12xbf16>
    %235 = vector.shape_cast %234 : vector<1x6x12xbf16> to vector<6x12xbf16>
    %cst_201 = arith.constant dense<0.000000e+00> : vector<6x192xf32>
    %236 = tpu.matmul %235, %208, %cst_201 {dimension_numbers = #tpu.dot_dimension_numbers<[1], [0], [0], [1], [0, 0, 1, 1], [], []>} : vector<6x12xbf16>, vector<12x192xbf16>, vector<6x192xf32> -> vector<6x192xf32>
    %237 = arith.truncf %236 : vector<6x192xf32> to vector<6x192xbf16>
    %c3_202 = arith.constant 3 : index
    %c0_203 = arith.constant 0 : index
    %c0_204 = arith.constant 0 : index
    %238 = vector.load %arg17[%c3_202, %c0_203, %c0_204] : memref<4x192x192xbf16, #tpu.memory_space<vmem>>, vector<1x192x192xbf16>
    %239 = vector.shape_cast %238 : vector<1x192x192xbf16> to vector<192x192xbf16>
    %cst_205 = arith.constant dense<0.000000e+00> : vector<6x192xf32>
    %240 = tpu.matmul %237, %239, %cst_205 {dimension_numbers = #tpu.dot_dimension_numbers<[1], [0], [0], [1], [0, 0, 1, 1], [], []>} : vector<6x192xbf16>, vector<192x192xbf16>, vector<6x192xf32> -> vector<6x192xf32>
    %241 = arith.addf %233, %240 : vector<6x192xf32>
    %c0_206 = arith.constant 0 : index
    %c0_207 = arith.constant 0 : index
    %242 = vector.load %arg18[%c0_206, %c0_207] : memref<192x64xf32, #tpu.memory_space<vmem>>, vector<192x64xf32>
    %c0_208 = arith.constant 0 : index
    %c0_209 = arith.constant 0 : index
    %243 = vector.load %arg19[%c0_208, %c0_209] : memref<64x192xf32, #tpu.memory_space<vmem>>, vector<64x192xf32>
    %cst_210 = arith.constant dense<0.000000e+00> : vector<192xf32>
    %244 = vector.multi_reduction <add>, %241, %cst_210 [0] : vector<6x192xf32> to vector<192xf32>
    %245 = vector.shape_cast %244 : vector<192xf32> to vector<1x192xf32>
    %cst_211 = arith.constant dense<0.000000e+00> : vector<1x64xf32>
    %246 = tpu.matmul %245, %242, %cst_211 {dimension_numbers = #tpu.dot_dimension_numbers<[1], [0], [0], [1], [0, 0, 1, 1], [], []>} : vector<1x192xf32>, vector<192x64xf32>, vector<1x64xf32> -> vector<1x64xf32>
    %cst_212 = arith.constant 1.800000e+01 : f32
    %247 = vector.broadcast %cst_212 : f32 to vector<1x64xf32>
    %248 = arith.divf %246, %247 : vector<1x64xf32>
    %cst_213 = arith.constant dense<0.000000e+00> : vector<1x192xf32>
    %249 = tpu.matmul %248, %243, %cst_213 {dimension_numbers = #tpu.dot_dimension_numbers<[1], [0], [0], [1], [0, 0, 1, 1], [], []>} : vector<1x64xf32>, vector<64x192xf32>, vector<1x192xf32> -> vector<1x192xf32>
    %250 = vector.broadcast %249 : vector<1x192xf32> to vector<6x192xf32>
    %251 = arith.subf %241, %250 : vector<6x192xf32>
    %252 = arith.mulf %251, %251 : vector<6x192xf32>
    %cst_214 = arith.constant dense<0.000000e+00> : vector<192xf32>
    %253 = vector.multi_reduction <add>, %252, %cst_214 [0] : vector<6x192xf32> to vector<192xf32>
    %254 = vector.shape_cast %253 : vector<192xf32> to vector<1x192xf32>
    %cst_215 = arith.constant dense<0.000000e+00> : vector<1x64xf32>
    %255 = tpu.matmul %254, %242, %cst_215 {dimension_numbers = #tpu.dot_dimension_numbers<[1], [0], [0], [1], [0, 0, 1, 1], [], []>} : vector<1x192xf32>, vector<192x64xf32>, vector<1x64xf32> -> vector<1x64xf32>
    %cst_216 = arith.constant 1.800000e+01 : f32
    %256 = vector.broadcast %cst_216 : f32 to vector<1x64xf32>
    %257 = arith.divf %255, %256 : vector<1x64xf32>
    %cst_217 = arith.constant 0.000000e+00 : f32
    %258 = vector.broadcast %cst_217 : f32 to vector<1x64xf32>
    %259 = arith.maximumf %257, %258 : vector<1x64xf32>
    %cst_218 = arith.constant 9.99999974E-6 : f32
    %260 = vector.broadcast %cst_218 : f32 to vector<1x64xf32>
    %261 = arith.addf %259, %260 : vector<1x64xf32>
    %262 = math.rsqrt %261 : vector<1x64xf32>
    %c0_219 = arith.constant 0 : index
    %c0_220 = arith.constant 0 : index
    %263 = vector.load %arg20[%c0_219, %c0_220] : memref<1x64xf32, #tpu.memory_space<vmem>>, vector<1x64xf32>
    %264 = arith.mulf %262, %263 : vector<1x64xf32>
    %cst_221 = arith.constant dense<0.000000e+00> : vector<1x192xf32>
    %265 = tpu.matmul %264, %243, %cst_221 {dimension_numbers = #tpu.dot_dimension_numbers<[1], [0], [0], [1], [0, 0, 1, 1], [], []>} : vector<1x64xf32>, vector<64x192xf32>, vector<1x192xf32> -> vector<1x192xf32>
    %c0_222 = arith.constant 0 : index
    %c0_223 = arith.constant 0 : index
    %266 = vector.load %arg21[%c0_222, %c0_223] : memref<1x64xf32, #tpu.memory_space<vmem>>, vector<1x64xf32>
    %cst_224 = arith.constant dense<0.000000e+00> : vector<1x192xf32>
    %267 = tpu.matmul %266, %243, %cst_224 {dimension_numbers = #tpu.dot_dimension_numbers<[1], [0], [0], [1], [0, 0, 1, 1], [], []>} : vector<1x64xf32>, vector<64x192xf32>, vector<1x192xf32> -> vector<1x192xf32>
    %268 = vector.broadcast %265 : vector<1x192xf32> to vector<6x192xf32>
    %269 = arith.mulf %251, %268 : vector<6x192xf32>
    %270 = vector.broadcast %267 : vector<1x192xf32> to vector<6x192xf32>
    %271 = arith.addf %269, %270 : vector<6x192xf32>
    %cst_225 = arith.constant 0.000000e+00 : f32
    %272 = vector.broadcast %cst_225 : f32 to vector<6x192xf32>
    %273 = arith.cmpf oge, %271, %272 : vector<6x192xf32>
    %cst_226 = arith.constant 2.000000e-01 : f32
    %274 = vector.broadcast %cst_226 : f32 to vector<6x192xf32>
    %275 = arith.mulf %274, %271 : vector<6x192xf32>
    %276 = arith.select %273, %271, %275 : vector<6x192xi1>, vector<6x192xf32>
    %cst_227 = arith.constant 0.000000e+00 : f32
    %277 = vector.broadcast %cst_227 : f32 to vector<10x320xf32>
    %c0_228 = arith.constant 0 : index
    %c0_229 = arith.constant 0 : index
    %278 = vector.load %arg30[%c0_228, %c0_229] : memref<10x320xf32, #tpu.memory_space<vmem>>, vector<10x320xf32>
    tpu.vector_store %arg30[%c0_228, %c0_229], %277 {strides = array<i32>} : memref<10x320xf32, #tpu.memory_space<vmem>>, vector<10x320xf32>,
    %279 = vector.extract_strided_slice %276 {offsets = [0, 0], sizes = [3, 192], strides = [1, 1]} : vector<6x192xf32> to vector<3x192xf32>
    %c1_230 = arith.constant 1 : index
    %c64 = arith.constant 64 : index
    %280 = vector.load %arg30[%c1_230, %c64] : memref<10x320xf32, #tpu.memory_space<vmem>>, vector<3x192xf32>
    tpu.vector_store %arg30[%c1_230, %c64], %279 {strides = array<i32>} : memref<10x320xf32, #tpu.memory_space<vmem>>, vector<3x192xf32>,
    %281 = vector.extract_strided_slice %276 {offsets = [3, 0], sizes = [3, 192], strides = [1, 1]} : vector<6x192xf32> to vector<3x192xf32>
    %c6 = arith.constant 6 : index
    %c64_231 = arith.constant 64 : index
    %282 = vector.load %arg30[%c6, %c64_231] : memref<10x320xf32, #tpu.memory_space<vmem>>, vector<3x192xf32>
    tpu.vector_store %arg30[%c6, %c64_231], %281 {strides = array<i32>} : memref<10x320xf32, #tpu.memory_space<vmem>>, vector<3x192xf32>,
    %c0_232 = arith.constant 0 : index
    %c0_233 = arith.constant 0 : index
    %283 = vector.load %arg30[%c0_232, %c0_233] : memref<10x320xf32, #tpu.memory_space<vmem>>, vector<10x320xf32>
    %284 = arith.truncf %283 : vector<10x320xf32> to vector<10x320xbf16>
    %cst_234 = arith.constant 0.000000e+00 : f32
    %285 = vector.broadcast %cst_234 : f32 to vector<4x2xf32>
    %c0_235 = arith.constant 0 : index
    %c0_236 = arith.constant 0 : index
    %c0_237 = arith.constant 0 : index
    %286 = vector.load %arg22[%c0_235, %c0_236, %c0_237] : memref<4x4x10xbf16, #tpu.memory_space<vmem>>, vector<1x4x10xbf16>
    %287 = vector.shape_cast %286 : vector<1x4x10xbf16> to vector<4x10xbf16>
    %cst_238 = arith.constant dense<0.000000e+00> : vector<4x320xf32>
    %288 = tpu.matmul %287, %284, %cst_238 {dimension_numbers = #tpu.dot_dimension_numbers<[1], [0], [0], [1], [0, 0, 1, 1], [], []>} : vector<4x10xbf16>, vector<10x320xbf16>, vector<4x320xf32> -> vector<4x320xf32>
    %289 = arith.truncf %288 : vector<4x320xf32> to vector<4x320xbf16>
    %c0_239 = arith.constant 0 : index
    %c0_240 = arith.constant 0 : index
    %c0_241 = arith.constant 0 : index
    %290 = vector.load %arg23[%c0_239, %c0_240, %c0_241] : memref<4x320x2xbf16, #tpu.memory_space<vmem>>, vector<1x320x2xbf16>
    %291 = vector.shape_cast %290 : vector<1x320x2xbf16> to vector<320x2xbf16>
    %cst_242 = arith.constant dense<0.000000e+00> : vector<4x2xf32>
    %292 = tpu.matmul %289, %291, %cst_242 {dimension_numbers = #tpu.dot_dimension_numbers<[1], [0], [0], [1], [0, 0, 1, 1], [], []>} : vector<4x320xbf16>, vector<320x2xbf16>, vector<4x2xf32> -> vector<4x2xf32>
    %293 = arith.addf %285, %292 : vector<4x2xf32>
    %c1_243 = arith.constant 1 : index
    %c0_244 = arith.constant 0 : index
    %c0_245 = arith.constant 0 : index
    %294 = vector.load %arg22[%c1_243, %c0_244, %c0_245] : memref<4x4x10xbf16, #tpu.memory_space<vmem>>, vector<1x4x10xbf16>
    %295 = vector.shape_cast %294 : vector<1x4x10xbf16> to vector<4x10xbf16>
    %cst_246 = arith.constant dense<0.000000e+00> : vector<4x320xf32>
    %296 = tpu.matmul %295, %284, %cst_246 {dimension_numbers = #tpu.dot_dimension_numbers<[1], [0], [0], [1], [0, 0, 1, 1], [], []>} : vector<4x10xbf16>, vector<10x320xbf16>, vector<4x320xf32> -> vector<4x320xf32>
    %297 = arith.truncf %296 : vector<4x320xf32> to vector<4x320xbf16>
    %c1_247 = arith.constant 1 : index
    %c0_248 = arith.constant 0 : index
    %c0_249 = arith.constant 0 : index
    %298 = vector.load %arg23[%c1_247, %c0_248, %c0_249] : memref<4x320x2xbf16, #tpu.memory_space<vmem>>, vector<1x320x2xbf16>
    %299 = vector.shape_cast %298 : vector<1x320x2xbf16> to vector<320x2xbf16>
    %cst_250 = arith.constant dense<0.000000e+00> : vector<4x2xf32>
    %300 = tpu.matmul %297, %299, %cst_250 {dimension_numbers = #tpu.dot_dimension_numbers<[1], [0], [0], [1], [0, 0, 1, 1], [], []>} : vector<4x320xbf16>, vector<320x2xbf16>, vector<4x2xf32> -> vector<4x2xf32>
    %301 = arith.addf %293, %300 : vector<4x2xf32>
    %c2_251 = arith.constant 2 : index
    %c0_252 = arith.constant 0 : index
    %c0_253 = arith.constant 0 : index
    %302 = vector.load %arg22[%c2_251, %c0_252, %c0_253] : memref<4x4x10xbf16, #tpu.memory_space<vmem>>, vector<1x4x10xbf16>
    %303 = vector.shape_cast %302 : vector<1x4x10xbf16> to vector<4x10xbf16>
    %cst_254 = arith.constant dense<0.000000e+00> : vector<4x320xf32>
    %304 = tpu.matmul %303, %284, %cst_254 {dimension_numbers = #tpu.dot_dimension_numbers<[1], [0], [0], [1], [0, 0, 1, 1], [], []>} : vector<4x10xbf16>, vector<10x320xbf16>, vector<4x320xf32> -> vector<4x320xf32>
    %305 = arith.truncf %304 : vector<4x320xf32> to vector<4x320xbf16>
    %c2_255 = arith.constant 2 : index
    %c0_256 = arith.constant 0 : index
    %c0_257 = arith.constant 0 : index
    %306 = vector.load %arg23[%c2_255, %c0_256, %c0_257] : memref<4x320x2xbf16, #tpu.memory_space<vmem>>, vector<1x320x2xbf16>
    %307 = vector.shape_cast %306 : vector<1x320x2xbf16> to vector<320x2xbf16>
    %cst_258 = arith.constant dense<0.000000e+00> : vector<4x2xf32>
    %308 = tpu.matmul %305, %307, %cst_258 {dimension_numbers = #tpu.dot_dimension_numbers<[1], [0], [0], [1], [0, 0, 1, 1], [], []>} : vector<4x320xbf16>, vector<320x2xbf16>, vector<4x2xf32> -> vector<4x2xf32>
    %309 = arith.addf %301, %308 : vector<4x2xf32>
    %c3_259 = arith.constant 3 : index
    %c0_260 = arith.constant 0 : index
    %c0_261 = arith.constant 0 : index
    %310 = vector.load %arg22[%c3_259, %c0_260, %c0_261] : memref<4x4x10xbf16, #tpu.memory_space<vmem>>, vector<1x4x10xbf16>
    %311 = vector.shape_cast %310 : vector<1x4x10xbf16> to vector<4x10xbf16>
    %cst_262 = arith.constant dense<0.000000e+00> : vector<4x320xf32>
    %312 = tpu.matmul %311, %284, %cst_262 {dimension_numbers = #tpu.dot_dimension_numbers<[1], [0], [0], [1], [0, 0, 1, 1], [], []>} : vector<4x10xbf16>, vector<10x320xbf16>, vector<4x320xf32> -> vector<4x320xf32>
    %313 = arith.truncf %312 : vector<4x320xf32> to vector<4x320xbf16>
    %c3_263 = arith.constant 3 : index
    %c0_264 = arith.constant 0 : index
    %c0_265 = arith.constant 0 : index
    %314 = vector.load %arg23[%c3_263, %c0_264, %c0_265] : memref<4x320x2xbf16, #tpu.memory_space<vmem>>, vector<1x320x2xbf16>
    %315 = vector.shape_cast %314 : vector<1x320x2xbf16> to vector<320x2xbf16>
    %cst_266 = arith.constant dense<0.000000e+00> : vector<4x2xf32>
    %316 = tpu.matmul %313, %315, %cst_266 {dimension_numbers = #tpu.dot_dimension_numbers<[1], [0], [0], [1], [0, 0, 1, 1], [], []>} : vector<4x320xbf16>, vector<320x2xbf16>, vector<4x2xf32> -> vector<4x2xf32>
    %317 = arith.addf %309, %316 : vector<4x2xf32>
    %c0_267 = arith.constant 0 : index
    %c0_268 = arith.constant 0 : index
    %318 = vector.load %arg24[%c0_267, %c0_268] : memref<1x2xf32, #tpu.memory_space<vmem>>, vector<1x2xf32>
    %319 = vector.broadcast %318 : vector<1x2xf32> to vector<4x2xf32>
    %320 = arith.addf %317, %319 : vector<4x2xf32>
    %c0_269 = arith.constant 0 : index
    %c0_270 = arith.constant 0 : index
    %321 = vector.load %arg25[%c0_269, %c0_270] : memref<4x2xf32, #tpu.memory_space<vmem>>, vector<4x2xf32>
    tpu.vector_store %arg25[%c0_269, %c0_270], %320 {strides = array<i32>} : memref<4x2xf32, #tpu.memory_space<vmem>>, vector<4x2xf32>,
    return
  }
}

</mosaic_0001>

<bundles_post_ra>
// kernel: forward.1
= control target key start
LH: loop header
LB: loop body
LE: loop exit
PB: predicated region body
PF: predicated region fallthrough
CT: control target
= control target key end

     0   :  { %s8402_s0 = inlined_call_operand.vmem [shape: f32[64,96], index: 0, kind: input, shape index: {}]   ;;  %s8403_s1 = inlined_call_operand.vmem [shape: bf16[4,32,68], index: 1, kind: input, shape index: {}]   ;;  %s8404_s2 = inlined_call_operand.hbm [shape: bf16[4,102,128], index: 2, kind: input, shape index: {}]   ;;  %s8405_s3 = inlined_call_operand.vmem [shape: f32[1,128], index: 3, kind: input, shape index: {}]   ;;  %s8406_s4 = inlined_call_operand.hbm [shape: bf16[4,16,36], index: 4, kind: input, shape index: {}]   ;;  %s8407_s5 = inlined_call_operand.hbm [shape: bf16[4,144,128], index: 5, kind: input, shape index: {}]   ;;  %s8408_s6 = inlined_call_operand.hbm [shape: f32[128,16], index: 6, kind: input, shape index: {}]   ;;  %s8409_s7 = inlined_call_operand.vmem [shape: f32[16,128], index: 7, kind: input, shape index: {}]   ;;  %s8410_s8 = inlined_call_operand.vmem [shape: f32[1,16], index: 8, kind: input, shape index: {}]   ;;  %s8411_s9 = inlined_call_operand.vmem [shape: f32[1,16], index: 9, kind: input, shape index: {}]   ;;  %s8412_s10 = inlined_call_operand.hbm [shape: bf16[4,8,20], index: 10, kind: input, shape index: {}]   ;;  %s8413_s11 = inlined_call_operand.hbm [shape: bf16[4,160,128], index: 11, kind: input, shape index: {}]   ;;  %s8414_s12 = inlined_call_operand.hbm [shape: f32[128,32], index: 12, kind: input, shape index: {}]   ;;  %s8415_s13 = inlined_call_operand.hbm [shape: f32[32,128], index: 13, kind: input, shape index: {}]   ;;  %s8416_s14 = inlined_call_operand.hbm [shape: f32[1,32], index: 14, kind: input, shape index: {}]   ;;  %s8417_s15 = inlined_call_operand.hbm [shape: f32[1,32], index: 15, kind: input, shape index: {}]   ;;  %s8418_s16 = inlined_call_operand.hbm [shape: bf16[4,6,12], index: 16, kind: input, shape index: {}]   ;;  %s8419_s17 = inlined_call_operand.vmem [shape: bf16[4,192,192], index: 17, kind: input, shape index: {}]   ;;  %s8420_s18 = inlined_call_operand.hbm [shape: f32[192,64], index: 18, kind: input, shape index: {}]   ;;  %s8421_s19 = inlined_call_operand.hbm [shape: f32[64,192], index: 19, kind: input, shape index: {}]   ;;  %s8422_s20 = inlined_call_operand.hbm [shape: f32[1,64], index: 20, kind: input, shape index: {}]   ;;  %s8423_s21 = inlined_call_operand.hbm [shape: f32[1,64], index: 21, kind: input, shape index: {}]   ;;  %s8424_s22 = inlined_call_operand.hbm [shape: bf16[4,4,10], index: 22, kind: input, shape index: {}]   ;;  %s8425_s23 = inlined_call_operand.hbm [shape: bf16[4,320,2], index: 23, kind: input, shape index: {}]   ;;  %s8426_s24 = inlined_call_operand.vmem [shape: f32[1,2], index: 24, kind: input, shape index: {}]   ;;  %s8427_s25 = inlined_call_operand.hbm [shape: f32[4,2], index: 25, kind: output, shape index: {}]  }
   0x1   :  { %8431 = sst [smem:[#allocation45_spill]] %s8402_s0 }
   0x2   :  { %8432 = sst [smem:[#allocation46_spill]] %s8403_s1 }
   0x3   :  { %8433 = sst [smem:[#allocation47_spill]] %s8404_s2 }
   0x4   :  { %8434 = sst [smem:[#allocation48_spill]] %s8405_s3 }
   0x5   :  { %8435 = sst [smem:[#allocation49_spill]] %s8406_s4 }
   0x6   :  { %8436 = sst [smem:[#allocation50_spill]] %s8407_s5 }
   0x7   :  { %8437 = sst [smem:[#allocation51_spill]] %s8408_s6 }
   0x8   :  { %8438 = sst [smem:[#allocation52_spill]] %s8409_s7 }
   0x9   :  { %8439 = sst [smem:[#allocation53_spill]] %s8410_s8 }
   0xa   :  { %8440 = sst [smem:[#allocation54_spill]] %s8411_s9 }
   0xb   :  { %8441 = sst [smem:[#allocation55_spill]] %s8427_s25 }
   0xc   :  { %30 = vsyncpa [#allocation8], 0 }
   0xd   :  { %31 = vsyncpa [#allocation11], 0 }
   0xe   :  { %32 = vsyncpa [#allocation14], 0 }
   0xf   :  { %33 = vsyncpa [#allocation17], 0 }
  0x10   :  { %34 = vsyncpa [#allocation20], 0 }
  0x11   :  { %35 = vsyncpa [#allocation23], 0 }
  0x12   :  { %36 = vsyncpa [#allocation26], 0 }
  0x13   :  { %37 = vsyncpa [#allocation29], 0 }
  0x14   :  { %38 = vsyncpa [#allocation32], 0 }
  0x15   :  { %39 = vsyncpa [#allocation9], 0  ;;  %s8442_s6 = sld [smem:[#allocation49_spill]]  ;;  %s7084_s7 = smov [#allocation10]  }
  0x16   :  { %s65_s3 = sshll.u32 %s7084_s7, 4  ;;  %s8443_s8 = sld [smem:[#allocation51_spill]]  ;;  %s66_s3 = int_to_ptr.vmem [resolvable:$true] %s65_s3 }
  0x17   :  { %s7085_s4 = smov 64   ;;  %s7086_s28 = smov 4  }
  0x18   :  { %s7087_s9 = smov [#allocation13]   ;;  %s7088_s0 = smov 128  }
  0x19   :  { %s91_s5 = sshll.u32 %s7087_s9, 4  ;;  %s7089_s29 = smov 8   ;;  %s92_s5 = int_to_ptr.vmem [resolvable:$true] %s91_s5 }
  0x1a   :  { %s121_s7 = sshll.u32 %s8413_s11, 4  ;;  %s7090_s26 = smov [#allocation16]   ;;  %s122_s7 = int_to_ptr.hbm [resolvable:$true] %s121_s7 }
  0x1b   :  { %s63_s30 = sshll.u32 %s8442_s6, 4  ;;  %s123_s1 = sshll.u32 %s7090_s26, 4  ;;  %s64_s30 = int_to_ptr.hbm [resolvable:$true] %s63_s30  ;;  %s124_s1 = int_to_ptr.vmem [resolvable:$true] %s123_s1 }
  0x1c   :  { %s89_s27 = sshll.u32 %s8443_s8, 4  ;;  %s7091_s9 = smov [#allocation19]   ;;  %s90_s27 = int_to_ptr.hbm [resolvable:$true] %s89_s27 }
  0x1d   :  { %71 = dma.hbm_to_vmem [thread:$0]  %s64_s30, 512, %s66_s3, [#allocation11], %s7085_s4, %s7085_s4, %s7086_s28  }
  0x1e   :  { %97 = dma.hbm_to_vmem [thread:$0]  %s90_s27, 2048, %s92_s5, [#allocation14], %s7088_s0, %s7088_s0, %s7089_s29  }
  0x1f   :  { %s147_s3 = sshll.u32 %s8415_s13, 4  ;;  %s149_s25 = sshll.u32 %s7091_s9, 4  ;;  %s148_s3 = int_to_ptr.hbm [resolvable:$true] %s147_s3  ;;  %s150_s25 = int_to_ptr.vmem [resolvable:$true] %s149_s25 }
  0x20   :  { %129 = dma.hbm_to_vmem [thread:$0]  %s122_s7, 5120, %s124_s1, [#allocation17], %s7085_s4, %s7085_s4, %s7086_s28  }
  0x21   :  { %s172_s2 = sshll.u32 %s8417_s15, 4  ;;  %s197_s13 = sshll.u32 %s8420_s18, 4  ;;  %s173_s2 = int_to_ptr.hbm [resolvable:$true] %s172_s2  ;;  %s198_s13 = int_to_ptr.hbm [resolvable:$true] %s197_s13 }
  0x22   :  { %155 = dma.hbm_to_vmem [thread:$0]  %s148_s3, 512, %s150_s25, [#allocation20], %s7088_s0, %s7088_s0, %s7089_s29  }
  0x23   :  { %s7092_s26 = smov [#allocation22]   ;;  %s7093_s7 = smov [#allocation25]  }
  0x24   :  { %s174_s8 = sshll.u32 %s7092_s26, 4  ;;  %s199_s1 = sshll.u32 %s7093_s7, 4  ;;  %s175_s8 = int_to_ptr.vmem [resolvable:$true] %s174_s8  ;;  %s200_s1 = int_to_ptr.vmem [resolvable:$true] %s199_s1 }
  0x25   :  { %177 = dma.hbm_to_vmem [thread:$0]  %s173_s2, 16, %s175_s8, [#allocation23]  }
  0x26   :  { %s224_s15 = sshll.u32 %s8422_s20, 4  ;;  %s245_s18 = sshll.u32 %s8424_s22, 4  ;;  %s225_s15 = int_to_ptr.hbm [resolvable:$true] %s224_s15  ;;  %s246_s18 = int_to_ptr.hbm [resolvable:$true] %s245_s18 }
  0x27   :  { %205 = dma.hbm_to_vmem [thread:$0]  %s198_s13, 3072, %s200_s1, [#allocation26], %s7088_s0, %s7088_s0, %s7089_s29  }
  0x28   :  { %s7094_s27 = smov [#allocation28]   ;;  %s7095_s2 = smov [#allocation31]  }
  0x29   :  { %s226_s5 = sshll.u32 %s7094_s27, 4  ;;  %s247_s11 = sshll.u32 %s7095_s2, 4  ;;  %s227_s5 = int_to_ptr.vmem [resolvable:$true] %s226_s5  ;;  %s248_s11 = int_to_ptr.vmem [resolvable:$true] %s247_s11 }
  0x2a   :  { %229 = dma.hbm_to_vmem [thread:$0]  %s225_s15, 16, %s227_s5, [#allocation29]  }
  0x2b   :  { %s7096_s6 = smov 32   ;;  %s7097_s20 = smov 2  }
  0x2c   :  { %253 = dma.hbm_to_vmem [thread:$0]  %s246_s18, 128, %s248_s11, [#allocation32], %s7096_s6, %s7096_s6, %s7097_s20  }
  0x2d   :  { %s8444_s13 = sld [smem:[#allocation47_spill]]  ;;  %s7098_s1 = smov [#allocation7]  }
  0x2e   :  { %s50_s22 = sshll.u32 %s7098_s1, 4  ;;  %s8445_s25 = sld [smem:[#allocation50_spill]]  ;;  %s51_s22 = int_to_ptr.vmem [resolvable:$true] %s50_s22 }
  0x2f   :  { %s7099_s3 = smov [#allocation12]   ;;  %s108_s2 = sshll.u32 %s8412_s10, 4  ;;  %s109_s2 = int_to_ptr.hbm [resolvable:$true] %s108_s2 }
  0x30   :  { %s78_s27 = sshll.u32 %s7099_s3, 4  ;;  %s134_s26 = sshll.u32 %s8414_s12, 4  ;;  %s79_s27 = int_to_ptr.vmem [resolvable:$true] %s78_s27  ;;  %s135_s26 = int_to_ptr.hbm [resolvable:$true] %s134_s26 }
  0x31   :  { %s7100_s8 = smov [#allocation15]   ;;  %s161_s30 = sshll.u32 %s8416_s14, 4  ;;  %s162_s30 = int_to_ptr.hbm [resolvable:$true] %s161_s30 }
  0x32   :  { %s210_s14 = sshll.u32 %s8421_s19, 4  ;;  %s211_s14 = int_to_ptr.hbm [resolvable:$true] %s210_s14 }
  0x33   :  { %s48_s7 = sshll.u32 %s8444_s13, 4  ;;  %s110_s13 = sshll.u32 %s7100_s8, 4  ;;  %s49_s7 = int_to_ptr.hbm [resolvable:$true] %s48_s7  ;;  %s111_s13 = int_to_ptr.vmem [resolvable:$true] %s110_s13 }
  0x34   :  { %s76_s15 = sshll.u32 %s8445_s25, 4  ;;  %s182_s25 = sshll.u32 %s8418_s16, 4  ;;  %s77_s15 = int_to_ptr.hbm [resolvable:$true] %s76_s15  ;;  %s183_s25 = int_to_ptr.hbm [resolvable:$true] %s182_s25 }
  0x35   :  { %56 = dma.hbm_to_vmem [thread:$0]  %s49_s7, 3328, %s51_s22, [#allocation8], %s7085_s4, %s7085_s4, %s7086_s28  }
  0x36   :  { %84 = dma.hbm_to_vmem [thread:$0]  %s77_s15, 4608, %s79_s27, [#allocation11], %s7085_s4, %s7085_s4, %s7086_s28  }
  0x37   :  { %116 = dma.hbm_to_vmem [thread:$0]  %s109_s2, 256, %s111_s13, [#allocation14], %s7085_s4, %s7085_s4, %s7086_s28  }
  0x38   :  { %s7101_s7 = smov [#allocation18]   ;;  %s7102_s15 = smov [#allocation21]  }
  0x39   :  { %s136_s10 = sshll.u32 %s7101_s7, 4  ;;  %s163_s3 = sshll.u32 %s7102_s15, 4  ;;  %s137_s10 = int_to_ptr.vmem [resolvable:$true] %s136_s10  ;;  %s164_s3 = int_to_ptr.vmem [resolvable:$true] %s163_s3 }
  0x3a   :  { %142 = dma.hbm_to_vmem [thread:$0]  %s135_s26, 2048, %s137_s10, [#allocation17], %s7088_s0, %s7088_s0, %s7089_s29  }
  0x3b   :  { %166 = dma.hbm_to_vmem [thread:$0]  %s162_s30, 16, %s164_s3, [#allocation20]  }
  0x3c   :  { %s7103_s27 = smov [#allocation24]   ;;  %s7104_s0 = smov [#allocation27]  }
  0x3d   :  { %s184_s18 = sshll.u32 %s7103_s27, 4  ;;  %s212_s11 = sshll.u32 %s7104_s0, 4  ;;  %s185_s18 = int_to_ptr.vmem [resolvable:$true] %s184_s18  ;;  %s213_s11 = int_to_ptr.vmem [resolvable:$true] %s212_s11 }
  0x3e   :  { %190 = dma.hbm_to_vmem [thread:$0]  %s183_s25, 256, %s185_s18, [#allocation23], %s7085_s4, %s7085_s4, %s7086_s28  }
  0x3f   :  { %s235_s26 = sshll.u32 %s8423_s21, 4  ;;  %s7105_s8 = smov 256   ;;  %s236_s26 = int_to_ptr.hbm [resolvable:$true] %s235_s26 }
  0x40   :  { %s7106_s13 = smov 16   ;;  %s7107_s7 = smov [#allocation30]  }
  0x41   :  { %218 = dma.hbm_to_vmem [thread:$0]  %s211_s14, 2048, %s213_s11, [#allocation26], %s7105_s8, %s7105_s8, %s7106_s13  }
  0x42   :  { %s237_s19 = sshll.u32 %s7107_s7, 4  ;;  %s258_s22 = sshll.u32 %s8425_s23, 4  ;;  %s238_s19 = int_to_ptr.vmem [resolvable:$true] %s237_s19  ;;  %s259_s22 = int_to_ptr.hbm [resolvable:$true] %s258_s22 }
  0x43   :  { %240 = dma.hbm_to_vmem [thread:$0]  %s236_s26, 16, %s238_s19, [#allocation29]  }
  0x44   :  { %s7108_s30 = smov [#allocation33]  }
  0x45   :  { %s260_s12 = sshll.u32 %s7108_s30, 4  ;;  %s261_s12 = int_to_ptr.vmem [resolvable:$true] %s260_s12 }
  0x46   :  { %266 = dma.hbm_to_vmem [thread:$0]  %s259_s22, 10240, %s261_s12, [#allocation32], %s7085_s4, %s7085_s4, %s7086_s28  }
  0x47   :  { %7064 = dma.done.wait [#allocation8], 3328  }
  0x48   :  { %7065 = vsyncadd [#allocation8], 4294963968 }
  0x49   :  { %7066 = dma.done.wait [#allocation11], 5120  }
  0x4a   :  { %7067 = vsyncadd [#allocation11], 4294962176 }
  0x4b   :  { %7068 = dma.done.wait [#allocation14], 2304  }
  0x4c   :  { %7069 = vsyncadd [#allocation14], 4294964992 }
  0x4d   :  { %7070 = dma.done.wait [#allocation17], 7168  }
  0x4e   :  { %7071 = vsyncadd [#allocation17], 4294960128 }
  0x4f   :  { %7072 = dma.done.wait [#allocation20], 528  }
  0x50   :  { %7073 = vsyncadd [#allocation20], 4294966768 }
  0x51   :  { %7074 = dma.done.wait [#allocation23], 272  }
  0x52   :  { %7075 = vsyncadd [#allocation23], 4294967024 }
  0x53   :  { %7076 = dma.done.wait [#allocation26], 5120  }
  0x54   :  { %7077 = vsyncadd [#allocation26], 4294962176 }
  0x55   :  { %7078 = dma.done.wait [#allocation29], 32  }
  0x56   :  { %7079 = vsyncadd [#allocation29], 4294967264 }
  0x57   :  { %7080 = dma.done.wait [#allocation32], 10368  }
  0x58   :  { %7081 = vsyncadd [#allocation32], 4294956928  ;;  %vm338_vm0 = vcmask 834560   ;;  %vm347_vm1 = vcmask 830464   ;;  %v7109_v0 = vmov 0.0   ;;  %s8446_s28 = sld [smem:[#allocation45_spill]] }
  0x59   :  { %346 = vst.msk [vmem:[#allocation2 + $0x38] sm:$0xff] %vm338_vm0, %v7109_v0  ;;  %s7110_s15 = smov 3   ;;  %v526_v3 = vld [vmem:[#allocation7 + $0x64] sm:$0x7]  ;;  %vm572_vm2 = vcmask 1042432   ;;  %v6312_v10 = vld [vmem:[#allocation7 + $0x5c] sm:$0xff] }
  0x5a   :  { %348 = vst.msk [vmem:[#allocation2 + $0x40] sm:$0xf] %vm347_vm1, %v7109_v0  ;;  %v552_v5 = vunpack.c.l.b16 %v526_v3  ;;  %v6311_v12 = vld [vmem:[#allocation7 + $0x54] sm:$0xff]  ;;  %v6310_v15 = vld [vmem:[#allocation7 + $0x4c] sm:$0xff]  ;;  %v6309_v16 = vld [vmem:[#allocation7 + $0x44] sm:$0xff]  ;;  %vm369_vm3 = vcmask 810008  }
  0x5b   :  { %339 = vst.msk [vmem:[#allocation2] sm:$0xff] %vm338_vm0, %v7109_v0  ;;  %v6308_v17 = vld [vmem:[#allocation7 + $0x3c] sm:$0xff]  ;;  %v6307_v19 = vld [vmem:[#allocation7 + $0x34] sm:$0xff]  ;;  %vm433_vm4 = vcmask 1041408   ;;  %s8447_s10 = sld [smem:[#allocation46_spill]]  ;;  %vm426_vm5 = vcmask 556032  }
  0x5c   :  { %340 = vst.msk [vmem:[#allocation2 + $0x8] sm:$0xff] %vm338_vm0, %v7109_v0  ;;  %v559_v6 = vpack.c.b16 %v552_v5, %v552_v5  ;;  %v470_v46 = vld [vmem:[#allocation7 + $0x30] sm:$0x7]  ;;  %v6304_v50 = vld [vmem:[#allocation7 + $0x28] sm:$0xff]  ;;  %v6303_v51 = vld [vmem:[#allocation7 + $0x20] sm:$0xff]  ;;  %s8448_s0 = sld [smem:[#allocation48_spill]] }
  0x5d   :  { %341 = vst.msk [vmem:[#allocation2 + $0x10] sm:$0xff] %vm338_vm0, %v7109_v0  ;;  %v620_v47 = vunpack.c.l.b16 %v470_v46  ;;  %v6302_v53 = vld [vmem:[#allocation7 + $0x18] sm:$0xff]  ;;  %v6301_v55 = vld [vmem:[#allocation7 + $0x10] sm:$0xff]  ;;  %v6300_v56 = vld [vmem:[#allocation7 + $0x8] sm:$0xff]  ;;  %vm946_vm6 = vcmask 125952   ;;  %vm950_vm11 = vcmask 1040384  }
  0x5e   :  { %342 = vst.msk [vmem:[#allocation2 + $0x18] sm:$0xff] %vm338_vm0, %v7109_v0  ;;  %v377_v1 = vld [vmem:[%s8446_s28 + $0x38] sm:$0xff]  ;;  %v376_v2 = vld [vmem:[%s8446_s28 + $0x30] sm:$0xff]  ;;  %v374_v4 = vld [vmem:[%s8446_s28 + $0x20] sm:$0xff]  ;;  %v574_v9 = vsel %vm572_vm2, %v559_v6, 0  ;;  %vm937_vm12 = vcmask 130048  }
  0x5f   :  { %343 = vst.msk [vmem:[#allocation2 + $0x20] sm:$0xff] %vm338_vm0, %v7109_v0  ;;  %388 = vrot.lane.b32.xlu0 %v377_v1, %s7110_s15  ;;  %386 = vrot.lane.b32.xlu1 %v376_v2, %s7110_s15  ;;  %v375_v7 = vld [vmem:[%s8446_s28 + $0x28] sm:$0xff]  ;;  %v352_v8 = vld [vmem:[%s8446_s28 + $0x18] sm:$0xff]  ;;  %v627_v48 = vpack.c.b16 %v620_v47, %v620_v47  ;;  %v717_v58 = vld [vmem:[#allocation7 + $0x98] sm:$0x7]  ;;  %vm995_vm13 = vcmask 1042496  }
  0x60   :  { %344 = vst.msk [vmem:[#allocation2 + $0x28] sm:$0xff] %vm338_vm0, %v7109_v0  ;;  %382 = vrot.lane.b32.xlu2 %v374_v4, %s7110_s15  ;;  %577 = vmatpush.bf16.msra.mxu2 %v574_v9  ;;  %v350_v11 = vld [vmem:[%s8446_s28 + $0x8] sm:$0xff]  ;;  %v351_v13 = vld [vmem:[%s8446_s28 + $0x10] sm:$0xff]  ;;  %v349_v14 = vld [vmem:[%s8446_s28] sm:$0xff]  ;;  %v743_v59 = vunpack.c.l.b16 %v717_v58  ;;  %vm997_vm14 = vcmask 59392   ;;  %vm971_vm15 = vcmask 1040448  }
  0x61   :  { %345 = vst.msk [vmem:[#allocation2 + $0x30] sm:$0xff] %vm338_vm0, %v7109_v0  ;;  %v6297_v42 = vld [vmem:[%s8447_s10] sm:$0xff]  ;;  %v6305_v43 = vld [vmem:[%s8447_s10 + $0x10] sm:$0xff]  ;;  %v6298_v44 = vld [vmem:[%s8447_s10 + $0x8] sm:$0xff]  ;;  %v641_v49 = vsel %vm572_vm2, %v627_v48, 0  ;;  %vm967_vm1 = vcmask 1047616  }
  0x62   :  { %936 = vst [vmem:[#allocation3] sm:$0xff] %v7109_v0  ;;  %v6306_v45 = vld [vmem:[%s8447_s10 + $0x18] sm:$0xff]  ;;  %644 = vmatpush.bf16.msra.mxu3 %v641_v49  ;;  %v6313_v52 = vld [vmem:[%s8447_s10 + $0x20] sm:$0xff]  ;;  %v6314_v54 = vld [vmem:[%s8447_s10 + $0x28] sm:$0xff]  ;;  %v750_v60 = vpack.c.b16 %v743_v59, %v743_v59  ;;  %s8449_s16 = sld [smem:[#allocation52_spill]]  ;;  %s7114_s20 = smov [#allocation34]  }
  0x63   :  { %939 = vst [vmem:[#allocation3 + $0x10] sm:$0xff] %v7109_v0  ;;  %v6299_v57 = vld [vmem:[#allocation7] sm:$0xff]  ;;  %v6320_v62 = vld [vmem:[#allocation7 + $0x90] sm:$0xff]  ;;  %v6319_v63 = vld [vmem:[#allocation7 + $0x88] sm:$0xff]  ;;  %s8450_s19 = sld [smem:[#allocation53_spill]]  ;;  %s4955_s26 = sshll.u32 %s7114_s20, 4  ;;  %s4956_s26 = int_to_ptr.vmem [resolvable:$true] %s4955_s26 }
  0x64   :  { %941 = vst [vmem:[#allocation3 + $0x20] sm:$0xff] %v7109_v0  ;;  %578 = vmatpush.bf16.msra.mxu2 %v6312_v10  ;;  %v764_v61 = vsel %vm572_vm2, %v750_v60, 0  ;;  %v6318_v1 = vld [vmem:[#allocation7 + $0x80] sm:$0xff]  ;;  %v6317_v2 = vld [vmem:[#allocation7 + $0x78] sm:$0xff]  ;;  %v6316_v5 = vld [vmem:[#allocation7 + $0x70] sm:$0xff]  ;;  %s8451_s22 = sld [smem:[#allocation54_spill]] }
  0x65   :  { %943 = vst [vmem:[#allocation3 + $0x30] sm:$0xff] %v7109_v0  ;;  %v6315_v6 = vld [vmem:[#allocation7 + $0x68] sm:$0xff] }
  0x66   :  { %945 = vst [vmem:[#allocation3 + $0x40] sm:$0xf] %v7109_v0  ;;  %645 = vmatpush.bf16.msra.mxu3 %v6304_v50  ;;  %v6616_v58 = vld [vmem:[%s8448_s0] ss:$0 sm:$0xff] }
  0x67   :  { %1786 = vst [vmem:[#allocation4] sm:$0xff] %v7109_v0  ;;  %384 = vrot.lane.b32.xlu0 %v375_v7, %s7110_s15  ;;  %363 = vrot.lane.b32.xlu1 %v352_v8, %s7110_s15 }
  0x68   :  { %1789 = vst [vmem:[#allocation4 + $0x10] sm:$0xff] %v7109_v0  ;;  %359 = vrot.lane.b32.xlu2 %v350_v11, %s7110_s15  ;;  %579 = vmatpush.bf16.msra.mxu2 %v6311_v12 }
  0x69   :  { %1791 = vst [vmem:[#allocation4 + $0x20] sm:$0xf] %v7109_v0 }
  0x6a   :  { %2584 = vst [vmem:[#allocation5] sm:$0xff] %v7109_v0  ;;  %646 = vmatpush.bf16.msra.mxu3 %v6303_v51 }
  0x6b   :  { %2587 = vst [vmem:[#allocation5 + $0x10] sm:$0xf] %v7109_v0 }
  0x6c   :  { %3887 = vst [vmem:[#allocation6] sm:$0xff] %v7109_v0  ;;  %580 = vmatpush.bf16.msra.mxu2 %v6310_v15 }
  0x6d   :  { %3888 = vst [vmem:[#allocation6 + $0x8] sm:$0xff] %v7109_v0 }
  0x6e   :  { %3890 = vst [vmem:[#allocation6 + $0x18] sm:$0x3] %v7109_v0  ;;  %647 = vmatpush.bf16.msra.mxu3 %v6302_v53 }
  0x6f   :  { %3891 = vst [vmem:[#allocation6 + $0x20] sm:$0x3] %v7109_v0  ;;  %361 = vrot.lane.b32.xlu0 %v351_v13, %s7110_s15  ;;  %357 = vrot.lane.b32.xlu1 %v349_v14, %s7110_s15 }
  0x70   :  { %581 = vmatpush.bf16.msra.mxu2 %v6309_v16  ;;  %947 = vst.msk [vmem:[#allocation3 + $0x48] sm:$0xf] %vm946_vm6, %v7109_v0  ;;  %vm989_vm6 = vcmask 1047619  }
  0x71   :  { %942 = vst.msk [vmem:[#allocation3 + $0x28] sm:$0xff] %vm937_vm12, %v7109_v0 }
  0x72   :  { %648 = vmatpush.bf16.msra.mxu3 %v6301_v55  ;;  %938 = vst.msk [vmem:[#allocation3 + $0x8] sm:$0xff] %vm937_vm12, %v7109_v0 }
  0x73   :  { %940 = vst.msk [vmem:[#allocation3 + $0x18] sm:$0xff] %vm937_vm12, %v7109_v0 }
  0x74   :  { %582 = vmatpush.bf16.msra.mxu2 %v6308_v17  ;;  %944 = vst.msk [vmem:[#allocation3 + $0x38] sm:$0xff] %vm937_vm12, %v7109_v0 }
  0x76   :  { %649 = vmatpush.bf16.msra.mxu3 %v6300_v56 }
  0x78   :  { %583 = vmatpush.bf16.msra.mxu2 %v6307_v19 }
  0x7a   :  { %650 = vmatpush.bf16.msra.mxu3 %v6299_v57 }
  0xba   :  { %v383_v18 = vpop.permute.xlu2 %382 }
  0xbb   :  { %394 = vst.msk [vmem:[#allocation2 + $0x23] sm:$0xff] %vm369_vm3, %v383_v18  ;;  %v6321_v18 = vld [vmem:[%s8447_s10 + $0x30] sm:$0xff] }
  0xc2   :  { %v360_v20 = vpop.permute.xlu2 %359 }
  0xc3   :  { %371 = vst.msk [vmem:[#allocation2 + $0x9] sm:$0xff] %vm369_vm3, %v360_v20 }
  0xd1   :  { %v389_v21 = vpop.permute.xlu0 %388  ;;  %v387_v22 = vpop.permute.xlu1 %386 }
  0xd2   :  { %397 = vst.msk [vmem:[#allocation2 + $0x3b] sm:$0xff] %vm369_vm3, %v389_v21 }
  0xd3   :  { %396 = vst.msk [vmem:[#allocation2 + $0x33] sm:$0xff] %vm369_vm3, %v387_v22  ;;  %v6322_v22 = vld [vmem:[%s8447_s10 + $0x38] sm:$0xff] }
  0xd9   :  { %v385_v23 = vpop.permute.xlu0 %384  ;;  %v364_v24 = vpop.permute.xlu1 %363  ;;  %v406_v25 = vld [vmem:[#allocation2 + $0x40] sm:$0xf] }
  0xda   :  { %395 = vst.msk [vmem:[#allocation2 + $0x2b] sm:$0xff] %vm369_vm3, %v385_v23  ;;  %v411_v26 = vpack.c.bf16 %v406_v25, %v406_v25  ;;  %v405_v31 = vld [vmem:[#allocation2 + $0x38] sm:$0xff]  ;;  %v844_v25 = vld [vmem:[#allocation7 + $0xcc] sm:$0x7] }
  0xdb   :  { %373 = vst.msk [vmem:[#allocation2 + $0x19] sm:$0xff] %vm369_vm3, %v364_v24 }
  0xdc   :  { %v435_v27 = vsel %vm433_vm4, %v411_v26, 0  ;;  %v870_v26 = vunpack.c.l.b16 %v844_v25 }
  0xdd   :  { %440 = vmatpush.bf16.msra.mxu0 %v435_v27  ;;  %495 = vmatpush.bf16.msra.mxu1 %v435_v27 }
  0xde   :  { %813 = vmatpush.bf16.msrb.mxu2 %v435_v27 }
  0xe1   :  { %v362_v28 = vpop.permute.xlu0 %361  ;;  %v358_v29 = vpop.permute.xlu1 %357  ;;  %v404_v30 = vld [vmem:[#allocation2 + $0x30] sm:$0xff]  ;;  %v403_v34 = vld [vmem:[#allocation2 + $0x28] sm:$0xff] }
  0xe2   :  { %372 = vst.msk [vmem:[#allocation2 + $0x11] sm:$0xff] %vm369_vm3, %v362_v28  ;;  %v410_v32 = vpack.c.bf16 %v405_v31, %v404_v30  ;;  %v402_v33 = vld [vmem:[#allocation2 + $0x20] sm:$0xff]  ;;  %v6327_v30 = vld [vmem:[#allocation7 + $0xbc] sm:$0xff]  ;;  %v6326_v31 = vld [vmem:[#allocation7 + $0xb4] sm:$0xff] }
  0xe3   :  { %370 = vst.msk [vmem:[#allocation2 + $0x1] sm:$0xff] %vm369_vm3, %v358_v29  ;;  %v409_v35 = vpack.c.bf16 %v403_v34, %v402_v33  ;;  %v6328_v29 = vld [vmem:[#allocation7 + $0xc4] sm:$0xff]  ;;  %vm963_vm3 = vcmask 1047617  }
  0xe4   :  { %441 = vmatpush.bf16.msra.mxu0 %v410_v32  ;;  %496 = vmatpush.bf16.msra.mxu1 %v410_v32  ;;  %v6324_v34 = vld [vmem:[#allocation7 + $0xa4] sm:$0xff] }
  0xe5   :  { %814 = vmatpush.bf16.msrb.mxu2 %v410_v32 }
  0xe8   :  { %442 = vmatpush.bf16.msra.mxu0 %v409_v35  ;;  %497 = vmatpush.bf16.msra.mxu1 %v409_v35 }
  0xe9   :  { %815 = vmatpush.bf16.msrb.mxu2 %v409_v35  ;;  %v400_v36 = vld [vmem:[#allocation2 + $0x10] sm:$0xff]  ;;  %v401_v37 = vld [vmem:[#allocation2 + $0x18] sm:$0xff] }
  0xea   :  { %v408_v38 = vpack.c.bf16 %v401_v37, %v400_v36  ;;  %v398_v39 = vld [vmem:[#allocation2] sm:$0xff]  ;;  %v399_v40 = vld [vmem:[#allocation2 + $0x8] sm:$0xff] }
  0xeb   :  { %v407_v41 = vpack.c.bf16 %v399_v40, %v398_v39 }
  0xec   :  { %443 = vmatpush.bf16.msra.mxu0 %v408_v38  ;;  %498 = vmatpush.bf16.msra.mxu1 %v408_v38 }
  0xed   :  { %816 = vmatpush.bf16.msrb.mxu2 %v408_v38 }
  0xf0   :  { %444 = vmatpush.bf16.msra.mxu0 %v407_v41  ;;  %499 = vmatpush.bf16.msra.mxu1 %v407_v41 }
  0xf1   :  { %817 = vmatpush.bf16.msrb.mxu2 %v407_v41 }
  0xf3   :  { %4983 = vmatmul.msk.bf16.vlgmr.msra.gmra.mxu0 %vm426_vm5, %v6297_v42  ;;  %4997 = vmatmul.msk.bf16.vlgmr.msra.gmra.mxu1 %vm426_vm5, %v6305_v43 }
  0xf4   :  { %686 = vmatpush.bf16.msrb.mxu0 %v435_v27  ;;  %767 = vmatpush.bf16.msrb.mxu1 %v764_v61  ;;  %v877_v27 = vpack.c.b16 %v870_v26, %v870_v26 }
  0xf6   :  { %v891_v28 = vsel %vm572_vm2, %v877_v27, 0 }
  0xf7   :  { %894 = vmatpush.bf16.msrb.mxu3 %v891_v28 }
  0xf8   :  { %687 = vmatpush.bf16.msrb.mxu0 %v410_v32  ;;  %768 = vmatpush.bf16.msrb.mxu1 %v6320_v62  ;;  %v6325_v32 = vld [vmem:[#allocation7 + $0xac] sm:$0xff] }
  0xfb   :  { %895 = vmatpush.bf16.msrb.mxu3 %v6328_v29 }
  0xfc   :  { %688 = vmatpush.bf16.msrb.mxu0 %v409_v35  ;;  %769 = vmatpush.bf16.msrb.mxu1 %v6319_v63  ;;  %v6323_v35 = vld [vmem:[#allocation7 + $0x9c] sm:$0xff] }
  0xff   :  { %896 = vmatpush.bf16.msrb.mxu3 %v6327_v30 }
 0x100   :  { %689 = vmatpush.bf16.msrb.mxu0 %v408_v38  ;;  %770 = vmatpush.bf16.msrb.mxu1 %v6318_v1 }
 0x103   :  { %4984 = vmatmul.msk.bf16.gmra.mxu0 %vm426_vm5, %v6298_v44  ;;  %4998 = vmatmul.msk.bf16.gmra.mxu1 %vm426_vm5, %v6306_v45 }
 0x104   :  { %690 = vmatpush.bf16.msrb.mxu0 %v407_v41  ;;  %771 = vmatpush.bf16.msrb.mxu1 %v6317_v2 }
 0x105   :  { %897 = vmatpush.bf16.msrb.mxu3 %v6326_v31 }
 0x108   :  { %772 = vmatpush.bf16.msrb.mxu1 %v6316_v5 }
 0x109   :  { %898 = vmatpush.bf16.msrb.mxu3 %v6325_v32 }
 0x10c   :  { %773 = vmatpush.bf16.msrb.mxu1 %v6315_v6 }
 0x10d   :  { %899 = vmatpush.bf16.msrb.mxu3 %v6324_v34 }
 0x111   :  { %900 = vmatpush.bf16.msrb.mxu3 %v6323_v35 }
 0x113   :  { %5063 = vmatmul.msk.bf16.vlgmr.msrb.gmra.mxu0 %vm426_vm5, %v6313_v52 }
 0x123   :  { %5064 = vmatmul.msk.bf16.gmra.mxu0 %vm426_vm5, %v6314_v54 }
 0x170   :  { %v446_v3 = vpop.f32.mrf.mxu0  ;;  %v501_v4 = vpop.f32.mrf.mxu1 }
 0x178   :  { %v448_v7 = vpop.f32.mrf.mxu0  ;;  %v503_v8 = vpop.f32.mrf.mxu1 }
 0x179   :  { %v456_v9 = vpack.c.bf16 %v448_v7, %v446_v3  ;;  %v511_v10 = vpack.c.bf16 %v503_v8, %v501_v4 }
 0x17b   :  { %5023 = vmatmul.msk.bf16.vlgmr.msra.gmra.mxu2 %vm338_vm0, %v511_v10  ;;  %5049 = vmatmul.msk.bf16.vlgmr.msra.gmra.mxu3 %vm338_vm0, %v456_v9 }
 0x180   :  { %v451_v11 = vpop.f32.mrf.mxu0  ;;  %v506_v12 = vpop.f32.mrf.mxu1 }
 0x188   :  { %v453_v13 = vpop.f32.mrf.mxu0  ;;  %v508_v14 = vpop.f32.mrf.mxu1 }
 0x189   :  { %v457_v15 = vpack.c.bf16 %v453_v13, %v451_v11  ;;  %v512_v16 = vpack.c.bf16 %v508_v14, %v506_v12 }
 0x18b   :  { %5024 = vmatmul.msk.bf16.gmra.mxu2 %vm338_vm0, %v512_v16  ;;  %5050 = vmatmul.msk.bf16.gmra.mxu3 %vm338_vm0, %v457_v15 }
 0x190   :  { %v692_v17 = vpop.f32.mrf.mxu0 }
 0x198   :  { %v694_v19 = vpop.f32.mrf.mxu0 }
 0x199   :  { %v702_v20 = vpack.c.bf16 %v694_v19, %v692_v17 }
 0x19b   :  { %5089 = vmatmul.msk.bf16.vlgmr.msrb.gmra.mxu1 %vm338_vm0, %v702_v20  ;;  %5103 = vmatmul.msk.bf16.vlgmr.msrb.gmra.mxu2 %vm426_vm5, %v6321_v18 }
 0x1a0   :  { %v697_v21 = vpop.f32.mrf.mxu0 }
 0x1a8   :  { %v699_v23 = vpop.f32.mrf.mxu0 }
 0x1a9   :  { %v703_v24 = vpack.c.bf16 %v699_v23, %v697_v21 }
 0x1ab   :  { %5090 = vmatmul.msk.bf16.gmra.mxu1 %vm338_vm0, %v703_v24  ;;  %5104 = vmatmul.msk.bf16.gmra.mxu2 %vm426_vm5, %v6322_v22  ;;  %vm965_vm5 = vcmask 64513  }
 0x1fe   :  { %v585_v33 = vpop.f32.mrf.mxu2  ;;  %v652_v45 = vpop.f32.mrf.mxu3 }
 0x1ff   :  { %v653_v52 = vadd.f32 %v652_v45, %v585_v33 }
 0x206   :  { %v587_v36 = vpop.f32.mrf.mxu2  ;;  %v654_v46 = vpop.f32.mrf.mxu3 }
 0x207   :  { %v655_v53 = vadd.f32 %v654_v46, %v587_v36 }
 0x20e   :  { %v590_v37 = vpop.f32.mrf.mxu2  ;;  %v657_v47 = vpop.f32.mrf.mxu3 }
 0x20f   :  { %v658_v62 = vadd.f32 %v657_v47, %v590_v37 }
 0x216   :  { %v592_v38 = vpop.f32.mrf.mxu2  ;;  %v659_v49 = vpop.f32.mrf.mxu3 }
 0x217   :  { %v660_v10 = vadd.f32 %v659_v49, %v592_v38  ;;  %v6348_v49 = vld [vmem:[#allocation12 + $0x88] sm:$0xff] }
 0x218   :  { %v775_v48 = vpop.f32.mrf.mxu1 }
 0x219   :  { %v785_v54 = vadd.f32 %v775_v48, %v653_v52  ;;  %v6329_v48 = vld [vmem:[#allocation10] sm:$0xff]  ;;  %v6336_v52 = vld [vmem:[#allocation12 + $0x30] sm:$0xff] }
 0x21e   :  { %v819_v39 = vpop.f32.mrf.mxu2 }
 0x220   :  { %v777_v50 = vpop.f32.mrf.mxu1 }
 0x221   :  { %v786_v55 = vadd.f32 %v777_v50, %v655_v53  ;;  %v6339_v50 = vld [vmem:[#allocation10 + $0x8] sm:$0xff] }
 0x222   :  { %v6335_v53 = vld [vmem:[#allocation12 + $0x28] sm:$0xff] }
 0x226   :  { %v821_v40 = vpop.f32.mrf.mxu2 }
 0x227   :  { %v829_v41 = vpack.c.bf16 %v821_v40, %v819_v39 }
 0x228   :  { %v780_v60 = vpop.f32.mrf.mxu1 }
 0x229   :  { %5129 = vmatmul.msk.bf16.vlgmr.msrb.gmra.mxu3 %vm338_vm0, %v829_v41  ;;  %v787_v2 = vadd.f32 %v780_v60, %v658_v62  ;;  %v6330_v60 = vld [vmem:[#allocation12] sm:$0xff]  ;;  %v6345_v62 = vld [vmem:[#allocation12 + $0x70] sm:$0xff] }
 0x22e   :  { %v824_v42 = vpop.f32.mrf.mxu2 }
 0x230   :  { %v782_v9 = vpop.f32.mrf.mxu1 }
 0x231   :  { %v788_v13 = vadd.f32 %v782_v9, %v660_v10 }
 0x236   :  { %v826_v43 = vpop.f32.mrf.mxu2 }
 0x237   :  { %v830_v44 = vpack.c.bf16 %v826_v43, %v824_v42 }
 0x239   :  { %5130 = vmatmul.msk.bf16.gmra.mxu3 %vm338_vm0, %v830_v44  ;;  %vm973_vm0 = vcmask 57344  }
 0x2ac   :  { %v902_v51 = vpop.f32.mrf.mxu3 }
 0x2ad   :  { %v912_v57 = vadd.f32 %v902_v51, %v785_v54  ;;  %v6337_v51 = vld [vmem:[#allocation12 + $0x38] sm:$0xff]  ;;  %v6349_v54 = vld [vmem:[#allocation10 + $0x10] sm:$0xff] }
 0x2af   :  { %v920_v63 = vadd.f32 %v6616_v58, %v912_v57  ;;  %v6333_v57 = vld [vmem:[#allocation12 + $0x18] sm:$0xff] }
 0x2b1   :  { %v928_v7 = vmul.f32 0.2, %v920_v63  ;;  %vm924_vm8 = vcmp.ge.f32.partialorder %v920_v63, 0.0 }
 0x2b3   :  { %v932_v11 = vsel %vm924_vm8, %v920_v63, %v928_v7  ;;  %vm1022_vm8 = vcmask 293888   ;;  %v6359_v63 = vld [vmem:[#allocation10 + $0x18] sm:$0xff] }
 0x2b4   :  { %v904_v56 = vpop.f32.mrf.mxu3  ;;  %v951_v16 = vrot.slane %v932_v11, 7 }
 0x2b5   :  { %v913_v59 = vadd.f32 %v904_v56, %v786_v55  ;;  %v6347_v55 = vld [vmem:[#allocation12 + $0x80] sm:$0xff] }
 0x2b6   :  { %1197 = vmatpush.bf16.msra.mxu0 %v6347_v55  ;;  %v6334_v56 = vld [vmem:[#allocation12 + $0x20] sm:$0xff] }
 0x2b7   :  { %v921_v61 = vadd.f32 %v6616_v58, %v913_v59  ;;  %v6331_v59 = vld [vmem:[#allocation12 + $0x8] sm:$0xff] }
 0x2b9   :  { %vm925_vm7 = vcmp.ge.f32.partialorder %v921_v61, 0.0  ;;  %v929_v1 = vmul.f32 0.2, %v921_v61 }
 0x2bb   :  { %v933_v3 = vsel %vm925_vm7, %v921_v61, %v929_v1  ;;  %vm991_vm7 = vcmask 64515   ;;  %v6346_v61 = vld [vmem:[#allocation12 + $0x78] sm:$0xff]  ;;  %v6344_v1 = vld [vmem:[#allocation12 + $0x68] sm:$0xff] }
 0x2bc   :  { %v907_v4 = vpop.f32.mrf.mxu3  ;;  %v952_v5 = vrot.slane %v933_v3, 7  ;;  %1198 = vmatpush.bf16.msra.mxu0 %v6346_v61  ;;  %v6342_v3 = vld [vmem:[#allocation12 + $0x58] sm:$0xff]  ;;  %v1613_v61 = vld [vmem:[#allocation13 + $0x48] sm:$0xff] }
 0x2bd   :  { %v914_v6 = vadd.f32 %v907_v4, %v787_v2  ;;  %v6343_v2 = vld [vmem:[#allocation12 + $0x60] sm:$0xff]  ;;  %v6341_v4 = vld [vmem:[#allocation12 + $0x50] sm:$0xff] }
 0x2be   :  { %958 = vrot.lane.b32.xlu0 %v952_v5, %s7089_s29  ;;  %v953_v23 = vsel %vm950_vm11, %v951_v16, %v952_v5  ;;  %v6340_v5 = vld [vmem:[#allocation12 + $0x48] sm:$0xff] }
 0x2bf   :  { %v922_v8 = vadd.f32 %v6616_v58, %v914_v6  ;;  %v6338_v6 = vld [vmem:[#allocation12 + $0x40] sm:$0xff] }
 0x2c0   :  { %1199 = vmatpush.bf16.msra.mxu0 %v6345_v62  ;;  %v1612_v62 = vld [vmem:[#allocation13 + $0x40] sm:$0xff] }
 0x2c1   :  { %vm926_vm9 = vcmp.ge.f32.partialorder %v922_v8, 0.0  ;;  %v930_v12 = vmul.f32 0.2, %v922_v8 }
 0x2c3   :  { %v934_v14 = vsel %vm926_vm9, %v922_v8, %v930_v12 }
 0x2c4   :  { %v909_v15 = vpop.f32.mrf.mxu3  ;;  %v977_v17 = vrot.slane %v934_v14, 5  ;;  %1200 = vmatpush.bf16.msra.mxu0 %v6344_v1  ;;  %v1611_v1 = vld [vmem:[#allocation13 + $0x38] sm:$0xff] }
 0x2c5   :  { %v915_v18 = vadd.f32 %v909_v15, %v788_v13  ;;  %v6358_v13 = vld [vmem:[#allocation12 + $0xd0] sm:$0xff] }
 0x2c6   :  { %954 = vrot.lane.b32.xlu0 %v951_v16, %s7089_s29  ;;  %980 = vrot.lane.b32.xlu1 %v977_v17, %s7089_s29  ;;  %v6357_v16 = vld [vmem:[#allocation12 + $0xc8] sm:$0xff] }
 0x2c7   :  { %v923_v19 = vadd.f32 %v6616_v58, %v915_v18  ;;  %v6332_v58 = vld [vmem:[#allocation12 + $0x10] sm:$0xff] }
 0x2c8   :  { %1201 = vmatpush.bf16.msra.mxu0 %v6343_v2  ;;  %v1610_v2 = vld [vmem:[#allocation13 + $0x30] sm:$0xff] }
 0x2c9   :  { %vm927_vm10 = vcmp.ge.f32.partialorder %v923_v19, 0.0  ;;  %v931_v20 = vmul.f32 0.2, %v923_v19 }
 0x2cb   :  { %v935_v21 = vsel %vm927_vm10, %v923_v19, %v931_v20 }
 0x2cc   :  { %v978_v22 = vrot.slane %v935_v21, 5  ;;  %1202 = vmatpush.bf16.msra.mxu0 %v6342_v3  ;;  %v1609_v3 = vld [vmem:[#allocation13 + $0x28] sm:$0xff] }
 0x2ce   :  { %984 = vrot.lane.b32.xlu2 %v978_v22, %s7089_s29  ;;  %956 = vrot.lane.b32.xlu1 %v953_v23, %s7089_s29  ;;  %v979_v24 = vsel %vm572_vm2, %v977_v17, %v978_v22  ;;  %vm969_vm2 = vcmask 64512  }
 0x2d0   :  { %1203 = vmatpush.bf16.msra.mxu0 %v6341_v4 }
 0x2d4   :  { %1204 = vmatpush.bf16.msra.mxu0 %v6340_v5  ;;  %v1608_v5 = vld [vmem:[#allocation13 + $0x20] sm:$0xff] }
 0x2d6   :  { %982 = vrot.lane.b32.xlu2 %v979_v24, %s7089_s29  ;;  %v6356_v24 = vld [vmem:[#allocation12 + $0xc0] sm:$0xff] }
 0x2d8   :  { %1303 = vmatpush.bf16.msrb.mxu0 %v6338_v6  ;;  %v1607_v6 = vld [vmem:[#allocation13 + $0x18] sm:$0xff] }
 0x328   :  { %v985_v25 = vpop.permute.xlu2 %984 }
 0x329   :  { %996 = vst.msk [vmem:[#allocation3 + $0x40] sm:$0x7] %vm995_vm13, %v985_v25 }
 0x32a   :  { %998 = vst.msk [vmem:[#allocation3 + $0x48] sm:$0x7] %vm997_vm14, %v985_v25  ;;  %v6367_v25 = vld [vmem:[#allocation12 + $0x110] sm:$0xff]  ;;  %vm1787_vm14 = vcmask 261120  }
 0x330   :  { %v959_v26 = vpop.permute.xlu0 %958  ;;  %v983_v27 = vpop.permute.xlu2 %982  ;;  %v1007_v28 = vld [vmem:[#allocation3 + $0x40] sm:$0xf] }
 0x331   :  { %972 = vst.msk [vmem:[#allocation3 + $0x20] sm:$0x1] %vm971_vm15, %v959_v26  ;;  %v1013_v29 = vpack.c.bf16 %v1007_v28, %v1007_v28  ;;  %v1008_v30 = vld [vmem:[#allocation3 + $0x48] sm:$0xf]  ;;  %vm1792_vm15 = vcmask 257024  }
 0x332   :  { %974 = vst.msk [vmem:[#allocation3 + $0x28] sm:$0x1] %vm973_vm0, %v959_v26  ;;  %v1014_v31 = vpack.c.bf16 %v1008_v30, %v1008_v30  ;;  %v6355_v26 = vld [vmem:[#allocation12 + $0xb8] sm:$0xff]  ;;  %v6366_v28 = vld [vmem:[#allocation12 + $0x108] sm:$0xff]  ;;  %v6365_v30 = vld [vmem:[#allocation12 + $0x100] sm:$0xff] }
 0x333   :  { %993 = vst.msk [vmem:[#allocation3 + $0x30] sm:$0xff] %vm967_vm1, %v983_v27  ;;  %v7469_v0 = vsel %vm433_vm4, %v1013_v29, 0  ;;  %v6354_v29 = vld [vmem:[#allocation12 + $0xb0] sm:$0xff] }
 0x334   :  { %994 = vst.msk [vmem:[#allocation3 + $0x38] sm:$0xff] %vm969_vm2, %v983_v27  ;;  %1037 = vmatpush.bf16.msra.mxu2 %v7469_v0  ;;  %v1030_v32 = vsel %vm433_vm4, %v1014_v31, 0  ;;  %v6368_v31 = vld [vmem:[#allocation12 + $0x118] sm:$0xff] }
 0x335   :  { %1051 = vmatpush.bf16.msra.mxu1 %v1030_v32  ;;  %1110 = vmatpush.bf16.msra.mxu3 %v1030_v32 }
 0x338   :  { %v955_v33 = vpop.permute.xlu0 %954  ;;  %v981_v34 = vpop.permute.xlu1 %980 }
 0x339   :  { %964 = vst.msk [vmem:[#allocation3] sm:$0xfe] %vm963_vm3, %v955_v33  ;;  %vm1816_vm3 = vcmask 1042560  }
 0x33a   :  { %966 = vst.msk [vmem:[#allocation3 + $0x8] sm:$0xfe] %vm965_vm5, %v955_v33  ;;  %v1005_v37 = vld [vmem:[#allocation3 + $0x30] sm:$0xff]  ;;  %vm1818_vm5 = vcmask 124928  }
 0x33b   :  { %990 = vst.msk [vmem:[#allocation3 + $0x20] sm:$0xf8] %vm989_vm6, %v981_v34  ;;  %v1006_v40 = vld [vmem:[#allocation3 + $0x38] sm:$0xff]  ;;  %vm1799_vm6 = vcmask 1047681  }
 0x33c   :  { %992 = vst.msk [vmem:[#allocation3 + $0x28] sm:$0xf8] %vm991_vm7, %v981_v34  ;;  %v6364_v34 = vld [vmem:[#allocation12 + $0xf8] sm:$0xff]  ;;  %vm1801_vm7 = vcmask 130049  }
 0x340   :  { %v957_v35 = vpop.permute.xlu1 %956  ;;  %v999_v42 = vld [vmem:[#allocation3] sm:$0xff] }
 0x341   :  { %968 = vst.msk [vmem:[#allocation3 + $0x10] sm:$0xff] %vm967_vm1, %v957_v35  ;;  %v1000_v45 = vld [vmem:[#allocation3 + $0x8] sm:$0xff]  ;;  %vm1812_vm1 = vcmask 1047683  }
 0x342   :  { %970 = vst.msk [vmem:[#allocation3 + $0x18] sm:$0xff] %vm969_vm2, %v957_v35  ;;  %v1003_v36 = vld [vmem:[#allocation3 + $0x20] sm:$0xff]  ;;  %vm1814_vm2 = vcmask 130051  }
 0x343   :  { %v1011_v38 = vpack.c.bf16 %v1005_v37, %v1003_v36  ;;  %v1004_v39 = vld [vmem:[#allocation3 + $0x28] sm:$0xff]  ;;  %v6352_v35 = vld [vmem:[#allocation12 + $0xa0] sm:$0xff]  ;;  %v6363_v36 = vld [vmem:[#allocation12 + $0xf0] sm:$0xff] }
 0x344   :  { %v1012_v41 = vpack.c.bf16 %v1006_v40, %v1004_v39  ;;  %v6351_v37 = vld [vmem:[#allocation12 + $0x98] sm:$0xff]  ;;  %v6350_v39 = vld [vmem:[#allocation12 + $0x90] sm:$0xff]  ;;  %v6361_v40 = vld [vmem:[#allocation12 + $0xe0] sm:$0xff] }
 0x345   :  { %1038 = vmatpush.bf16.msra.mxu2 %v1011_v38 }
 0x346   :  { %1052 = vmatpush.bf16.msra.mxu1 %v1012_v41  ;;  %1111 = vmatpush.bf16.msra.mxu3 %v1012_v41 }
 0x348   :  { %v1001_v43 = vld [vmem:[#allocation3 + $0x10] sm:$0xff] }
 0x349   :  { %v1009_v44 = vpack.c.bf16 %v1001_v43, %v999_v42  ;;  %v1002_v46 = vld [vmem:[#allocation3 + $0x18] sm:$0xff] }
 0x34a   :  { %v1010_v47 = vpack.c.bf16 %v1002_v46, %v1000_v45 }
 0x34b   :  { %1039 = vmatpush.bf16.msra.mxu2 %v1009_v44 }
 0x34c   :  { %1053 = vmatpush.bf16.msra.mxu1 %v1010_v47  ;;  %1112 = vmatpush.bf16.msra.mxu3 %v1010_v47 }
 0x34e   :  { %5135 = vmatmul.msk.bf16.vlgmr.msra.gmra.mxu2 %vm1022_vm8, %v6329_v48 }
 0x34f   :  { %1096 = vmatpush.bf16.msrb.mxu2 %v7469_v0  ;;  %5142 = vmatmul.msk.bf16.vlgmr.msra.gmra.mxu3 %vm1022_vm8, %v6339_v50 }
 0x350   :  { %1340 = vmatpush.bf16.msrb.mxu3 %v1030_v32  ;;  %1218 = vmatpush.bf16.msrb.mxu1 %v6348_v49 }
 0x351   :  { %5136 = vmatmul.msk.bf16.vlgmr.msra.gmra.mxu1 %vm1022_vm8, %v6329_v48 }
 0x353   :  { %1097 = vmatpush.bf16.msrb.mxu2 %v1011_v38 }
 0x354   :  { %1326 = vmatpush.bf16.msra.mxu1 %v7469_v0  ;;  %1341 = vmatpush.bf16.msrb.mxu3 %v1012_v41 }
 0x357   :  { %1098 = vmatpush.bf16.msrb.mxu2 %v1009_v44 }
 0x358   :  { %1327 = vmatpush.bf16.msra.mxu1 %v1011_v38  ;;  %1342 = vmatpush.bf16.msrb.mxu3 %v1010_v47 }
 0x35b   :  { %1282 = vmatpush.bf16.msra.mxu2 %v6337_v51 }
 0x35c   :  { %1487 = vmatpush.bf16.msra.mxu3 %v1030_v32  ;;  %1328 = vmatpush.bf16.msra.mxu1 %v1009_v44 }
 0x35e   :  { %5141 = vmatmul.msk.bf16.vlgmr.msrb.gmra.mxu2 %vm1022_vm8, %v6339_v50 }
 0x35f   :  { %1283 = vmatpush.bf16.msra.mxu2 %v6336_v52  ;;  %5222 = vmatmul.msk.bf16.vlgmr.msrb.gmra.mxu3 %vm1022_vm8, %v6349_v54 }
 0x360   :  { %1488 = vmatpush.bf16.msra.mxu3 %v1012_v41  ;;  %v6360_v41 = vld [vmem:[#allocation12 + $0xd8] sm:$0xff] }
 0x363   :  { %1284 = vmatpush.bf16.msra.mxu2 %v6335_v53  ;;  %v1619_v53 = vld [vmem:[#allocation13 + $0x78] sm:$0xff] }
 0x364   :  { %1489 = vmatpush.bf16.msra.mxu3 %v1010_v47 }
 0x367   :  { %1285 = vmatpush.bf16.msra.mxu2 %v6334_v56  ;;  %v1617_v56 = vld [vmem:[#allocation13 + $0x68] sm:$0xff] }
 0x368   :  { %1629 = vmatpush.msrb.mxu3 %v1619_v53 }
 0x36b   :  { %1286 = vmatpush.bf16.msra.mxu2 %v6333_v57  ;;  %v1616_v57 = vld [vmem:[#allocation13 + $0x60] sm:$0xff] }
 0x36f   :  { %1287 = vmatpush.bf16.msra.mxu2 %v6332_v58  ;;  %5265 = vmatmul.msk.bf16.vlgmr.msra.gmra.mxu3 %vm1022_vm8, %v6359_v63  ;;  %v1615_v58 = vld [vmem:[#allocation13 + $0x58] sm:$0xff] }
 0x373   :  { %1288 = vmatpush.bf16.msra.mxu2 %v6331_v59  ;;  %v1614_v59 = vld [vmem:[#allocation13 + $0x50] sm:$0xff] }
 0x377   :  { %1289 = vmatpush.bf16.msra.mxu2 %v6330_v60 }
 0x37b   :  { %1473 = vmatpush.bf16.msrb.mxu2 %v7469_v0  ;;  %v6353_v0 = vld [vmem:[#allocation12 + $0xa8] sm:$0xff] }
 0x37f   :  { %1474 = vmatpush.bf16.msrb.mxu2 %v1011_v38  ;;  %v6362_v38 = vld [vmem:[#allocation12 + $0xe8] sm:$0xff] }
 0x383   :  { %1475 = vmatpush.bf16.msrb.mxu2 %v1009_v44 }
 0x3ce   :  { %v1055_v18 = vpop.f32.mrf.mxu1 }
 0x3d1   :  { %v1041_v7 = vpop.f32.mrf.mxu2 }
 0x3d2   :  { %v1114_v8 = vpop.f32.mrf.mxu3 }
 0x3d6   :  { %v1057_v20 = vpop.f32.mrf.mxu1 }
 0x3d7   :  { %v1061_v22 = vpack.c.bf16 %v1057_v20, %v1055_v18 }
 0x3d9   :  { %v1043_v9 = vpop.f32.mrf.mxu2 }
 0x3da   :  { %v1060_v10 = vpack.c.bf16 %v1043_v9, %v1041_v7  ;;  %v1116_v11 = vpop.f32.mrf.mxu3  ;;  %v1606_v7 = vld [vmem:[#allocation13 + $0x10] sm:$0xff]  ;;  %v1605_v9 = vld [vmem:[#allocation13 + $0x8] sm:$0xff] }
 0x3db   :  { %v1120_v12 = vpack.c.bf16 %v1116_v11, %v1114_v8 }
 0x3dc   :  { %1290 = vmatmul.bf16.vlgmr.msra.gmra.mxu2 %v1060_v10  ;;  %v1604_v10 = vld [vmem:[#allocation13] sm:$0xff] }
 0x3dd   :  { %5179 = vmatmul.msk.bf16.vlgmr.msrb.gmra.mxu1 %vm937_vm12, %v1120_v12  ;;  %1595 = vmatpush.bf16.msra.mxu2 %v6368_v31  ;;  %v1621_v12 = vld [vmem:[%s8449_s16 + $0x8] sm:$0xff] }
 0x3de   :  { %1448 = vmatpush.bf16.msrb.mxu1 %v6358_v13 }
 0x3e1   :  { %v1100_v14 = vpop.f32.mrf.mxu2 }
 0x3e2   :  { %v1344_v19 = vpop.f32.mrf.mxu3 }
 0x3e9   :  { %v1102_v15 = vpop.f32.mrf.mxu2 }
 0x3ea   :  { %v1119_v17 = vpack.c.bf16 %v1102_v15, %v1100_v14  ;;  %v1346_v21 = vpop.f32.mrf.mxu3 }
 0x3eb   :  { %v1350_v23 = vpack.c.bf16 %v1346_v21, %v1344_v19 }
 0x3ec   :  { %5264 = vmatmul.msk.bf16.vlgmr.msrb.gmra.mxu2 %vm1022_vm8, %v6359_v63  ;;  %1205 = vmatmul.bf16.vlgmr.msra.gmra.mxu0 %v1119_v17 }
 0x3ed   :  { %5221 = vmatmul.msk.bf16.vlgmr.msra.gmra.mxu1 %vm1022_vm8, %v6349_v54  ;;  %1427 = vmatpush.bf16.msra.mxu0 %v6357_v16  ;;  %v1618_v54 = vld [vmem:[#allocation13 + $0x70] sm:$0xff]  ;;  %vm1803_vm8 = vcmask 1040512  }
 0x3ee   :  { %1574 = vmatpush.bf16.msra.mxu1 %v6367_v25  ;;  %1692 = vmatpush.msrb.mxu2 %v1619_v53 }
 0x3ef   :  { %1630 = vmatpush.msrb.mxu3 %v1618_v54 }
 0x3f0   :  { %1693 = vmatpush.msrb.mxu2 %v1618_v54 }
 0x3f1   :  { %1428 = vmatpush.bf16.msra.mxu0 %v6356_v24  ;;  %1631 = vmatpush.msrb.mxu3 %v1617_v56 }
 0x3f2   :  { %v1491_v27 = vpop.f32.mrf.mxu3  ;;  %1575 = vmatpush.bf16.msra.mxu1 %v6366_v28  ;;  %1694 = vmatpush.msrb.mxu2 %v1617_v56 }
 0x3f3   :  { %1632 = vmatpush.msrb.mxu3 %v1616_v57 }
 0x3f4   :  { %1695 = vmatpush.msrb.mxu2 %v1616_v57 }
 0x3f5   :  { %1429 = vmatpush.bf16.msra.mxu0 %v6355_v26  ;;  %1633 = vmatpush.msrb.mxu3 %v1615_v58 }
 0x3f6   :  { %1576 = vmatpush.bf16.msra.mxu1 %v6365_v30  ;;  %1696 = vmatpush.msrb.mxu2 %v1615_v58 }
 0x3f7   :  { %1634 = vmatpush.msrb.mxu3 %v1614_v59 }
 0x3f8   :  { %1697 = vmatpush.msrb.mxu2 %v1614_v59 }
 0x3f9   :  { %1430 = vmatpush.bf16.msra.mxu0 %v6354_v29  ;;  %1635 = vmatpush.msrb.mxu3 %v1613_v61 }
 0x3fa   :  { %v1493_v32 = vpop.f32.mrf.mxu3  ;;  %1577 = vmatpush.bf16.msra.mxu1 %v6364_v34  ;;  %1698 = vmatpush.msrb.mxu2 %v1613_v61 }
 0x3fb   :  { %v1497_v33 = vpack.c.bf16 %v1493_v32, %v1491_v27  ;;  %1636 = vmatpush.msrb.mxu3 %v1612_v62 }
 0x3fc   :  { %5216 = vmatmul.msk.bf16.vlgmr.msrb.gmra.mxu0 %vm937_vm12, %v1061_v22  ;;  %1699 = vmatpush.msrb.mxu2 %v1612_v62 }
 0x3fd   :  { %5259 = vmatmul.msk.bf16.vlgmr.msrb.gmra.mxu1 %vm937_vm12, %v1350_v23  ;;  %1431 = vmatpush.bf16.msra.mxu0 %v6353_v0 }
 0x3fe   :  { %5302 = vmatmul.msk.bf16.vlgmr.msra.gmra.mxu2 %vm937_vm12, %v1497_v33  ;;  %1578 = vmatpush.bf16.msra.mxu1 %v6363_v36 }
 0x3ff   :  { %1637 = vmatpush.msrb.mxu3 %v1611_v1  ;;  %1700 = vmatpush.msrb.mxu2 %v1611_v1 }
 0x401   :  { %1432 = vmatpush.bf16.msra.mxu0 %v6352_v35  ;;  %1638 = vmatpush.msrb.mxu3 %v1610_v2 }
 0x402   :  { %1579 = vmatpush.bf16.msra.mxu1 %v6362_v38  ;;  %1701 = vmatpush.msrb.mxu2 %v1610_v2  ;;  %v1620_v38 = vld [vmem:[%s8449_s16] sm:$0xff] }
 0x403   :  { %1639 = vmatpush.msrb.mxu3 %v1609_v3 }
 0x404   :  { %1702 = vmatpush.msrb.mxu2 %v1609_v3 }
 0x405   :  { %1433 = vmatpush.bf16.msra.mxu0 %v6351_v37  ;;  %1640 = vmatpush.msrb.mxu3 %v1608_v5 }
 0x406   :  { %1580 = vmatpush.bf16.msra.mxu1 %v6361_v40  ;;  %1703 = vmatpush.msrb.mxu2 %v1608_v5 }
 0x407   :  { %1641 = vmatpush.msrb.mxu3 %v1607_v6 }
 0x408   :  { %1704 = vmatpush.msrb.mxu2 %v1607_v6 }
 0x409   :  { %1434 = vmatpush.bf16.msra.mxu0 %v6350_v39  ;;  %1642 = vmatpush.msrb.mxu3 %v1606_v7  ;;  %v7111_v39 = vmov 128.0  }
 0x40a   :  { %1581 = vmatpush.bf16.msra.mxu1 %v6360_v41  ;;  %1705 = vmatpush.msrb.mxu2 %v1606_v7  ;;  %6618 = vrcp.f32 %v7111_v39 }
 0x40b   :  { %1643 = vmatpush.msrb.mxu3 %v1605_v9 }
 0x40c   :  { %1706 = vmatpush.msrb.mxu2 %v1605_v9 }
 0x40d   :  { %1674 = vmatpush.msrb.mxu0 %v1621_v12  ;;  %1644 = vmatpush.msrb.mxu3 %v1604_v10 }
 0x40e   :  { %1707 = vmatpush.msrb.mxu2 %v1604_v10 }
 0x40f   :  { %1675 = vmatpush.msrb.mxu0 %v1620_v38 }
 0x410   :  { %v6619_v40 = vpop.eup %6618 }
 0x411   :  { %v1650_v41 = vmul.f32 128.0, %v6619_v40  ;;  %vm1654_vm9 = vweird.f32 %v6619_v40 }
 0x45a   :  { %v7491_v42 = vpop.f32.mrf.mxu1 }
 0x45f   :  { %v7493_v43 = vpop.f32.mrf.mxu2 }
 0x462   :  { %v7495_v44 = vpop.f32.mrf.mxu1 }
 0x467   :  { %v7497_v45 = vpop.f32.mrf.mxu2 }
 0x469   :  { %v1206_v52 = vpop.f32.mrf.mxu0 }
 0x46a   :  { %v1330_v46 = vpop.f32.mrf.mxu1  ;;  %v1221_v15 = vadd.f32 %v7491_v42, %v1206_v52  ;;  %v1651_v42 = vsub.f32 1.0, %v1650_v41  ;;  %v6376_v41 = vld [vmem:[#allocation16 + $0x38] sm:$0xff] }
 0x46c   :  { %v1292_v18 = vadd.f32 %v7493_v43, %v1221_v15  ;;  %v1652_v43 = vmul.f32 %v6619_v40, %v1651_v42 }
 0x46f   :  { %v1477_v47 = vpop.f32.mrf.mxu2 }
 0x471   :  { %v1208_v55 = vpop.f32.mrf.mxu0 }
 0x472   :  { %v1332_v48 = vpop.f32.mrf.mxu1  ;;  %v1223_v16 = vadd.f32 %v7495_v44, %v1208_v55  ;;  %v1653_v44 = vadd.f32 %v6619_v40, %v1652_v43  ;;  %v1830_v43 = vld [vmem:[#allocation15] sm:$0xf] }
 0x473   :  { %v1349_v49 = vpack.c.bf16 %v1332_v48, %v1330_v46 }
 0x474   :  { %v1294_v19 = vadd.f32 %v7497_v45, %v1223_v16  ;;  %v1655_v45 = vsel %vm1654_vm9, %v6619_v40, %v1653_v44  ;;  %vm1805_vm9 = vcmask 122880   ;;  %v1890_v44 = vld [vmem:[#allocation15 + $0x4] sm:$0xf] }
 0x475   :  { %1435 = vmatmul.bf16.vlgmr.msra.gmra.mxu0 %v1349_v49 }
 0x476   :  { %1744 = vmatpush.msra.mxu0 %v1621_v12 }
 0x477   :  { %v1479_v50 = vpop.f32.mrf.mxu2 }
 0x478   :  { %v1496_v51 = vpack.c.bf16 %v1479_v50, %v1477_v47  ;;  %1745 = vmatpush.msra.mxu0 %v1620_v38 }
 0x479   :  { %v1305_v60 = vpop.f32.mrf.mxu0 }
 0x47a   :  { %1582 = vmatmul.bf16.vlgmr.msra.gmra.mxu1 %v1496_v51  ;;  %v1450_v63 = vpop.f32.mrf.mxu1  ;;  %v1306_v22 = vadd.f32 %v1305_v60, %v1292_v18 }
 0x481   :  { %v1307_v4 = vpop.f32.mrf.mxu0  ;;  %v1597_v13 = vpop.f32.mrf.mxu2 }
 0x482   :  { %v1452_v8 = vpop.f32.mrf.mxu1  ;;  %v1308_v23 = vadd.f32 %v1307_v4, %v1294_v19 }
 0x489   :  { %v1599_v25 = vpop.f32.mrf.mxu2 }
 0x4f2   :  { %v1436_v11 = vpop.f32.mrf.mxu0 }
 0x4f3   :  { %v1451_v20 = vadd.f32 %v1450_v63, %v1436_v11  ;;  %v1750_v11 = vld [vmem:[%s8451_s22] sm:$0x1] }
 0x4f5   :  { %v1455_v27 = vadd.f32 %v1451_v20, %v1306_v22 }
 0x4f7   :  { %v1583_v14 = vpop.f32.mrf.mxu1 }
 0x4f8   :  { %v1598_v24 = vadd.f32 %v1597_v13, %v1583_v14 }
 0x4fa   :  { %v1438_v17 = vpop.f32.mrf.mxu0  ;;  %v1602_v30 = vadd.f32 %v1598_v24, %v1455_v27  ;;  %v6388_v27 = vld [vmem:[#allocation16 + $0x98] sm:$0xff] }
 0x4fb   :  { %v1453_v21 = vadd.f32 %v1452_v8, %v1438_v17  ;;  %v1725_v8 = vld [vmem:[%s8450_s19] sm:$0x1]  ;;  %2025 = vmatpush.bf16.msra.mxu2 %v6388_v27  ;;  %v6401_v27 = vld [vmem:[#allocation16 + $0x100] sm:$0xff]  ;;  %s8452_s19 = sld [smem:[#allocation55_spill]] }
 0x4fd   :  { %v1456_v28 = vadd.f32 %v1453_v21, %v1308_v23 }
 0x4ff   :  { %v1585_v26 = vpop.f32.mrf.mxu1 }
 0x500   :  { %v1600_v29 = vadd.f32 %v1599_v25, %v1585_v26 }
 0x501   :  { %s4957_s10 = sshll.u32 %s8452_s19, 4  ;;  %s4958_s10 = int_to_ptr.hbm [resolvable:$true] %s4957_s10 }
 0x502   :  { %v1603_v31 = vadd.f32 %v1600_v29, %v1456_v28  ;;  %v6387_v28 = vld [vmem:[#allocation16 + $0x90] sm:$0xff] }
 0x503   :  { %2026 = vmatpush.bf16.msra.mxu2 %v6387_v28 }
 0x504   :  { %v1622_v0 = vadd.f32 %v1603_v31, %v1602_v30 }
 0x506   :  { %v1623_v32 = vrot.slane %v1622_v0, 4 }
 0x508   :  { %v1624_v33 = vadd.f32 %v1623_v32, %v1622_v0 }
 0x50a   :  { %v1625_v34 = vrot.slane %v1624_v33, 2 }
 0x50c   :  { %v1626_v35 = vadd.f32 %v1625_v34, %v1624_v33 }
 0x50e   :  { %v1627_v36 = vrot.slane %v1626_v35, 1 }
 0x510   :  { %v1628_v37 = vadd.f32 %v1627_v36, %v1626_v35 }
 0x512   :  { %1645 = vmatmul.f32.vlgmr.msrb.gmra.mxu3 %v1628_v37 }
 0x595   :  { %v1646_v46 = vpop.f32.mrf.mxu3 }
 0x596   :  { %v1656_v47 = vmul.f32 %v1655_v45, %v1646_v46  ;;  %v6378_v46 = vld [vmem:[#allocation16 + $0x48] sm:$0xff] }
 0x598   :  { %5303 = vmatmul.msk.f32.vlgmr.msrb.gmra.mxu0 %vm937_vm12, %v1656_v47  ;;  %v6386_v47 = vld [vmem:[#allocation16 + $0x88] sm:$0xff] }
 0x599   :  { %1768 = vmatpush.msrb.mxu0 %v1621_v12  ;;  %v7518_v12 = vld [vmem:[#allocation4] sm:$0xff] }
 0x59a   :  { %1790 = vst.msk [vmem:[#allocation4 + $0x18] sm:$0xff] %vm1787_vm14, %v7518_v12 }
 0x59b   :  { %1769 = vmatpush.msrb.mxu0 %v1620_v38  ;;  %1793 = vst.msk [vmem:[#allocation4 + $0x28] sm:$0xf] %vm1792_vm15, %v7518_v12 }
 0x59c   :  { %1788 = vst.msk [vmem:[#allocation4 + $0x8] sm:$0xff] %vm1787_vm14, %v7518_v12 }
 0x615   :  { %v1677_v48 = vpop.f32.mrf.mxu0 }
 0x616   :  { %v1680_v49 = vperm.slane %v1677_v48, 0  ;;  %v6385_v48 = vld [vmem:[#allocation16 + $0x80] sm:$0xff] }
 0x618   :  { %v1681_v50 = vsub.f32 %v1602_v30, %v1680_v49  ;;  %v1682_v51 = vsub.f32 %v1603_v31, %v1680_v49  ;;  %v6374_v49 = vld [vmem:[#allocation16 + $0x28] sm:$0xff] }
 0x61a   :  { %v1683_v52 = vmul.f32 %v1681_v50, %v1681_v50  ;;  %v1684_v53 = vmul.f32 %v1682_v51, %v1682_v51 }
 0x61c   :  { %v1685_v54 = vadd.f32 %v1684_v53, %v1683_v52  ;;  %v6373_v52 = vld [vmem:[#allocation16 + $0x20] sm:$0xff]  ;;  %v6372_v53 = vld [vmem:[#allocation16 + $0x18] sm:$0xff] }
 0x61e   :  { %v1686_v55 = vrot.slane %v1685_v54, 4 }
 0x620   :  { %v1687_v56 = vadd.f32 %v1686_v55, %v1685_v54  ;;  %v6371_v54 = vld [vmem:[#allocation16 + $0x10] sm:$0xff]  ;;  %v6370_v55 = vld [vmem:[#allocation16 + $0x8] sm:$0xff] }
 0x622   :  { %v1688_v57 = vrot.slane %v1687_v56, 2 }
 0x624   :  { %v1689_v58 = vadd.f32 %v1688_v57, %v1687_v56  ;;  %v6369_v56 = vld [vmem:[#allocation16] sm:$0xff]  ;;  %v6383_v57 = vld [vmem:[#allocation16 + $0x70] sm:$0xff] }
 0x626   :  { %v1690_v59 = vrot.slane %v1689_v58, 1 }
 0x628   :  { %v1691_v60 = vadd.f32 %v1690_v59, %v1689_v58  ;;  %v6382_v58 = vld [vmem:[#allocation16 + $0x68] sm:$0xff]  ;;  %v6381_v59 = vld [vmem:[#allocation16 + $0x60] sm:$0xff] }
 0x62a   :  { %1708 = vmatmul.f32.vlgmr.msrb.gmra.mxu2 %v1691_v60  ;;  %v6380_v60 = vld [vmem:[#allocation16 + $0x58] sm:$0xff] }
 0x6ad   :  { %v1709_v61 = vpop.f32.mrf.mxu2 }
 0x6ae   :  { %v1712_v62 = vmul.f32 %v1709_v61, %v1655_v45  ;;  %v6375_v45 = vld [vmem:[#allocation16 + $0x30] sm:$0xff] }
 0x6af   :  { %v6379_v61 = vld [vmem:[#allocation16 + $0x50] sm:$0xff] }
 0x6b0   :  { %v1713_v63 = vmax.f32 %v1712_v62, 0.0 }
 0x6b2   :  { %v1714_v1 = vadd.f32 1e-05, %v1713_v63 }
 0x6b4   :  { %6620 = vrsqrt.f32 %v1714_v1  ;;  %vm1721_vm11 = vweird.f32 %v1714_v1 }
 0x6ba   :  { %v6621_v2 = vpop.eup %6620 }
 0x6bb   :  { %v1716_v3 = vmul.f32 %v6621_v2, %v1714_v1  ;;  %vm1722_vm10 = vweird.f32 %v6621_v2 }
 0x6bc   :  { %vm1723_vm13 = vmor %vm1721_vm11, %vm1722_vm10 }
 0x6bd   :  { %v1717_v4 = vmul.f32 %v6621_v2, %v1716_v3 }
 0x6bf   :  { %v1718_v5 = vmul.f32 0.5, %v1717_v4 }
 0x6c1   :  { %v1719_v6 = vsub.f32 1.5, %v1718_v5 }
 0x6c3   :  { %v1720_v7 = vmul.f32 %v6621_v2, %v1719_v6 }
 0x6c5   :  { %v1724_v9 = vsel %vm1723_vm13, %v6621_v2, %v1720_v7 }
 0x6c6   :  { %v1726_v10 = vmul.f32 %v1725_v8, %v1724_v9  ;;  %v2266_v9 = vld [vmem:[#allocation15 + $0xc] sm:$0xf] }
 0x6c8   :  { %5304 = vmatmul.msk.f32.vlgmr.msra.gmra.mxu0 %vm937_vm12, %v1726_v10 }
 0x6d0   :  { %5305 = vmatmul.msk.f32.vlgmr.msrb.gmra.mxu0 %vm937_vm12, %v1750_v11  ;;  %v2122_v11 = vld [vmem:[#allocation15 + $0x8] sm:$0xf] }
 0x745   :  { %v1747_v13 = vpop.f32.mrf.mxu0 }
 0x746   :  { %v1774_v14 = vperm.slane %v1747_v13, 0 }
 0x748   :  { %v1775_v16 = vmul.f32 %v1774_v14, %v1681_v50  ;;  %v1776_v17 = vmul.f32 %v1774_v14, %v1682_v51  ;;  %v6377_v50 = vld [vmem:[#allocation16 + $0x40] sm:$0xff]  ;;  %v6384_v51 = vld [vmem:[#allocation16 + $0x78] sm:$0xff]  ;;  %v6398_v14 = vld [vmem:[#allocation16 + $0xe8] sm:$0xff] }
 0x74d   :  { %v1771_v15 = vpop.f32.mrf.mxu0 }
 0x74e   :  { %v1777_v18 = vperm.slane %v1771_v15, 0  ;;  %v6397_v15 = vld [vmem:[#allocation16 + $0xe0] sm:$0xff] }
 0x750   :  { %v1778_v19 = vadd.f32 %v1777_v18, %v1775_v16  ;;  %v1779_v20 = vadd.f32 %v1777_v18, %v1776_v17  ;;  %v6396_v16 = vld [vmem:[#allocation16 + $0xd8] sm:$0xff]  ;;  %v6406_v17 = vld [vmem:[#allocation16 + $0x128] sm:$0xff]  ;;  %v6395_v18 = vld [vmem:[#allocation16 + $0xd0] sm:$0xff] }
 0x752   :  { %vm1781_vm12 = vcmp.ge.f32.partialorder %v1779_v20, 0.0  ;;  %v1783_v21 = vmul.f32 0.2, %v1779_v20  ;;  %vm1780_vm0 = vcmp.ge.f32.partialorder %v1778_v19, 0.0  ;;  %v1782_v22 = vmul.f32 0.2, %v1778_v19 }
 0x754   :  { %v1785_v23 = vsel %vm1781_vm12, %v1779_v20, %v1783_v21  ;;  %v1784_v24 = vsel %vm1780_vm0, %v1778_v19, %v1782_v22  ;;  %v6405_v19 = vld [vmem:[#allocation16 + $0x120] sm:$0xff]  ;;  %v6394_v20 = vld [vmem:[#allocation16 + $0xc8] sm:$0xff]  ;;  %v6404_v21 = vld [vmem:[#allocation16 + $0x118] sm:$0xff]  ;;  %vm2585_vm12 = vcmask 523264   ;;  %vm2588_vm0 = vcmask 519168  }
 0x755   :  { %v1808_v25 = vrot.slane %v1785_v23, 5  ;;  %v1795_v26 = vrot.slane %v1784_v24, 7  ;;  %v6393_v22 = vld [vmem:[#allocation16 + $0xc0] sm:$0xff]  ;;  %v6403_v23 = vld [vmem:[#allocation16 + $0x110] sm:$0xff]  ;;  %v6392_v24 = vld [vmem:[#allocation16 + $0xb8] sm:$0xff]  ;;  %2586 = vst.msk [vmem:[#allocation5 + $0x8] sm:$0xff] %vm2585_vm12, %v7518_v12 }
 0x756   :  { %2589 = vst.msk [vmem:[#allocation5 + $0x18] sm:$0xf] %vm2588_vm0, %v7518_v12 }
 0x757   :  { %1809 = vrot.lane.b32.xlu2 %v1808_v25, %s7106_s13  ;;  %1796 = vrot.lane.b32.xlu0 %v1795_v26, %s7106_s13  ;;  %v6402_v25 = vld [vmem:[#allocation16 + $0x108] sm:$0xff]  ;;  %v6391_v26 = vld [vmem:[#allocation16 + $0xb0] sm:$0xff]  ;;  %3889 = vst.msk [vmem:[#allocation6 + $0x10] sm:$0xff] %vm2585_vm12, %v7518_v12 }
 0x7b1   :  { %v1810_v29 = vpop.permute.xlu2 %1809 }
 0x7b2   :  { %1813 = vst.msk [vmem:[#allocation4 + $0x10] sm:$0xf8] %vm1812_vm1, %v1810_v29 }
 0x7b3   :  { %1815 = vst.msk [vmem:[#allocation4 + $0x18] sm:$0xf8] %vm1814_vm2, %v1810_v29  ;;  %vm2605_vm2 = vcmask 261127  }
 0x7b4   :  { %1817 = vst.msk [vmem:[#allocation4 + $0x20] sm:$0x7] %vm1816_vm3, %v1810_v29  ;;  %vm2607_vm3 = vcmask 1042688  }
 0x7b5   :  { %1819 = vst.msk [vmem:[#allocation4 + $0x28] sm:$0x7] %vm1818_vm5, %v1810_v29  ;;  %v6390_v29 = vld [vmem:[#allocation16 + $0xa8] sm:$0xff]  ;;  %vm2609_vm5 = vcmask 256000  }
 0x7bb   :  { %v1824_v30 = vld [vmem:[#allocation4 + $0x20] sm:$0xf] }
 0x7bc   :  { %v1828_v31 = vpack.c.bf16 %v1824_v30, %v1824_v30  ;;  %v1825_v0 = vld [vmem:[#allocation4 + $0x28] sm:$0xf]  ;;  %v6400_v30 = vld [vmem:[#allocation16 + $0xf8] sm:$0xff] }
 0x7bd   :  { %v1829_v32 = vpack.c.bf16 %v1825_v0, %v1825_v0 }
 0x7be   :  { %v1836_v33 = vsel %vm433_vm4, %v1828_v31, 0  ;;  %v6408_v31 = vld [vmem:[#allocation16 + $0x138] sm:$0xff] }
 0x7bf   :  { %1847 = vmatpush.bf16.msrb.mxu1 %v1836_v33  ;;  %v7529_v34 = vsel %vm433_vm4, %v1829_v32, 0  ;;  %1900 = vmatpush.bf16.msra.mxu0 %v1836_v33  ;;  %vm1831_vm4 = vcmask 162816   ;;  %v6389_v32 = vld [vmem:[#allocation16 + $0xa0] sm:$0xff] }
 0x7c0   :  { %1860 = vmatpush.bf16.msra.mxu3 %v7529_v34  ;;  %2132 = vmatpush.bf16.msrb.mxu2 %v1836_v33 }
 0x7c9   :  { %v1797_v35 = vpop.permute.xlu0 %1796 }
 0x7ca   :  { %1800 = vst.msk [vmem:[#allocation4] sm:$0xfe] %vm1799_vm6, %v1797_v35  ;;  %vm2595_vm6 = vcmask 1044737  }
 0x7cb   :  { %1802 = vst.msk [vmem:[#allocation4 + $0x8] sm:$0xfe] %vm1801_vm7, %v1797_v35  ;;  %vm2597_vm7 = vcmask 258049  }
 0x7cc   :  { %1804 = vst.msk [vmem:[#allocation4 + $0x10] sm:$0x1] %vm1803_vm8, %v1797_v35  ;;  %vm2622_vm8 = vcmask 1045504  }
 0x7cd   :  { %1806 = vst.msk [vmem:[#allocation4 + $0x18] sm:$0x1] %vm1805_vm9, %v1797_v35  ;;  %vm2618_vm9 = vcmask 97280  }
 0x7d1   :  { %v1820_v36 = vld [vmem:[#allocation4] sm:$0xff] }
 0x7d2   :  { %v1821_v37 = vld [vmem:[#allocation4 + $0x8] sm:$0xff] }
 0x7d3   :  { %v1822_v38 = vld [vmem:[#allocation4 + $0x10] sm:$0xff] }
 0x7d4   :  { %v1826_v39 = vpack.c.bf16 %v1822_v38, %v1820_v36  ;;  %v1823_v40 = vld [vmem:[#allocation4 + $0x18] sm:$0xff] }
 0x7d5   :  { %v7532_v42 = vpack.c.bf16 %v1823_v40, %v1821_v37 }
 0x7d6   :  { %1848 = vmatpush.bf16.msrb.mxu1 %v1826_v39  ;;  %1901 = vmatpush.bf16.msra.mxu0 %v1826_v39 }
 0x7d7   :  { %1861 = vmatpush.bf16.msra.mxu3 %v7532_v42  ;;  %2133 = vmatpush.bf16.msrb.mxu2 %v1826_v39 }
 0x7d9   :  { %5306 = vmatmul.msk.bf16.vlgmr.msrb.gmra.mxu1 %vm1831_vm4, %v1830_v43  ;;  %5308 = vmatmul.msk.bf16.vlgmr.msra.gmra.mxu0 %vm1831_vm4, %v1890_v44 }
 0x7da   :  { %1913 = vmatpush.bf16.msra.mxu1 %v7529_v34  ;;  %2095 = vmatpush.bf16.msrb.mxu0 %v6376_v41 }
 0x7db   :  { %5307 = vmatmul.msk.bf16.vlgmr.msra.gmra.mxu3 %vm1831_vm4, %v1830_v43 }
 0x7dc   :  { %2006 = vmatpush.bf16.msrb.mxu3 %v6386_v47 }
 0x7de   :  { %1914 = vmatpush.bf16.msra.mxu1 %v7532_v42  ;;  %2096 = vmatpush.bf16.msrb.mxu0 %v6375_v45 }
 0x7e0   :  { %2007 = vmatpush.bf16.msrb.mxu3 %v6385_v48 }
 0x7e2   :  { %2114 = vmatpush.bf16.msrb.mxu1 %v6378_v46  ;;  %2097 = vmatpush.bf16.msrb.mxu0 %v6374_v49 }
 0x7e4   :  { %2008 = vmatpush.bf16.msrb.mxu3 %v6384_v51 }
 0x7e6   :  { %2115 = vmatpush.bf16.msrb.mxu1 %v6377_v50  ;;  %2098 = vmatpush.bf16.msrb.mxu0 %v6373_v52 }
 0x7e8   :  { %2009 = vmatpush.bf16.msrb.mxu3 %v6383_v57  ;;  %v2422_v57 = vld [vmem:[#allocation18 + $0x68] sm:$0xff] }
 0x7e9   :  { %5309 = vmatmul.msk.bf16.vlgmr.msra.gmra.mxu1 %vm1831_vm4, %v1890_v44 }
 0x7ea   :  { %2099 = vmatpush.bf16.msrb.mxu0 %v6372_v53  ;;  %2145 = vmatpush.bf16.msra.mxu1 %v7529_v34 }
 0x7ec   :  { %2010 = vmatpush.bf16.msrb.mxu3 %v6382_v58  ;;  %v2421_v58 = vld [vmem:[#allocation18 + $0x60] sm:$0xff] }
 0x7ee   :  { %2100 = vmatpush.bf16.msrb.mxu0 %v6371_v54  ;;  %2146 = vmatpush.bf16.msra.mxu1 %v7532_v42 }
 0x7f0   :  { %2011 = vmatpush.bf16.msrb.mxu3 %v6381_v59  ;;  %v2420_v59 = vld [vmem:[#allocation18 + $0x58] sm:$0xff] }
 0x7f2   :  { %2101 = vmatpush.bf16.msrb.mxu0 %v6370_v55  ;;  %v2424_v55 = vld [vmem:[#allocation18 + $0x78] sm:$0xff] }
 0x7f4   :  { %2012 = vmatpush.bf16.msrb.mxu3 %v6380_v60  ;;  %v2419_v60 = vld [vmem:[#allocation18 + $0x50] sm:$0xff] }
 0x7f6   :  { %2102 = vmatpush.bf16.msrb.mxu0 %v6369_v56  ;;  %v2423_v56 = vld [vmem:[#allocation18 + $0x70] sm:$0xff] }
 0x7f8   :  { %2013 = vmatpush.bf16.msrb.mxu3 %v6379_v61  ;;  %v2418_v61 = vld [vmem:[#allocation18 + $0x48] sm:$0xff] }
 0x7fa   :  { %2276 = vmatpush.bf16.msra.mxu0 %v1836_v33  ;;  %v6399_v33 = vld [vmem:[#allocation16 + $0xf0] sm:$0xff] }
 0x7fc   :  { %2257 = vmatpush.bf16.msra.mxu3 %v6398_v14 }
 0x7fe   :  { %2277 = vmatpush.bf16.msra.mxu0 %v1826_v39 }
 0x800   :  { %2258 = vmatpush.bf16.msra.mxu3 %v6397_v15 }
 0x856   :  { %v1850_v62 = vpop.f32.mrf.mxu1  ;;  %v1903_v63 = vpop.f32.mrf.mxu0 }
 0x857   :  { %v1867_v1 = vpack.c.bf16 %v1850_v62, %v1850_v62  ;;  %v1920_v2 = vpack.c.bf16 %v1903_v63, %v1903_v63  ;;  %v2417_v62 = vld [vmem:[#allocation18 + $0x40] sm:$0xff]  ;;  %v2416_v63 = vld [vmem:[#allocation18 + $0x38] sm:$0xff] }
 0x859   :  { %2103 = vmatmul.bf16.vlgmr.msrb.gmra.mxu0 %v1867_v1  ;;  %2014 = vmatmul.bf16.vlgmr.msrb.gmra.mxu3 %v1920_v2  ;;  %v2415_v1 = vld [vmem:[#allocation18 + $0x30] sm:$0xff]  ;;  %v2414_v2 = vld [vmem:[#allocation18 + $0x28] sm:$0xff] }
 0x85a   :  { %2382 = vmatpush.bf16.msrb.mxu3 %v6406_v17  ;;  %2401 = vmatpush.bf16.msrb.mxu0 %v6408_v31  ;;  %v2425_v31 = vld [vmem:[#allocation19] sm:$0xff] }
 0x85e   :  { %v1863_v3 = vpop.f32.mrf.mxu3  ;;  %v1852_v5 = vpop.f32.mrf.mxu1  ;;  %2383 = vmatpush.bf16.msrb.mxu3 %v6405_v19 }
 0x85f   :  { %v1868_v4 = vpack.c.bf16 %v1863_v3, %v1863_v3  ;;  %v1905_v6 = vpop.f32.mrf.mxu0  ;;  %v2413_v3 = vld [vmem:[#allocation18 + $0x20] sm:$0xff]  ;;  %v2411_v5 = vld [vmem:[#allocation18 + $0x10] sm:$0xff] }
 0x861   :  { %5391 = vmatmul.msk.bf16.vlgmr.msrb.gmra.mxu1 %vm1787_vm14, %v1868_v4  ;;  %v2412_v4 = vld [vmem:[#allocation18 + $0x18] sm:$0xff] }
 0x862   :  { %2289 = vmatpush.bf16.msrb.mxu1 %v7529_v34  ;;  %2384 = vmatpush.bf16.msrb.mxu3 %v6404_v21  ;;  %v6407_v34 = vld [vmem:[#allocation16 + $0x130] sm:$0xff] }
 0x863   :  { %2402 = vmatpush.bf16.msrb.mxu0 %v6407_v34 }
 0x866   :  { %2290 = vmatpush.bf16.msrb.mxu1 %v7532_v42  ;;  %v1865_v7 = vpop.f32.mrf.mxu3  ;;  %v1916_v8 = vpop.f32.mrf.mxu1  ;;  %2385 = vmatpush.bf16.msrb.mxu3 %v6403_v23 }
 0x867   :  { %v1921_v10 = vpack.c.bf16 %v1916_v8, %v1916_v8  ;;  %v2410_v7 = vld [vmem:[#allocation18 + $0x8] sm:$0xff]  ;;  %v2409_v8 = vld [vmem:[#allocation18] sm:$0xff] }
 0x869   :  { %5350 = vmatmul.msk.bf16.vlgmr.msra.gmra.mxu2 %vm1787_vm14, %v1921_v10  ;;  %5435 = vmatmul.msk.bf16.vlgmr.msra.gmra.mxu0 %vm1831_vm4, %v2266_v9  ;;  %v2427_v10 = vld [vmem:[#allocation19 + $0x10] sm:$0xff] }
 0x86a   :  { %2238 = vmatpush.bf16.msra.mxu2 %v6396_v16  ;;  %2386 = vmatpush.bf16.msrb.mxu3 %v6402_v25 }
 0x86b   :  { %2495 = vmatpush.msra.mxu0 %v2424_v55 }
 0x86d   :  { %2496 = vmatpush.msra.mxu0 %v2423_v56 }
 0x86e   :  { %v1918_v13 = vpop.f32.mrf.mxu1  ;;  %2239 = vmatpush.bf16.msra.mxu2 %v6395_v18  ;;  %2387 = vmatpush.bf16.msrb.mxu3 %v6401_v27 }
 0x86f   :  { %2497 = vmatpush.msra.mxu0 %v2422_v57 }
 0x871   :  { %5393 = vmatmul.msk.bf16.vlgmr.msra.gmra.mxu1 %vm1831_vm4, %v2122_v11  ;;  %2498 = vmatpush.msra.mxu0 %v2421_v58 }
 0x872   :  { %2240 = vmatpush.bf16.msra.mxu2 %v6394_v20  ;;  %2388 = vmatpush.bf16.msrb.mxu3 %v6400_v30  ;;  %v2426_v30 = vld [vmem:[#allocation19 + $0x8] sm:$0xff] }
 0x873   :  { %2435 = vmatpush.msra.mxu1 %v2424_v55  ;;  %2499 = vmatpush.msra.mxu0 %v2420_v59 }
 0x875   :  { %2436 = vmatpush.msra.mxu1 %v2423_v56  ;;  %2500 = vmatpush.msra.mxu0 %v2419_v60 }
 0x876   :  { %2241 = vmatpush.bf16.msra.mxu2 %v6393_v22  ;;  %2389 = vmatpush.bf16.msrb.mxu3 %v6399_v33 }
 0x877   :  { %2437 = vmatpush.msra.mxu1 %v2422_v57  ;;  %2501 = vmatpush.msra.mxu0 %v2418_v61 }
 0x879   :  { %5392 = vmatmul.msk.bf16.vlgmr.msrb.gmra.mxu2 %vm1831_vm4, %v2122_v11  ;;  %2438 = vmatpush.msra.mxu1 %v2421_v58 }
 0x87a   :  { %2242 = vmatpush.bf16.msra.mxu2 %v6392_v24  ;;  %2502 = vmatpush.msra.mxu0 %v2417_v62 }
 0x87b   :  { %2439 = vmatpush.msra.mxu1 %v2420_v59 }
 0x87c   :  { %2503 = vmatpush.msra.mxu0 %v2416_v63 }
 0x87d   :  { %2440 = vmatpush.msra.mxu1 %v2419_v60  ;;  %v2528_v60 = vld [vmem:[#allocation21] sm:$0x1] }
 0x87e   :  { %2243 = vmatpush.bf16.msra.mxu2 %v6391_v26  ;;  %2504 = vmatpush.msra.mxu0 %v2415_v1 }
 0x87f   :  { %2441 = vmatpush.msra.mxu1 %v2418_v61 }
 0x880   :  { %2505 = vmatpush.msra.mxu0 %v2414_v2 }
 0x881   :  { %5436 = vmatmul.msk.bf16.vlgmr.msrb.gmra.mxu1 %vm1831_vm4, %v2266_v9  ;;  %v2428_v9 = vld [vmem:[#allocation19 + $0x18] sm:$0xff]  ;;  %vm3606_vm4 = vcmask 521216  }
 0x882   :  { %2244 = vmatpush.bf16.msra.mxu2 %v6390_v29  ;;  %2442 = vmatpush.msra.mxu1 %v2417_v62 }
 0x883   :  { %2506 = vmatpush.msra.mxu0 %v2413_v3 }
 0x884   :  { %2443 = vmatpush.msra.mxu1 %v2416_v63  ;;  %v2553_v63 = vld [vmem:[#allocation22] sm:$0x1] }
 0x885   :  { %2507 = vmatpush.msra.mxu0 %v2412_v4 }
 0x886   :  { %2245 = vmatpush.bf16.msra.mxu2 %v6389_v32  ;;  %2444 = vmatpush.msra.mxu1 %v2415_v1 }
 0x887   :  { %2508 = vmatpush.msra.mxu0 %v2411_v5 }
 0x888   :  { %2445 = vmatpush.msra.mxu1 %v2414_v2 }
 0x889   :  { %2509 = vmatpush.msra.mxu0 %v2410_v7 }
 0x88a   :  { %2446 = vmatpush.msra.mxu1 %v2413_v3  ;;  %2478 = vmatpush.msrb.mxu2 %v2428_v9 }
 0x88b   :  { %2510 = vmatpush.msra.mxu0 %v2409_v8 }
 0x88c   :  { %2447 = vmatpush.msra.mxu1 %v2412_v4  ;;  %2479 = vmatpush.msrb.mxu2 %v2427_v10 }
 0x88e   :  { %2448 = vmatpush.msra.mxu1 %v2411_v5  ;;  %2480 = vmatpush.msrb.mxu2 %v2426_v30 }
 0x890   :  { %2449 = vmatpush.msra.mxu1 %v2410_v7  ;;  %2481 = vmatpush.msrb.mxu2 %v2425_v31 }
 0x892   :  { %2450 = vmatpush.msra.mxu1 %v2409_v8 }
 0x8d6   :  { %v2104_v28 = vpop.f32.mrf.mxu0 }
 0x8dc   :  { %v2015_v0 = vpop.f32.mrf.mxu3 }
 0x8de   :  { %v7551_v35 = vpop.f32.mrf.mxu1  ;;  %v2106_v36 = vpop.f32.mrf.mxu0 }
 0x8e4   :  { %v2017_v37 = vpop.f32.mrf.mxu3 }
 0x8e6   :  { %v2119_v38 = vpop.f32.mrf.mxu1  ;;  %v2279_v39 = vpop.f32.mrf.mxu0 }
 0x8e7   :  { %v2296_v48 = vpack.c.bf16 %v2279_v39, %v2279_v39 }
 0x8ec   :  { %v2028_v40 = vpop.f32.mrf.mxu2 }
 0x8ed   :  { %v2029_v41 = vadd.f32 %v2028_v40, %v2015_v0  ;;  %v7112_v0 = vmov 32.0  }
 0x8ee   :  { %v2148_v42 = vpop.f32.mrf.mxu1  ;;  %v2281_v44 = vpop.f32.mrf.mxu0  ;;  %6622 = vrcp.f32 %v7112_v0  ;;  %v5559_v0 = vld [vmem:[%s8419_s17 + $0x120] sm:$0xf] }
 0x8ef   :  { %v2153_v43 = vpack.c.bf16 %v2148_v42, %v2148_v42  ;;  %v7553_v45 = vadd.f32 %v2104_v28, %v2029_v41 }
 0x8f1   :  { %5434 = vmatmul.msk.bf16.vlgmr.msra.gmra.mxu3 %vm1787_vm14, %v2153_v43  ;;  %v2118_v15 = vadd.f32 %v7551_v35, %v7553_v45 }
 0x8f4   :  { %v2030_v46 = vpop.f32.mrf.mxu2  ;;  %v6623_v32 = vpop.eup %6622 }
 0x8f5   :  { %v2456_v33 = vmul.f32 32.0, %v6623_v32  ;;  %vm2460_vm10 = vweird.f32 %v6623_v32 }
 0x8f6   :  { %v2150_v47 = vpop.f32.mrf.mxu1 }
 0x8f7   :  { %v2457_v34 = vsub.f32 1.0, %v2456_v33 }
 0x8f9   :  { %v2458_v35 = vmul.f32 %v6623_v32, %v2457_v34  ;;  %v2682_v34 = vld [vmem:[#allocation24 + $0x4] sm:$0x7] }
 0x8fb   :  { %v2459_v36 = vadd.f32 %v6623_v32, %v2458_v35  ;;  %v2617_v35 = vld [vmem:[#allocation24] sm:$0x7] }
 0x8fc   :  { %v2135_v49 = vpop.f32.mrf.mxu2 }
 0x8fd   :  { %v2152_v50 = vpack.c.bf16 %v2135_v49, %v2135_v49  ;;  %v2461_v37 = vsel %vm2460_vm10, %v6623_v32, %v2459_v36  ;;  %v6446_v32 = vld [vmem:[%s8419_s17 + $0x124] sm:$0xf0]  ;;  %v5583_v36 = vld [vmem:[%s8419_s17 + $0x150] sm:$0xf] }
 0x8fe   :  { %v2292_v51 = vpop.f32.mrf.mxu1 }
 0x8ff   :  { %v2297_v52 = vpack.c.bf16 %v2292_v51, %v2292_v51  ;;  %2246 = vmatmul.bf16.vlgmr.msra.gmra.mxu2 %v2152_v50 }
 0x900   :  { %2545 = vmatpush.msra.mxu2 %v2428_v9 }
 0x901   :  { %2390 = vmatmul.bf16.vlgmr.msrb.gmra.mxu3 %v2296_v48  ;;  %5477 = vmatmul.msk.bf16.vlgmr.msrb.gmra.mxu0 %vm1787_vm14, %v2297_v52 }
 0x902   :  { %2546 = vmatpush.msra.mxu2 %v2427_v10 }
 0x904   :  { %v2137_v53 = vpop.f32.mrf.mxu2  ;;  %2547 = vmatpush.msra.mxu2 %v2426_v30 }
 0x906   :  { %v2294_v54 = vpop.f32.mrf.mxu1  ;;  %2548 = vmatpush.msra.mxu2 %v2425_v31 }
 0x974   :  { %v2260_v6 = vpop.f32.mrf.mxu3 }
 0x97c   :  { %v2262_v11 = vpop.f32.mrf.mxu3 }
 0x97e   :  { %v2404_v13 = vpop.f32.mrf.mxu0 }
 0x982   :  { %v2247_v14 = vpop.f32.mrf.mxu2 }
 0x983   :  { %v2261_v16 = vadd.f32 %v2260_v6, %v2247_v14  ;;  %v6456_v14 = vld [vmem:[%s8419_s17 + $0x174] sm:$0xf0] }
 0x984   :  { %v2391_v17 = vpop.f32.mrf.mxu3 }
 0x985   :  { %v2405_v18 = vadd.f32 %v2404_v13, %v2391_v17  ;;  %v2264_v19 = vadd.f32 %v2261_v16, %v2118_v15  ;;  %v5599_v13 = vld [vmem:[%s8419_s17 + $0x170] sm:$0xf]  ;;  %v6448_v16 = vld [vmem:[%s8419_s17 + $0x134] sm:$0xf0] }
 0x986   :  { %v2406_v20 = vpop.f32.mrf.mxu0  ;;  %v5567_v15 = vld [vmem:[%s8419_s17 + $0x130] sm:$0xf] }
 0x987   :  { %v2408_v21 = vadd.f32 %v2405_v18, %v2264_v19 }
 0x989   :  { %v2429_v22 = vrot.slane %v2408_v21, 4 }
 0x98a   :  { %v2249_v23 = vpop.f32.mrf.mxu2 }
 0x98b   :  { %v2430_v24 = vadd.f32 %v2429_v22, %v2408_v21  ;;  %v5591_v22 = vld [vmem:[%s8419_s17 + $0x160] sm:$0xf]  ;;  %v6454_v23 = vld [vmem:[%s8419_s17 + $0x164] sm:$0xf0] }
 0x98c   :  { %v2393_v25 = vpop.f32.mrf.mxu3 }
 0x98d   :  { %v2431_v26 = vrot.slane %v2430_v24, 2 }
 0x98f   :  { %v2432_v27 = vadd.f32 %v2431_v26, %v2430_v24  ;;  %v6455_v24 = vld [vmem:[%s8419_s17 + $0x174] sm:$0xf]  ;;  %v5600_v26 = vor.u32 %v6456_v14, %v5599_v13  ;;  %v6422_v13 = vld [vmem:[%s8419_s17 + $0x64] sm:$0xf0] }
 0x991   :  { %v2433_v28 = vrot.slane %v2432_v27, 1 }
 0x993   :  { %v2434_v29 = vadd.f32 %v2433_v28, %v2432_v27  ;;  %v5568_v27 = vor.u32 %v6448_v16, %v5567_v15  ;;  %v5601_v28 = vld [vmem:[%s8419_s17 + $0x178] sm:$0xf0] }
 0x995   :  { %2451 = vmatmul.f32.vlgmr.msra.gmra.mxu1 %v2434_v29  ;;  %v6447_v29 = vld [vmem:[%s8419_s17 + $0x134] sm:$0xf] }
 0xa12   :  { %v2452_v38 = vpop.f32.mrf.mxu1 }
 0xa13   :  { %v2462_v39 = vmul.f32 %v2461_v37, %v2452_v38 }
 0xa15   :  { %5478 = vmatmul.msk.f32.vlgmr.msrb.gmra.mxu2 %vm1787_vm14, %v2462_v39  ;;  %v6453_v39 = vld [vmem:[%s8419_s17 + $0x164] sm:$0xf] }
 0xa16   :  { %2569 = vmatpush.msrb.mxu2 %v2428_v9 }
 0xa18   :  { %2570 = vmatpush.msrb.mxu2 %v2427_v10 }
 0xa1a   :  { %2571 = vmatpush.msrb.mxu2 %v2426_v30  ;;  %v5569_v30 = vld [vmem:[%s8419_s17 + $0x138] sm:$0xf0] }
 0xa1b   :  { %v5572_v38 = vor.u32 %v6447_v29, %v5569_v30  ;;  %v5519_v29 = vld [vmem:[%s8419_s17 + $0xd0] sm:$0xf] }
 0xa1c   :  { %2572 = vmatpush.msrb.mxu2 %v2425_v31 }
 0xa98   :  { %v2483_v40 = vpop.f32.mrf.mxu2 }
 0xa99   :  { %v2486_v41 = vperm.slane %v2483_v40, 0  ;;  %v5592_v40 = vor.u32 %v6454_v23, %v5591_v22  ;;  %v6438_v22 = vld [vmem:[%s8419_s17 + $0xe4] sm:$0xf0]  ;;  %v5689_v23 = vld [vmem:[%s8419_s17 + $0xa0] sm:$0xf] }
 0xa9b   :  { %v2487_v42 = vsub.f32 %v2408_v21, %v2486_v41  ;;  %v5560_v41 = vor.u32 %v6446_v32, %v5559_v0  ;;  %v6437_v0 = vld [vmem:[%s8419_s17 + $0xe4] sm:$0xf]  ;;  %v5529_v32 = vld [vmem:[%s8419_s17 + $0xe8] sm:$0xf0] }
 0xa9d   :  { %v2488_v43 = vmul.f32 %v2487_v42, %v2487_v42 }
 0xa9f   :  { %v2489_v44 = vrot.slane %v2488_v43, 4 }
 0xaa1   :  { %v2490_v45 = vadd.f32 %v2489_v44, %v2488_v43  ;;  %v6445_v43 = vld [vmem:[%s8419_s17 + $0x124] sm:$0xf]  ;;  %v5561_v44 = vld [vmem:[%s8419_s17 + $0x128] sm:$0xf0] }
 0xaa3   :  { %v2491_v46 = vrot.slane %v2490_v45, 2 }
 0xaa5   :  { %v2492_v47 = vadd.f32 %v2491_v46, %v2490_v45  ;;  %v6452_v45 = vld [vmem:[%s8419_s17 + $0x154] sm:$0xf0]  ;;  %v5551_v46 = vld [vmem:[%s8419_s17 + $0x110] sm:$0xf] }
 0xaa7   :  { %v2493_v48 = vrot.slane %v2492_v47, 1 }
 0xaa9   :  { %v2494_v49 = vadd.f32 %v2493_v48, %v2492_v47  ;;  %v6444_v47 = vld [vmem:[%s8419_s17 + $0x114] sm:$0xf0]  ;;  %v5575_v48 = vld [vmem:[%s8419_s17 + $0x140] sm:$0xf] }
 0xaab   :  { %2511 = vmatmul.f32.vlgmr.msra.gmra.mxu0 %v2494_v49 }
 0xb28   :  { %v2512_v50 = vpop.f32.mrf.mxu0 }
 0xb29   :  { %v2515_v51 = vmul.f32 %v2512_v50, %v2461_v37  ;;  %v5604_v37 = vor.u32 %v6455_v24, %v5601_v28  ;;  %v5564_v50 = vor.u32 %v6445_v43, %v5561_v44  ;;  %v6430_v24 = vld [vmem:[%s8419_s17 + $0xa4] sm:$0xf0]  ;;  %v5633_v44 = vld [vmem:[%s8419_s17 + $0x30] sm:$0xf] }
 0xb2a   :  { %v5690_v30 = vor.u32 %v6430_v24, %v5689_v23  ;;  %v6429_v23 = vld [vmem:[%s8419_s17 + $0xa4] sm:$0xf]  ;;  %v5691_v24 = vld [vmem:[%s8419_s17 + $0xa8] sm:$0xf0] }
 0xb2b   :  { %v2516_v52 = vmax.f32 %v2515_v51, 0.0  ;;  %v6451_v51 = vld [vmem:[%s8419_s17 + $0x154] sm:$0xf] }
 0xb2d   :  { %v2517_v53 = vadd.f32 1e-05, %v2516_v52  ;;  %v5584_v52 = vor.u32 %v6452_v45, %v5583_v36  ;;  %v5681_v36 = vld [vmem:[%s8419_s17 + $0x90] sm:$0xf]  ;;  %v5511_v45 = vld [vmem:[%s8419_s17 + $0xc0] sm:$0xf] }
 0xb2f   :  { %6624 = vrsqrt.f32 %v2517_v53  ;;  %vm2524_vm13 = vweird.f32 %v2517_v53 }
 0xb35   :  { %v6625_v54 = vpop.eup %6624 }
 0xb36   :  { %v2519_v55 = vmul.f32 %v6625_v54, %v2517_v53  ;;  %vm2525_vm11 = vweird.f32 %v6625_v54  ;;  %v5552_v53 = vor.u32 %v6444_v47, %v5551_v46  ;;  %v6434_v46 = vld [vmem:[%s8419_s17 + $0xc4] sm:$0xf0]  ;;  %v6416_v47 = vld [vmem:[%s8419_s17 + $0x34] sm:$0xf0] }
 0xb37   :  { %vm2526_vm15 = vmor %vm2524_vm13, %vm2525_vm11 }
 0xb38   :  { %v2520_v56 = vmul.f32 %v6625_v54, %v2519_v55  ;;  %v6443_v55 = vld [vmem:[%s8419_s17 + $0x114] sm:$0xf] }
 0xb3a   :  { %v2521_v57 = vmul.f32 0.5, %v2520_v56  ;;  %v5553_v56 = vld [vmem:[%s8419_s17 + $0x118] sm:$0xf0] }
 0xb3c   :  { %v2522_v58 = vsub.f32 1.5, %v2521_v57  ;;  %v6450_v57 = vld [vmem:[%s8419_s17 + $0x144] sm:$0xf0] }
 0xb3e   :  { %v2523_v59 = vmul.f32 %v6625_v54, %v2522_v58  ;;  %v5543_v58 = vld [vmem:[%s8419_s17 + $0x100] sm:$0xf] }
 0xb40   :  { %v2527_v61 = vsel %vm2526_vm15, %v6625_v54, %v2523_v59  ;;  %v5585_v54 = vld [vmem:[%s8419_s17 + $0x158] sm:$0xf0]  ;;  %v6442_v59 = vld [vmem:[%s8419_s17 + $0x104] sm:$0xf0] }
 0xb41   :  { %v2529_v62 = vmul.f32 %v2528_v60, %v2527_v61  ;;  %v5665_v60 = vld [vmem:[%s8419_s17 + $0x70] sm:$0xf]  ;;  %v6424_v61 = vld [vmem:[%s8419_s17 + $0x74] sm:$0xf0] }
 0xb43   :  { %5479 = vmatmul.msk.f32.vlgmr.msra.gmra.mxu2 %vm1787_vm14, %v2529_v62  ;;  %v5535_v62 = vld [vmem:[%s8419_s17 + $0xf0] sm:$0xf] }
 0xb4b   :  { %5480 = vmatmul.msk.f32.vlgmr.msrb.gmra.mxu2 %vm1787_vm14, %v2553_v63  ;;  %vm2603_vm14 = vcmask 1047815   ;;  %v5588_v63 = vor.u32 %v6451_v51, %v5585_v54  ;;  %v5634_v51 = vor.u32 %v6416_v47, %v5633_v44  ;;  %v6414_v54 = vld [vmem:[%s8419_s17 + $0x24] sm:$0xf0] }
 0xbc6   :  { %v2550_v1 = vpop.f32.mrf.mxu2 }
 0xbc7   :  { %v2577_v2 = vperm.slane %v2550_v1, 0  ;;  %v5556_v1 = vor.u32 %v6443_v55, %v5553_v56  ;;  %v6421_v55 = vld [vmem:[%s8419_s17 + $0x64] sm:$0xf]  ;;  %v5659_v56 = vld [vmem:[%s8419_s17 + $0x68] sm:$0xf0] }
 0xbc9   :  { %v2578_v4 = vmul.f32 %v2577_v2, %v2487_v42  ;;  %v5593_v42 = vld [vmem:[%s8419_s17 + $0x168] sm:$0xf0]  ;;  %v6449_v2 = vld [vmem:[%s8419_s17 + $0x144] sm:$0xf] }
 0xbca   :  { %v5596_v49 = vor.u32 %v6453_v39, %v5593_v42  ;;  %v6418_v39 = vld [vmem:[%s8419_s17 + $0x44] sm:$0xf0] }
 0xbce   :  { %v2574_v3 = vpop.f32.mrf.mxu2 }
 0xbcf   :  { %v2579_v5 = vperm.slane %v2574_v3, 0  ;;  %v5576_v3 = vor.u32 %v6450_v57, %v5575_v48  ;;  %v6423_v48 = vld [vmem:[%s8419_s17 + $0x74] sm:$0xf] }
 0xbd1   :  { %v2580_v6 = vadd.f32 %v2579_v5, %v2578_v4  ;;  %v5544_v4 = vor.u32 %v6442_v59, %v5543_v58  ;;  %v5577_v5 = vld [vmem:[%s8419_s17 + $0x148] sm:$0xf0]  ;;  %v5662_v58 = vor.u32 %v6421_v55, %v5659_v56  ;;  %v5617_v59 = vld [vmem:[%s8419_s17 + $0x10] sm:$0xf] }
 0xbd2   :  { %v5580_v14 = vor.u32 %v6449_v2, %v5577_v5  ;;  %v6426_v5 = vld [vmem:[%s8419_s17 + $0x84] sm:$0xf0] }
 0xbd3   :  { %vm2581_vm1 = vcmp.ge.f32.partialorder %v2580_v6, 0.0  ;;  %v2582_v7 = vmul.f32 0.2, %v2580_v6 }
 0xbd5   :  { %v2583_v8 = vsel %vm2581_vm1, %v2580_v6, %v2582_v7  ;;  %v6441_v6 = vld [vmem:[%s8419_s17 + $0x104] sm:$0xf]  ;;  %v5545_v7 = vld [vmem:[%s8419_s17 + $0x108] sm:$0xf0] }
 0xbd6   :  { %v2599_v9 = vrot.slane %v2583_v8, 5  ;;  %v2591_v10 = vrot.slane %v2583_v8, 7  ;;  %v5666_v8 = vor.u32 %v6424_v61, %v5665_v60  ;;  %v5548_v15 = vor.u32 %v6441_v6, %v5545_v7  ;;  %v6412_v60 = vld [vmem:[%s8419_s17 + $0x14] sm:$0xf0] }
 0xbd7   :  { %v5618_v61 = vor.u32 %v6412_v60, %v5617_v59  ;;  %v5813_v60 = vld [vmem:[%s8419_s17 + $0x220] sm:$0xf] }
 0xbd8   :  { %2600 = vrot.lane.b32.xlu2 %v2599_v9, %s7096_s6  ;;  %2592 = vrot.lane.b32.xlu1 %v2591_v10, %s7096_s6  ;;  %v6440_v9 = vld [vmem:[%s8419_s17 + $0xf4] sm:$0xf0]  ;;  %v5697_v10 = vld [vmem:[%s8419_s17 + $0xb0] sm:$0xf] }
 0xbd9   :  { %v5536_v16 = vor.u32 %v6440_v9, %v5535_v62  ;;  %v6435_v62 = vld [vmem:[%s8419_s17 + $0xd4] sm:$0xf]  ;;  %v5651_v9 = vld [vmem:[%s8419_s17 + $0x58] sm:$0xf0] }
 0xc32   :  { %v2601_v11 = vpop.permute.xlu2 %2600 }
 0xc33   :  { %2604 = vst.msk [vmem:[#allocation5] sm:$0x80] %vm2603_vm14, %v2601_v11  ;;  %vm3892_vm14 = vcmask 517120  }
 0xc34   :  { %2606 = vst.msk [vmem:[#allocation5 + $0x8] sm:$0x80] %vm2605_vm2, %v2601_v11  ;;  %vm3937_vm2 = vcmask 1044480  }
 0xc35   :  { %2608 = vst.msk [vmem:[#allocation5 + $0x10] sm:$0x7] %vm2607_vm3, %v2601_v11  ;;  %vm3933_vm3 = vcmask 80896  }
 0xc36   :  { %2610 = vst.msk [vmem:[#allocation5 + $0x18] sm:$0x7] %vm2609_vm5, %v2601_v11  ;;  %v6432_v11 = vld [vmem:[%s8419_s17 + $0xb4] sm:$0xf0]  ;;  %vm3917_vm5 = vcmask 1048070  }
 0xc3c   :  { %v2613_v18 = vld [vmem:[#allocation5 + $0x10] sm:$0xf] }
 0xc3d   :  { %v2614_v21 = vld [vmem:[#allocation5 + $0x18] sm:$0xf] }
 0xc4a   :  { %v2593_v12 = vpop.permute.xlu1 %2592 }
 0xc4b   :  { %2596 = vst.msk [vmem:[#allocation5] sm:$0x1e] %vm2595_vm6, %v2593_v12  ;;  %vm3920_vm6 = vcmask 1040896  }
 0xc4c   :  { %2598 = vst.msk [vmem:[#allocation5 + $0x8] sm:$0x1e] %vm2597_vm7, %v2593_v12  ;;  %v5657_v12 = vld [vmem:[%s8419_s17 + $0x60] sm:$0xf]  ;;  %vm3905_vm7 = vcmask 1043969  }
 0xc52   :  { %v2611_v17 = vld [vmem:[#allocation5] sm:$0xff] }
 0xc53   :  { %v2615_v19 = vpack.c.bf16 %v2613_v18, %v2611_v17  ;;  %v2612_v20 = vld [vmem:[#allocation5 + $0x8] sm:$0xff]  ;;  %v5527_v17 = vld [vmem:[%s8419_s17 + $0xe0] sm:$0xf]  ;;  %v5698_v18 = vor.u32 %v6432_v11, %v5697_v10  ;;  %v6433_v11 = vld [vmem:[%s8419_s17 + $0xc4] sm:$0xf] }
 0xc54   :  { %v2616_v25 = vpack.c.bf16 %v2614_v21, %v2612_v20  ;;  %v5537_v20 = vld [vmem:[%s8419_s17 + $0xf8] sm:$0xf0]  ;;  %v5658_v21 = vor.u32 %v6422_v13, %v5657_v12  ;;  %v5528_v28 = vor.u32 %v6438_v22, %v5527_v17  ;;  %v5513_v12 = vld [vmem:[%s8419_s17 + $0xc8] sm:$0xf0]  ;;  %v6417_v13 = vld [vmem:[%s8419_s17 + $0x44] sm:$0xf] }
 0xc55   :  { %v7600_v31 = vsel %vm2622_vm8, %v2615_v19, 0  ;;  %v6439_v19 = vld [vmem:[%s8419_s17 + $0xf4] sm:$0xf] }
 0xc56   :  { %2636 = vmatpush.bf16.msra.mxu3 %v7600_v31  ;;  %v7610_v33 = vsel %vm2622_vm8, %v2616_v25, 0  ;;  %2693 = vmatpush.bf16.msra.mxu2 %v7600_v31  ;;  %v5649_v25 = vld [vmem:[%s8419_s17 + $0x50] sm:$0xf]  ;;  %v6415_v17 = vld [vmem:[%s8419_s17 + $0x34] sm:$0xf] }
 0xc57   :  { %2649 = vmatpush.bf16.msrb.mxu1 %v7610_v33  ;;  %2706 = vmatpush.bf16.msrb.mxu0 %v7610_v33 }
 0xc59   :  { %5483 = vmatmul.msk.bf16.vlgmr.msra.gmra.mxu2 %vm2618_vm9, %v2682_v34  ;;  %5481 = vmatmul.msk.bf16.vlgmr.msra.gmra.mxu3 %vm2618_vm9, %v2617_v35 }
 0xc5a   :  { %2862 = vmatpush.bf16.msrb.mxu3 %v5568_v27  ;;  %5484 = vmatmul.msk.bf16.vlgmr.msrb.gmra.mxu0 %vm2618_vm9, %v2682_v34  ;;  %v5540_v27 = vor.u32 %v6439_v19, %v5537_v20  ;;  %v6431_v19 = vld [vmem:[%s8419_s17 + $0xb4] sm:$0xf]  ;;  %v5699_v20 = vld [vmem:[%s8419_s17 + $0xb8] sm:$0xf0] }
 0xc5b   :  { %2879 = vmatpush.bf16.msra.mxu1 %v5600_v26  ;;  %2905 = vmatpush.bf16.msra.mxu0 %v5604_v37  ;;  %v6420_v26 = vld [vmem:[%s8419_s17 + $0x54] sm:$0xf0]  ;;  %v5702_v22 = vor.u32 %v6431_v19, %v5699_v20  ;;  %v5791_v20 = vld [vmem:[%s8419_s17 + $0x1f8] sm:$0xf0] }
 0xc5c   :  { %5482 = vmatmul.msk.bf16.vlgmr.msrb.gmra.mxu1 %vm2618_vm9, %v2617_v35  ;;  %2888 = vmatpush.bf16.msrb.mxu2 %v5572_v38  ;;  %v5650_v34 = vor.u32 %v6420_v26, %v5649_v25  ;;  %v6436_v35 = vld [vmem:[%s8419_s17 + $0xd4] sm:$0xf0]  ;;  %v5641_v38 = vld [vmem:[%s8419_s17 + $0x40] sm:$0xf]  ;;  %v6413_v25 = vld [vmem:[%s8419_s17 + $0x24] sm:$0xf] }
 0xc5d   :  { %v6428_v37 = vld [vmem:[%s8419_s17 + $0x94] sm:$0xf0]  ;;  %v5642_v43 = vor.u32 %v6418_v39, %v5641_v38  ;;  %v5627_v26 = vld [vmem:[%s8419_s17 + $0x28] sm:$0xf0]  ;;  %v6425_v38 = vld [vmem:[%s8419_s17 + $0x84] sm:$0xf] }
 0xc5e   :  { %2863 = vmatpush.bf16.msrb.mxu3 %v5560_v41  ;;  %v5520_v41 = vor.u32 %v6436_v35, %v5519_v29  ;;  %v5682_v42 = vor.u32 %v6428_v37, %v5681_v36  ;;  %v6411_v29 = vld [vmem:[%s8419_s17 + $0x14] sm:$0xf]  ;;  %v6409_v35 = vld [vmem:[%s8419_s17 + $0x4] sm:$0xf]  ;;  %v5611_v37 = vld [vmem:[%s8419_s17 + $0x8] sm:$0xf0] }
 0xc5f   :  { %2880 = vmatpush.bf16.msra.mxu1 %v5592_v40  ;;  %2906 = vmatpush.bf16.msra.mxu0 %v5596_v49  ;;  %v5532_v40 = vor.u32 %v6437_v0, %v5529_v32  ;;  %v5667_v49 = vld [vmem:[%s8419_s17 + $0x78] sm:$0xf0]  ;;  %v6427_v32 = vld [vmem:[%s8419_s17 + $0x94] sm:$0xf]  ;;  %v5614_v39 = vor.u32 %v6409_v35, %v5611_v37  ;;  %v6465_v35 = vld [vmem:[%s8419_s17 + $0x1c4] sm:$0xf] }
 0xc60   :  { %2889 = vmatpush.bf16.msrb.mxu2 %v5564_v50  ;;  %v5512_v50 = vor.u32 %v6434_v46, %v5511_v45  ;;  %v5767_v37 = vld [vmem:[%s8419_s17 + $0x1c8] sm:$0xf0] }
 0xc62   :  { %2864 = vmatpush.bf16.msrb.mxu3 %v5552_v53  ;;  %v5670_v53 = vor.u32 %v6423_v48, %v5667_v49 }
 0xc63   :  { %2881 = vmatpush.bf16.msra.mxu1 %v5584_v52  ;;  %2907 = vmatpush.bf16.msra.mxu0 %v5588_v63  ;;  %v5625_v52 = vld [vmem:[%s8419_s17 + $0x20] sm:$0xf]  ;;  %v5521_v63 = vld [vmem:[%s8419_s17 + $0xd8] sm:$0xf0] }
 0xc64   :  { %2890 = vmatpush.bf16.msrb.mxu2 %v5556_v1  ;;  %v5626_v57 = vor.u32 %v6414_v54, %v5625_v52  ;;  %v5609_v1 = vld [vmem:[%s8419_s17] sm:$0xf]  ;;  %v5524_v2 = vor.u32 %v6435_v62, %v5521_v63  ;;  %v6480_v52 = vld [vmem:[%s8419_s17 + $0x234] sm:$0xf0]  ;;  %v5823_v54 = vld [vmem:[%s8419_s17 + $0x238] sm:$0xf0] }
 0xc65   :  { %v6477_v62 = vld [vmem:[%s8419_s17 + $0x224] sm:$0xf]  ;;  %v5815_v63 = vld [vmem:[%s8419_s17 + $0x228] sm:$0xf0] }
 0xc66   :  { %2865 = vmatpush.bf16.msrb.mxu3 %v5544_v4  ;;  %v5673_v4 = vld [vmem:[%s8419_s17 + $0x80] sm:$0xf] }
 0xc67   :  { %2882 = vmatpush.bf16.msra.mxu1 %v5576_v3  ;;  %2908 = vmatpush.bf16.msra.mxu0 %v5580_v14  ;;  %v6410_v3 = vld [vmem:[%s8419_s17 + $0x4] sm:$0xf0]  ;;  %v5674_v7 = vor.u32 %v6426_v5, %v5673_v4  ;;  %v5516_v14 = vor.u32 %v6433_v11, %v5513_v12  ;;  %v6476_v4 = vld [vmem:[%s8419_s17 + $0x214] sm:$0xf0]  ;;  %v6475_v5 = vld [vmem:[%s8419_s17 + $0x214] sm:$0xf] }
 0xc68   :  { %2891 = vmatpush.bf16.msrb.mxu2 %v5548_v15  ;;  %v5610_v6 = vor.u32 %v6410_v3, %v5609_v1  ;;  %v5643_v15 = vld [vmem:[%s8419_s17 + $0x48] sm:$0xf0]  ;;  %v5805_v3 = vld [vmem:[%s8419_s17 + $0x210] sm:$0xf]  ;;  %v6473_v11 = vld [vmem:[%s8419_s17 + $0x204] sm:$0xf] }
 0xc69   :  { %v5799_v12 = vld [vmem:[%s8419_s17 + $0x208] sm:$0xf0] }
 0xc6a   :  { %2866 = vmatpush.bf16.msrb.mxu3 %v5536_v16  ;;  %v5646_v16 = vor.u32 %v6417_v13, %v5643_v15  ;;  %v3090_v15 = vld [vmem:[#allocation24 + $0x8] sm:$0x7] }
 0xc6b   :  { %3037 = vmatpush.bf16.msrb.mxu1 %v5666_v8  ;;  %3054 = vmatpush.bf16.msrb.mxu0 %v5698_v18  ;;  %v6419_v8 = vld [vmem:[%s8419_s17 + $0x54] sm:$0xf]  ;;  %v5635_v18 = vld [vmem:[%s8419_s17 + $0x38] sm:$0xf0] }
 0xc6c   :  { %2892 = vmatpush.bf16.msrb.mxu2 %v5540_v27  ;;  %v5654_v10 = vor.u32 %v6419_v8, %v5651_v9  ;;  %v5694_v27 = vor.u32 %v6429_v23, %v5691_v24  ;;  %v5797_v9 = vld [vmem:[%s8419_s17 + $0x200] sm:$0xf]  ;;  %v5783_v24 = vld [vmem:[%s8419_s17 + $0x1e8] sm:$0xf0] }
 0xc6e   :  { %2867 = vmatpush.bf16.msrb.mxu3 %v5528_v28  ;;  %v5630_v28 = vor.u32 %v6413_v25, %v5627_v26  ;;  %v5773_v26 = vld [vmem:[%s8419_s17 + $0x1d0] sm:$0xf] }
 0xc6f   :  { %3038 = vmatpush.bf16.msrb.mxu1 %v5658_v21  ;;  %3055 = vmatpush.bf16.msrb.mxu0 %v5690_v30  ;;  %v5638_v21 = vor.u32 %v6415_v17, %v5635_v18  ;;  %v5619_v30 = vld [vmem:[%s8419_s17 + $0x18] sm:$0xf0]  ;;  %v6472_v17 = vld [vmem:[%s8419_s17 + $0x1f4] sm:$0xf0]  ;;  %v6471_v18 = vld [vmem:[%s8419_s17 + $0x1f4] sm:$0xf] }
 0xc70   :  { %2893 = vmatpush.bf16.msrb.mxu2 %v5532_v40  ;;  %v5622_v0 = vor.u32 %v6411_v29, %v5619_v30  ;;  %v5675_v40 = vld [vmem:[%s8419_s17 + $0x88] sm:$0xf0]  ;;  %v5775_v30 = vld [vmem:[%s8419_s17 + $0x1d8] sm:$0xf0] }
 0xc72   :  { %2868 = vmatpush.bf16.msrb.mxu3 %v5520_v41  ;;  %v5678_v41 = vor.u32 %v6425_v38, %v5675_v40  ;;  %v5770_v38 = vor.u32 %v6465_v35, %v5767_v37  ;;  %v6464_v40 = vld [vmem:[%s8419_s17 + $0x1b4] sm:$0xf0] }
 0xc73   :  { %3039 = vmatpush.bf16.msrb.mxu1 %v5650_v34  ;;  %3056 = vmatpush.bf16.msrb.mxu0 %v5682_v42  ;;  %v5683_v34 = vld [vmem:[%s8419_s17 + $0x98] sm:$0xf0] }
 0xc74   :  { %2894 = vmatpush.bf16.msrb.mxu2 %v5524_v2  ;;  %v5686_v36 = vor.u32 %v6427_v32, %v5683_v34  ;;  %v5818_v2 = vor.u32 %v6477_v62, %v5815_v63  ;;  %v5765_v32 = vld [vmem:[%s8419_s17 + $0x1c0] sm:$0xf]  ;;  %v6466_v34 = vld [vmem:[%s8419_s17 + $0x1c4] sm:$0xf0]  ;;  %v5735_v63 = vld [vmem:[%s8419_s17 + $0x188] sm:$0xf0] }
 0xc76   :  { %2869 = vmatpush.bf16.msrb.mxu3 %v5512_v50  ;;  %v5821_v50 = vld [vmem:[%s8419_s17 + $0x230] sm:$0xf] }
 0xc77   :  { %3040 = vmatpush.bf16.msrb.mxu1 %v5642_v43  ;;  %3057 = vmatpush.bf16.msrb.mxu0 %v5674_v7  ;;  %v5806_v7 = vor.u32 %v6476_v4, %v5805_v3 }
 0xc78   :  { %2895 = vmatpush.bf16.msrb.mxu2 %v5516_v14  ;;  %v5802_v14 = vor.u32 %v6473_v11, %v5799_v12 }
 0xc7a   :  { %3063 = vmatpush.bf16.msra.mxu3 %v5670_v53  ;;  %v6479_v53 = vld [vmem:[%s8419_s17 + $0x234] sm:$0xf] }
 0xc7b   :  { %3041 = vmatpush.bf16.msrb.mxu1 %v5634_v51  ;;  %v5826_v59 = vor.u32 %v6479_v53, %v5823_v54  ;;  %v6459_v53 = vld [vmem:[%s8419_s17 + $0x194] sm:$0xf] }
 0xc7c   :  { %3080 = vmatpush.bf16.msra.mxu2 %v5702_v22  ;;  %v6469_v22 = vld [vmem:[%s8419_s17 + $0x1e4] sm:$0xf] }
 0xc7d   :  { %v5786_v25 = vor.u32 %v6469_v22, %v5783_v24 }
 0xc7e   :  { %3064 = vmatpush.bf16.msra.mxu3 %v5662_v58  ;;  %v5822_v58 = vor.u32 %v6480_v52, %v5821_v50  ;;  %v6460_v52 = vld [vmem:[%s8419_s17 + $0x194] sm:$0xf0] }
 0xc7f   :  { %3042 = vmatpush.bf16.msrb.mxu1 %v5626_v57 }
 0xc80   :  { %3081 = vmatpush.bf16.msra.mxu2 %v5694_v27  ;;  %v6468_v27 = vld [vmem:[%s8419_s17 + $0x1d4] sm:$0xf0] }
 0xc81   :  { %v5774_v29 = vor.u32 %v6468_v27, %v5773_v26  ;;  %v6492_v26 = vld [vmem:[%s8419_s17 + $0x294] sm:$0xf0]  ;;  %v6491_v27 = vld [vmem:[%s8419_s17 + $0x294] sm:$0xf] }
 0xc82   :  { %3065 = vmatpush.bf16.msra.mxu3 %v5654_v10  ;;  %v6474_v10 = vld [vmem:[%s8419_s17 + $0x204] sm:$0xf0] }
 0xc83   :  { %3043 = vmatpush.bf16.msrb.mxu1 %v5618_v61  ;;  %v6478_v61 = vld [vmem:[%s8419_s17 + $0x224] sm:$0xf0]  ;;  %v5798_v13 = vor.u32 %v6474_v10, %v5797_v9 }
 0xc84   :  { %3082 = vmatpush.bf16.msra.mxu2 %v5686_v36  ;;  %v5814_v1 = vor.u32 %v6478_v61, %v5813_v60  ;;  %v5766_v36 = vor.u32 %v6466_v34, %v5765_v32 }
 0xc86   :  { %3066 = vmatpush.bf16.msra.mxu3 %v5646_v16  ;;  %v5789_v16 = vld [vmem:[%s8419_s17 + $0x1f0] sm:$0xf] }
 0xc87   :  { %3044 = vmatpush.bf16.msrb.mxu1 %v5610_v6  ;;  %v5807_v6 = vld [vmem:[%s8419_s17 + $0x218] sm:$0xf0]  ;;  %v5790_v19 = vor.u32 %v6472_v17, %v5789_v16 }
 0xc88   :  { %3083 = vmatpush.bf16.msra.mxu2 %v5678_v41  ;;  %v5810_v8 = vor.u32 %v6475_v5, %v5807_v6  ;;  %v6463_v41 = vld [vmem:[%s8419_s17 + $0x1b4] sm:$0xf]  ;;  %v5915_v17 = vld [vmem:[%s8419_s17 + $0x2b8] sm:$0xf0] }
 0xc8a   :  { %3067 = vmatpush.bf16.msra.mxu3 %v5638_v21  ;;  %v6470_v21 = vld [vmem:[%s8419_s17 + $0x1e4] sm:$0xf0] }
 0xc8e   :  { %3068 = vmatpush.bf16.msra.mxu3 %v5630_v28  ;;  %v6467_v28 = vld [vmem:[%s8419_s17 + $0x1d4] sm:$0xf] }
 0xc92   :  { %3069 = vmatpush.bf16.msra.mxu3 %v5622_v0  ;;  %v5778_v0 = vor.u32 %v6467_v28, %v5775_v30  ;;  %v5899_v28 = vld [vmem:[%s8419_s17 + $0x298] sm:$0xf0] }
 0xc93   :  { %v5902_v35 = vor.u32 %v6491_v27, %v5899_v28  ;;  %v5859_v28 = vld [vmem:[%s8419_s17 + $0x248] sm:$0xf0] }
 0xc96   :  { %3070 = vmatpush.bf16.msra.mxu3 %v5614_v39  ;;  %v5757_v39 = vld [vmem:[%s8419_s17 + $0x1b0] sm:$0xf] }
 0xcd7   :  { %v2708_v42 = vpop.f32.mrf.mxu0 }
 0xcd8   :  { %v2713_v44 = vpack.c.bf16 %v2708_v42, %v2708_v42  ;;  %v5758_v42 = vor.u32 %v6464_v40, %v5757_v39 }
 0xcd9   :  { %v2651_v43 = vpop.f32.mrf.mxu1 }
 0xcda   :  { %5605 = vmatmul.msk.bf16.vlgmr.msra.gmra.mxu1 %vm2585_vm12, %v2713_v44  ;;  %5606 = vmatmul.msk.bf16.vlgmr.msra.gmra.mxu0 %vm2585_vm12, %v2713_v44  ;;  %v2656_v57 = vpack.c.bf16 %v2651_v43, %v2651_v43  ;;  %v5759_v43 = vld [vmem:[%s8419_s17 + $0x1b8] sm:$0xf0] }
 0xcdb   :  { %3101 = vmatpush.bf16.msra.mxu0 %v7600_v31  ;;  %3114 = vmatpush.bf16.msra.mxu1 %v7610_v33  ;;  %v5762_v44 = vor.u32 %v6463_v41, %v5759_v43 }
 0xcdc   :  { %v2695_v45 = vpop.f32.mrf.mxu2  ;;  %v2638_v46 = vpop.f32.mrf.mxu3 }
 0xcdd   :  { %v2712_v47 = vpack.c.bf16 %v2695_v45, %v2695_v45  ;;  %v2655_v56 = vpack.c.bf16 %v2638_v46, %v2638_v46  ;;  %v5749_v45 = vld [vmem:[%s8419_s17 + $0x1a0] sm:$0xf]  ;;  %v6462_v46 = vld [vmem:[%s8419_s17 + $0x1a4] sm:$0xf0] }
 0xcdf   :  { %v2710_v48 = vpop.f32.mrf.mxu0  ;;  %2870 = vmatmul.bf16.vlgmr.msrb.gmra.mxu3 %v2712_v47  ;;  %2896 = vmatmul.bf16.vlgmr.msrb.gmra.mxu2 %v2712_v47  ;;  %v6461_v47 = vld [vmem:[%s8419_s17 + $0x1a4] sm:$0xf] }
 0xce0   :  { %3270 = vmatpush.bf16.msrb.mxu2 %v5790_v19  ;;  %v5750_v48 = vor.u32 %v6462_v46, %v5749_v45  ;;  %v6494_v19 = vld [vmem:[%s8419_s17 + $0x2a4] sm:$0xf0]  ;;  %v5889_v46 = vld [vmem:[%s8419_s17 + $0x280] sm:$0xf] }
 0xce1   :  { %v2653_v49 = vpop.f32.mrf.mxu1  ;;  %v3325_v45 = vld [vmem:[#allocation24 + $0xc] sm:$0x7] }
 0xce2   :  { %v5751_v49 = vld [vmem:[%s8419_s17 + $0x1a8] sm:$0xf0] }
 0xce3   :  { %v5754_v50 = vor.u32 %v6461_v47, %v5751_v49  ;;  %v6490_v47 = vld [vmem:[%s8419_s17 + $0x284] sm:$0xf0] }
 0xce4   :  { %v2640_v51 = vpop.f32.mrf.mxu3  ;;  %v2697_v55 = vpop.f32.mrf.mxu2  ;;  %v5890_v49 = vor.u32 %v6490_v47, %v5889_v46 }
 0xce5   :  { %v5741_v51 = vld [vmem:[%s8419_s17 + $0x190] sm:$0xf]  ;;  %v5743_v55 = vld [vmem:[%s8419_s17 + $0x198] sm:$0xf0] }
 0xce6   :  { %v5742_v54 = vor.u32 %v6460_v52, %v5741_v51  ;;  %v5881_v52 = vld [vmem:[%s8419_s17 + $0x270] sm:$0xf] }
 0xcea   :  { %3045 = vmatmul.bf16.vlgmr.msrb.gmra.mxu1 %v2655_v56  ;;  %5703 = vmatmul.msk.bf16.vlgmr.msrb.gmra.mxu0 %vm2585_vm12, %v2656_v57 }
 0xceb   :  { %3287 = vmatpush.bf16.msrb.mxu0 %v5822_v58  ;;  %3313 = vmatpush.bf16.msrb.mxu1 %v5826_v59  ;;  %v6458_v58 = vld [vmem:[%s8419_s17 + $0x184] sm:$0xf0]  ;;  %v6457_v59 = vld [vmem:[%s8419_s17 + $0x184] sm:$0xf] }
 0xcef   :  { %3071 = vmatmul.bf16.vlgmr.msra.gmra.mxu3 %v2655_v56  ;;  %3288 = vmatpush.bf16.msrb.mxu0 %v5814_v1  ;;  %v5746_v56 = vor.u32 %v6459_v53, %v5743_v55  ;;  %v5738_v1 = vor.u32 %v6457_v59, %v5735_v63  ;;  %v6488_v53 = vld [vmem:[%s8419_s17 + $0x274] sm:$0xf0] }
 0xcf0   :  { %3314 = vmatpush.bf16.msrb.mxu1 %v5818_v2  ;;  %5704 = vmatmul.msk.bf16.vlgmr.msra.gmra.mxu2 %vm2585_vm12, %v2656_v57  ;;  %v5733_v57 = vld [vmem:[%s8419_s17 + $0x180] sm:$0xf]  ;;  %v5882_v55 = vor.u32 %v6488_v53, %v5881_v52  ;;  %v6504_v59 = vld [vmem:[%s8419_s17 + $0x2f4] sm:$0xf0] }
 0xcf1   :  { %v5734_v62 = vor.u32 %v6458_v58, %v5733_v57  ;;  %v5945_v58 = vld [vmem:[%s8419_s17 + $0x2f0] sm:$0xf] }
 0xcf3   :  { %3289 = vmatpush.bf16.msrb.mxu0 %v5806_v7 }
 0xcf4   :  { %3315 = vmatpush.bf16.msrb.mxu1 %v5810_v8 }
 0xcf7   :  { %3290 = vmatpush.bf16.msrb.mxu0 %v5798_v13  ;;  %v5913_v13 = vld [vmem:[%s8419_s17 + $0x2b0] sm:$0xf] }
 0xcf8   :  { %3316 = vmatpush.bf16.msrb.mxu1 %v5802_v14  ;;  %v6496_v14 = vld [vmem:[%s8419_s17 + $0x2b4] sm:$0xf0] }
 0xcf9   :  { %v5914_v16 = vor.u32 %v6496_v14, %v5913_v13  ;;  %v5865_v14 = vld [vmem:[%s8419_s17 + $0x250] sm:$0xf] }
 0xcfa   :  { %5705 = vmatmul.msk.bf16.vlgmr.msra.gmra.mxu0 %vm2618_vm9, %v3090_v15  ;;  %5706 = vmatmul.msk.bf16.vlgmr.msra.gmra.mxu1 %vm2618_vm9, %v3090_v15  ;;  %v6495_v15 = vld [vmem:[%s8419_s17 + $0x2b4] sm:$0xf] }
 0xcfb   :  { %3336 = vmatpush.bf16.msra.mxu0 %v7600_v31  ;;  %v5794_v31 = vor.u32 %v6471_v18, %v5791_v20  ;;  %v5905_v18 = vld [vmem:[%s8419_s17 + $0x2a0] sm:$0xf]  ;;  %v5918_v20 = vor.u32 %v6495_v15, %v5915_v17  ;;  %v6484_v15 = vld [vmem:[%s8419_s17 + $0x254] sm:$0xf0] }
 0xcfc   :  { %3349 = vmatpush.bf16.msra.mxu1 %v7610_v33  ;;  %v5781_v33 = vld [vmem:[%s8419_s17 + $0x1e0] sm:$0xf]  ;;  %v5866_v17 = vor.u32 %v6484_v15, %v5865_v14  ;;  %v8249_v14 = vld [vmem:[#allocation25] sm:$0xff] }
 0xcfd   :  { %3296 = vmatpush.bf16.msrb.mxu3 %v5794_v31  ;;  %v5782_v23 = vor.u32 %v6470_v21, %v5781_v33  ;;  %v6493_v31 = vld [vmem:[%s8419_s17 + $0x2a4] sm:$0xf]  ;;  %v5907_v33 = vld [vmem:[%s8419_s17 + $0x2a8] sm:$0xf0]  ;;  %v5906_v21 = vor.u32 %v6494_v19, %v5905_v18  ;;  %v5867_v18 = vld [vmem:[%s8419_s17 + $0x258] sm:$0xf0] }
 0xcfe   :  { %v5910_v24 = vor.u32 %v6493_v31, %v5907_v33  ;;  %v5929_v19 = vld [vmem:[%s8419_s17 + $0x2d0] sm:$0xf] }
 0xcff   :  { %3271 = vmatpush.bf16.msrb.mxu2 %v5782_v23  ;;  %v8253_v15 = vld [vmem:[#allocation25 + $0x80] sm:$0xff] }
 0xd01   :  { %3297 = vmatpush.bf16.msrb.mxu3 %v5786_v25  ;;  %v5897_v25 = vld [vmem:[%s8419_s17 + $0x290] sm:$0xf] }
 0xd03   :  { %3272 = vmatpush.bf16.msrb.mxu2 %v5774_v29 }
 0xd05   :  { %3298 = vmatpush.bf16.msrb.mxu3 %v5778_v0  ;;  %v5898_v0 = vor.u32 %v6492_v26, %v5897_v25  ;;  %v6482_v25 = vld [vmem:[%s8419_s17 + $0x244] sm:$0xf0]  ;;  %v6481_v26 = vld [vmem:[%s8419_s17 + $0x244] sm:$0xf] }
 0xd07   :  { %3273 = vmatpush.bf16.msrb.mxu2 %v5766_v36 }
 0xd09   :  { %3299 = vmatpush.bf16.msrb.mxu3 %v5770_v38 }
 0xd0b   :  { %3274 = vmatpush.bf16.msrb.mxu2 %v5758_v42 }
 0xd0d   :  { %3300 = vmatpush.bf16.msrb.mxu3 %v5762_v44 }
 0xd0f   :  { %3275 = vmatpush.bf16.msrb.mxu2 %v5750_v48  ;;  %v6489_v48 = vld [vmem:[%s8419_s17 + $0x284] sm:$0xf] }
 0xd11   :  { %3301 = vmatpush.bf16.msrb.mxu3 %v5754_v50  ;;  %v5891_v50 = vld [vmem:[%s8419_s17 + $0x288] sm:$0xf0] }
 0xd12   :  { %v5894_v51 = vor.u32 %v6489_v48, %v5891_v50 }
 0xd13   :  { %3276 = vmatpush.bf16.msrb.mxu2 %v5742_v54  ;;  %v6487_v54 = vld [vmem:[%s8419_s17 + $0x274] sm:$0xf] }
 0xd15   :  { %3302 = vmatpush.bf16.msrb.mxu3 %v5746_v56  ;;  %v5883_v56 = vld [vmem:[%s8419_s17 + $0x278] sm:$0xf0] }
 0xd16   :  { %v5886_v57 = vor.u32 %v6487_v54, %v5883_v56 }
 0xd17   :  { %3277 = vmatpush.bf16.msrb.mxu2 %v5734_v62  ;;  %v5947_v62 = vld [vmem:[%s8419_s17 + $0x2f8] sm:$0xf0] }
 0xd19   :  { %3303 = vmatpush.bf16.msrb.mxu3 %v5738_v1  ;;  %v5873_v1 = vld [vmem:[%s8419_s17 + $0x260] sm:$0xf] }
 0xd1b   :  { %3505 = vmatpush.bf16.msra.mxu2 %v5914_v16  ;;  %v6483_v16 = vld [vmem:[%s8419_s17 + $0x254] sm:$0xf] }
 0xd1c   :  { %v5870_v31 = vor.u32 %v6483_v16, %v5867_v18  ;;  %v8255_v16 = vld [vmem:[#allocation27 + $0x70] sm:$0xff]  ;;  %v8261_v18 = vld [vmem:[#allocation27 + $0x60] sm:$0xff] }
 0xd1d   :  { %3531 = vmatpush.bf16.msra.mxu3 %v5918_v20  ;;  %v6500_v20 = vld [vmem:[%s8419_s17 + $0x2d4] sm:$0xf0] }
 0xd1e   :  { %v5930_v33 = vor.u32 %v6500_v20, %v5929_v19  ;;  %v8263_v19 = vld [vmem:[#allocation27 + $0x68] sm:$0xff]  ;;  %v8267_v20 = vld [vmem:[#allocation27 + $0x50] sm:$0xff] }
 0xd1f   :  { %3506 = vmatpush.bf16.msra.mxu2 %v5906_v21  ;;  %v6499_v21 = vld [vmem:[%s8419_s17 + $0x2d4] sm:$0xf] }
 0xd21   :  { %3532 = vmatpush.bf16.msra.mxu3 %v5910_v24  ;;  %v5857_v24 = vld [vmem:[%s8419_s17 + $0x240] sm:$0xf] }
 0xd22   :  { %v5858_v27 = vor.u32 %v6482_v25, %v5857_v24 }
 0xd23   :  { %3507 = vmatpush.bf16.msra.mxu2 %v5898_v0  ;;  %v5862_v0 = vor.u32 %v6481_v26, %v5859_v28 }
 0xd25   :  { %3533 = vmatpush.bf16.msra.mxu3 %v5902_v35  ;;  %v5923_v35 = vld [vmem:[%s8419_s17 + $0x2c8] sm:$0xf0] }
 0xd27   :  { %3508 = vmatpush.bf16.msra.mxu2 %v5890_v49 }
 0xd29   :  { %3534 = vmatpush.bf16.msra.mxu3 %v5894_v51 }
 0xd2b   :  { %3509 = vmatpush.bf16.msra.mxu2 %v5882_v55 }
 0xd2d   :  { %3535 = vmatpush.bf16.msra.mxu3 %v5886_v57 }
 0xd57   :  { %v2884_v60 = vpop.f32.mrf.mxu1  ;;  %v2910_v61 = vpop.f32.mrf.mxu0 }
 0xd5f   :  { %v2886_v2 = vpop.f32.mrf.mxu1  ;;  %v2912_v3 = vpop.f32.mrf.mxu0 }
 0xd60   :  { %v6486_v2 = vld [vmem:[%s8419_s17 + $0x264] sm:$0xf0]  ;;  %v6485_v3 = vld [vmem:[%s8419_s17 + $0x264] sm:$0xf] }
 0xd62   :  { %v2871_v4 = vpop.f32.mrf.mxu3  ;;  %v2897_v5 = vpop.f32.mrf.mxu2 }
 0xd63   :  { %v2885_v6 = vadd.f32 %v2884_v60, %v2871_v4  ;;  %v2911_v29 = vadd.f32 %v2910_v61, %v2897_v5  ;;  %v6503_v60 = vld [vmem:[%s8419_s17 + $0x2f4] sm:$0xf]  ;;  %v5946_v61 = vor.u32 %v6504_v59, %v5945_v58  ;;  %v5874_v4 = vor.u32 %v6486_v2, %v5873_v1  ;;  %v5875_v5 = vld [vmem:[%s8419_s17 + $0x268] sm:$0xf0]  ;;  %v8215_v1 = vld [vmem:[#allocation25 + $0x30] sm:$0xff] }
 0xd64   :  { %v5950_v63 = vor.u32 %v6503_v60, %v5947_v62  ;;  %v8209_v62 = vld [vmem:[#allocation25 + $0x38] sm:$0xff]  ;;  %v8217_v2 = vld [vmem:[#allocation25 + $0xb0] sm:$0xff] }
 0xd65   :  { %3510 = vmatpush.bf16.msra.mxu2 %v5874_v4  ;;  %v8223_v4 = vld [vmem:[#allocation25 + $0xa8] sm:$0xff] }
 0xd67   :  { %v3046_v7 = vpop.f32.mrf.mxu1  ;;  %v3059_v8 = vpop.f32.mrf.mxu0 }
 0xd68   :  { %v3047_v9 = vadd.f32 %v3046_v7, %v2885_v6  ;;  %v5937_v6 = vld [vmem:[%s8419_s17 + $0x2e0] sm:$0xf]  ;;  %v6502_v7 = vld [vmem:[%s8419_s17 + $0x2e4] sm:$0xf0] }
 0xd69   :  { %3511 = vmatpush.bf16.msra.mxu2 %v5866_v17  ;;  %v8257_v17 = vld [vmem:[#allocation27 + $0x78] sm:$0xff] }
 0xd6a   :  { %v8025_v10 = vadd.f32 %v3059_v8, %v3047_v9  ;;  %v2873_v11 = vpop.f32.mrf.mxu3  ;;  %v2899_v12 = vpop.f32.mrf.mxu2  ;;  %v5878_v8 = vor.u32 %v6485_v3, %v5875_v5  ;;  %v5938_v9 = vor.u32 %v6502_v7, %v5937_v6  ;;  %v8221_v3 = vld [vmem:[#allocation25 + $0x28] sm:$0xff]  ;;  %v8227_v5 = vld [vmem:[#allocation25 + $0x20] sm:$0xff]  ;;  %v8233_v7 = vld [vmem:[#allocation25 + $0x18] sm:$0xff] }
 0xd6b   :  { %v6501_v11 = vld [vmem:[%s8419_s17 + $0x2e4] sm:$0xf]  ;;  %v5939_v12 = vld [vmem:[%s8419_s17 + $0x2e8] sm:$0xf0] }
 0xd6c   :  { %v5942_v13 = vor.u32 %v6501_v11, %v5939_v12  ;;  %3536 = vmatpush.bf16.msra.mxu3 %v5878_v8  ;;  %v8229_v6 = vld [vmem:[#allocation25 + $0xa0] sm:$0xff]  ;;  %v8235_v8 = vld [vmem:[#allocation25 + $0x98] sm:$0xff]  ;;  %v8241_v11 = vld [vmem:[#allocation25 + $0x90] sm:$0xff] }
 0xd6d   :  { %3512 = vmatpush.bf16.msra.mxu2 %v5858_v27  ;;  %v8245_v12 = vld [vmem:[#allocation25 + $0x8] sm:$0xff] }
 0xd6f   :  { %v3048_v22 = vpop.f32.mrf.mxu1  ;;  %v3061_v23 = vpop.f32.mrf.mxu0 }
 0xd70   :  { %v5931_v22 = vld [vmem:[%s8419_s17 + $0x2d8] sm:$0xf0]  ;;  %3537 = vmatpush.bf16.msra.mxu3 %v5870_v31  ;;  %v8269_v31 = vld [vmem:[#allocation27 + $0x58] sm:$0xff] }
 0xd71   :  { %v5934_v23 = vor.u32 %v6499_v21, %v5931_v22  ;;  %v8277_v21 = vld [vmem:[#allocation27 + $0x48] sm:$0xff]  ;;  %v8283_v22 = vld [vmem:[#allocation27 + $0x30] sm:$0xff] }
 0xd72   :  { %v3072_v30 = vpop.f32.mrf.mxu3 }
 0xd73   :  { %v3073_v32 = vadd.f32 %v3072_v30, %v2911_v29  ;;  %v3085_v34 = vpop.f32.mrf.mxu2  ;;  %v5921_v29 = vld [vmem:[%s8419_s17 + $0x2c0] sm:$0xf]  ;;  %v6498_v30 = vld [vmem:[%s8419_s17 + $0x2c4] sm:$0xf0] }
 0xd74   :  { %3538 = vmatpush.bf16.msra.mxu3 %v5862_v0 }
 0xd75   :  { %v8063_v36 = vadd.f32 %v3085_v34, %v3073_v32  ;;  %v5922_v32 = vor.u32 %v6498_v30, %v5921_v29  ;;  %v6497_v34 = vld [vmem:[%s8419_s17 + $0x2c4] sm:$0xf] }
 0xd77   :  { %v3103_v37 = vpop.f32.mrf.mxu0  ;;  %v3116_v38 = vpop.f32.mrf.mxu1 }
 0xd78   :  { %v3120_v39 = vpack.c.bf16 %v3103_v37, %v3103_v37  ;;  %v3121_v40 = vpack.c.bf16 %v3116_v38, %v3116_v38  ;;  %v5926_v37 = vor.u32 %v6497_v34, %v5923_v35  ;;  %v8177_v38 = vld [vmem:[#allocation25 + $0x78] sm:$0xff] }
 0xd7a   :  { %3278 = vmatmul.bf16.vlgmr.msrb.gmra.mxu2 %v3120_v39  ;;  %5827 = vmatmul.msk.bf16.vlgmr.msrb.gmra.mxu0 %vm2585_vm12, %v3121_v40  ;;  %v3074_v41 = vpop.f32.mrf.mxu3 }
 0xd7b   :  { %3304 = vmatmul.bf16.vlgmr.msrb.gmra.mxu3 %v3120_v39  ;;  %5828 = vmatmul.msk.bf16.vlgmr.msrb.gmra.mxu1 %vm2585_vm12, %v3121_v40  ;;  %v3087_v42 = vpop.f32.mrf.mxu2  ;;  %v8179_v39 = vld [vmem:[#allocation25 + $0x70] sm:$0xff]  ;;  %v8182_v40 = vld [vmem:[#allocation25 + $0x68] sm:$0xff]  ;;  %v8185_v41 = vld [vmem:[#allocation25 + $0x60] sm:$0xff] }
 0xd7c   :  { %3522 = vmatpush.bf16.msrb.mxu0 %v5946_v61  ;;  %3548 = vmatpush.bf16.msrb.mxu1 %v5950_v63  ;;  %v8188_v42 = vld [vmem:[#allocation25 + $0x58] sm:$0xff]  ;;  %v8202_v61 = vld [vmem:[#allocation25 + $0x48] sm:$0xff] }
 0xd7d   :  { %v8211_v63 = vld [vmem:[#allocation25 + $0xb8] sm:$0xff]  ;;  %3676 = vmatpush.msrb.mxu2 %v8255_v16  ;;  %3696 = vmatpush.msrb.mxu3 %v8257_v17 }
 0xd7f   :  { %v3118_v43 = vpop.f32.mrf.mxu1  ;;  %v3105_v44 = vpop.f32.mrf.mxu0  ;;  %3677 = vmatpush.msrb.mxu2 %v8261_v18  ;;  %3697 = vmatpush.msrb.mxu3 %v8263_v19 }
 0xd80   :  { %3523 = vmatpush.bf16.msrb.mxu0 %v5938_v9  ;;  %3549 = vmatpush.bf16.msrb.mxu1 %v5942_v13  ;;  %v8239_v9 = vld [vmem:[#allocation25 + $0x10] sm:$0xff]  ;;  %v8247_v13 = vld [vmem:[#allocation25 + $0x88] sm:$0xff] }
 0xd81   :  { %3678 = vmatpush.msrb.mxu2 %v8267_v20  ;;  %3698 = vmatpush.msrb.mxu3 %v8269_v31 }
 0xd83   :  { %3699 = vmatpush.msrb.mxu3 %v8277_v21 }
 0xd84   :  { %3524 = vmatpush.bf16.msrb.mxu0 %v5930_v33  ;;  %3550 = vmatpush.bf16.msrb.mxu1 %v5934_v23  ;;  %v8275_v33 = vld [vmem:[#allocation27 + $0x40] sm:$0xff]  ;;  %v8285_v23 = vld [vmem:[#allocation27 + $0x38] sm:$0xff] }
 0xd85   :  { %3679 = vmatpush.msrb.mxu2 %v8275_v33  ;;  %3700 = vmatpush.msrb.mxu3 %v8285_v23 }
 0xd87   :  { %3680 = vmatpush.msrb.mxu2 %v8283_v22 }
 0xd88   :  { %3525 = vmatpush.bf16.msrb.mxu0 %v5922_v32  ;;  %3551 = vmatpush.bf16.msrb.mxu1 %v5926_v37 }
 0xd8a   :  { %5829 = vmatmul.msk.bf16.vlgmr.msra.gmra.mxu0 %vm2618_vm9, %v3325_v45 }
 0xd8b   :  { %5830 = vmatmul.msk.bf16.vlgmr.msra.gmra.mxu1 %vm2618_vm9, %v3325_v45 }
 0xd8c   :  { %3617 = vmatpush.msra.mxu0 %v8177_v38  ;;  %3645 = vmatpush.msra.mxu1 %v8211_v63 }
 0xd8e   :  { %3618 = vmatpush.msra.mxu0 %v8179_v39  ;;  %3646 = vmatpush.msra.mxu1 %v8217_v2 }
 0xd90   :  { %3619 = vmatpush.msra.mxu0 %v8182_v40  ;;  %3647 = vmatpush.msra.mxu1 %v8223_v4 }
 0xd92   :  { %3620 = vmatpush.msra.mxu0 %v8185_v41  ;;  %3648 = vmatpush.msra.mxu1 %v8229_v6 }
 0xd94   :  { %3621 = vmatpush.msra.mxu0 %v8188_v42  ;;  %3649 = vmatpush.msra.mxu1 %v8235_v8 }
 0xd96   :  { %3650 = vmatpush.msra.mxu1 %v8241_v11 }
 0xd98   :  { %3651 = vmatpush.msra.mxu1 %v8247_v13 }
 0xd9a   :  { %3652 = vmatpush.msra.mxu1 %v8253_v15 }
 0xdf7   :  { %v3292_v43 = vpop.f32.mrf.mxu0 }
 0xdf8   :  { %v3318_v44 = vpop.f32.mrf.mxu1 }
 0xdfd   :  { %v3279_v45 = vpop.f32.mrf.mxu2 }
 0xdfe   :  { %v3293_v46 = vadd.f32 %v3292_v43, %v3279_v45  ;;  %v3305_v47 = vpop.f32.mrf.mxu3 }
 0xdff   :  { %v3319_v48 = vadd.f32 %v3318_v44, %v3305_v47  ;;  %v3294_v49 = vpop.f32.mrf.mxu0 }
 0xe00   :  { %v8193_v50 = vadd.f32 %v3293_v46, %v8025_v10  ;;  %v3320_v51 = vpop.f32.mrf.mxu1  ;;  %v8200_v10 = vld [vmem:[#allocation25 + $0x50] sm:$0xff] }
 0xe01   :  { %v8196_v52 = vadd.f32 %v3319_v48, %v8063_v36  ;;  %3622 = vmatpush.msra.mxu0 %v8200_v10  ;;  %v8206_v36 = vld [vmem:[#allocation25 + $0x40] sm:$0xff] }
 0xe03   :  { %3623 = vmatpush.msra.mxu0 %v8202_v61 }
 0xe05   :  { %v3281_v53 = vpop.f32.mrf.mxu2  ;;  %3624 = vmatpush.msra.mxu0 %v8206_v36 }
 0xe06   :  { %v3307_v54 = vpop.f32.mrf.mxu3  ;;  %v3588_v53 = vld [vmem:[#allocation27 + $0x28] sm:$0xff] }
 0xe07   :  { %v3338_v55 = vpop.f32.mrf.mxu0  ;;  %3625 = vmatpush.msra.mxu0 %v8209_v62  ;;  %3701 = vmatpush.msrb.mxu3 %v3588_v53  ;;  %v3585_v54 = vld [vmem:[#allocation27 + $0x10] sm:$0xff] }
 0xe08   :  { %v3355_v56 = vpack.c.bf16 %v3338_v55, %v3338_v55  ;;  %v3351_v57 = vpop.f32.mrf.mxu1  ;;  %v3586_v55 = vld [vmem:[#allocation27 + $0x18] sm:$0xff] }
 0xe09   :  { %v3356_v58 = vpack.c.bf16 %v3351_v57, %v3351_v57  ;;  %3626 = vmatpush.msra.mxu0 %v8215_v1  ;;  %3702 = vmatpush.msrb.mxu3 %v3586_v55  ;;  %v3584_v57 = vld [vmem:[#allocation27 + $0x8] sm:$0xff] }
 0xe0a   :  { %3513 = vmatmul.bf16.vlgmr.msra.gmra.mxu2 %v3355_v56  ;;  %3539 = vmatmul.bf16.vlgmr.msra.gmra.mxu3 %v3355_v56  ;;  %v3583_v56 = vld [vmem:[#allocation27] sm:$0xff] }
 0xe0b   :  { %5951 = vmatmul.msk.bf16.vlgmr.msrb.gmra.mxu0 %vm2585_vm12, %v3356_v58  ;;  %5952 = vmatmul.msk.bf16.vlgmr.msrb.gmra.mxu1 %vm2585_vm12, %v3356_v58  ;;  %v7113_v58 = vmov 18.0  }
 0xe0c   :  { %3627 = vmatpush.msra.mxu0 %v8221_v3  ;;  %3731 = vmatpush.msrb.mxu1 %v8177_v38  ;;  %6626 = vrcp.f32 %v7113_v58 }
 0xe0d   :  { %3703 = vmatpush.msrb.mxu3 %v3584_v57 }
 0xe0e   :  { %3628 = vmatpush.msra.mxu0 %v8227_v5  ;;  %3732 = vmatpush.msrb.mxu1 %v8179_v39 }
 0xe0f   :  { %v3340_v59 = vpop.f32.mrf.mxu0  ;;  %3817 = vmatpush.msra.mxu3 %v8257_v17 }
 0xe10   :  { %v3353_v60 = vpop.f32.mrf.mxu1  ;;  %3629 = vmatpush.msra.mxu0 %v8233_v7  ;;  %3733 = vmatpush.msrb.mxu1 %v8182_v40 }
 0xe11   :  { %3818 = vmatpush.msra.mxu3 %v8263_v19 }
 0xe12   :  { %3630 = vmatpush.msra.mxu0 %v8239_v9  ;;  %3734 = vmatpush.msrb.mxu1 %v8185_v41  ;;  %v6627_v59 = vpop.eup %6626 }
 0xe13   :  { %3819 = vmatpush.msra.mxu3 %v8269_v31  ;;  %v3658_v60 = vmul.f32 18.0, %v6627_v59  ;;  %vm3662_vm10 = vweird.f32 %v6627_v59 }
 0xe14   :  { %3631 = vmatpush.msra.mxu0 %v8245_v12  ;;  %3735 = vmatpush.msrb.mxu1 %v8188_v42 }
 0xe15   :  { %3820 = vmatpush.msra.mxu3 %v8277_v21 }
 0xe16   :  { %3632 = vmatpush.msra.mxu0 %v8249_v14  ;;  %3736 = vmatpush.msrb.mxu1 %v8200_v10  ;;  %v3659_v10 = vsub.f32 1.0, %v3658_v60 }
 0xe17   :  { %3821 = vmatpush.msra.mxu3 %v8285_v23 }
 0xe18   :  { %3797 = vmatpush.msrb.mxu0 %v8255_v16  ;;  %3737 = vmatpush.msrb.mxu1 %v8202_v61  ;;  %v3660_v61 = vmul.f32 %v6627_v59, %v3659_v10 }
 0xe19   :  { %3822 = vmatpush.msra.mxu3 %v3588_v53 }
 0xe1a   :  { %3798 = vmatpush.msrb.mxu0 %v8261_v18  ;;  %3738 = vmatpush.msrb.mxu1 %v8206_v36  ;;  %v3661_v36 = vadd.f32 %v6627_v59, %v3660_v61 }
 0xe1b   :  { %3823 = vmatpush.msra.mxu3 %v3586_v55 }
 0xe1c   :  { %3799 = vmatpush.msrb.mxu0 %v8267_v20  ;;  %3739 = vmatpush.msrb.mxu1 %v8209_v62 }
 0xe1d   :  { %3824 = vmatpush.msra.mxu3 %v3584_v57 }
 0xe1e   :  { %3800 = vmatpush.msrb.mxu0 %v8275_v33  ;;  %3740 = vmatpush.msrb.mxu1 %v8215_v1  ;;  %v3663_v1 = vsel %vm3662_vm10, %v6627_v59, %v3661_v36  ;;  %v6631_v36 = vld [vmem:[#allocation6] sm:$0xff] }
 0xe1f   :  { %3893 = vst.msk [vmem:[#allocation6 + $0x28] sm:$0x3] %vm3892_vm14, %v6631_v36 }
 0xe20   :  { %3801 = vmatpush.msrb.mxu0 %v8283_v22  ;;  %3741 = vmatpush.msrb.mxu1 %v8221_v3 }
 0xe22   :  { %3742 = vmatpush.msrb.mxu1 %v8227_v5 }
 0xe24   :  { %3743 = vmatpush.msrb.mxu1 %v8233_v7 }
 0xe26   :  { %3744 = vmatpush.msrb.mxu1 %v8239_v9 }
 0xe28   :  { %3745 = vmatpush.msrb.mxu1 %v8245_v12 }
 0xe2a   :  { %3746 = vmatpush.msrb.mxu1 %v8249_v14 }
 0xe88   :  { %v3527_v24 = vpop.f32.mrf.mxu0  ;;  %v3553_v25 = vpop.f32.mrf.mxu1 }
 0xe8d   :  { %v3514_v26 = vpop.f32.mrf.mxu2  ;;  %v3540_v27 = vpop.f32.mrf.mxu3 }
 0xe8e   :  { %v3528_v28 = vadd.f32 %v3527_v24, %v3514_v26  ;;  %v3554_v29 = vadd.f32 %v3553_v25, %v3540_v27  ;;  %v3829_v25 = vld [vmem:[#allocation30] sm:$0x1] }
 0xe90   :  { %v8300_v30 = vadd.f32 %v3528_v28, %v8193_v50  ;;  %v8303_v0 = vadd.f32 %v3554_v29, %v8196_v52  ;;  %v3529_v32 = vpop.f32.mrf.mxu0  ;;  %v3555_v34 = vpop.f32.mrf.mxu1  ;;  %v3587_v52 = vld [vmem:[#allocation27 + $0x20] sm:$0xff] }
 0xe91   :  { %3681 = vmatpush.msrb.mxu2 %v3587_v52  ;;  %3802 = vmatpush.msrb.mxu0 %v3587_v52 }
 0xe92   :  { %v3599_v35 = vsel %vm2622_vm8, %v8300_v30, 0.0  ;;  %v3607_v37 = vsel %vm3606_vm4, %v8303_v0, 0.0 }
 0xe93   :  { %v3600_v38 = vrot.slane %v3599_v35, 4  ;;  %v3608_v39 = vrot.slane %v3607_v37, 4  ;;  %3682 = vmatpush.msrb.mxu2 %v3585_v54  ;;  %3803 = vmatpush.msrb.mxu0 %v3585_v54 }
 0xe95   :  { %v3601_v40 = vadd.f32 %v3600_v38, %v3599_v35  ;;  %v3609_v41 = vadd.f32 %v3608_v39, %v3607_v37  ;;  %v3516_v42 = vpop.f32.mrf.mxu2  ;;  %v3542_v43 = vpop.f32.mrf.mxu3  ;;  %3683 = vmatpush.msrb.mxu2 %v3583_v56  ;;  %3804 = vmatpush.msrb.mxu0 %v3583_v56 }
 0xe97   :  { %v3602_v44 = vrot.slane %v3601_v40, 2  ;;  %v3610_v45 = vrot.slane %v3609_v41, 2  ;;  %3759 = vmatpush.msra.mxu2 %v8211_v63 }
 0xe99   :  { %v3603_v46 = vadd.f32 %v3602_v44, %v3601_v40  ;;  %v3611_v47 = vadd.f32 %v3610_v45, %v3609_v41  ;;  %3760 = vmatpush.msra.mxu2 %v8217_v2  ;;  %v3784_v40 = vld [vmem:[#allocation28] sm:$0x1] }
 0xe9b   :  { %v3604_v48 = vrot.slane %v3603_v46, 1  ;;  %v3612_v49 = vrot.slane %v3611_v47, 1  ;;  %3761 = vmatpush.msra.mxu2 %v8223_v4 }
 0xe9d   :  { %v3605_v50 = vadd.f32 %v3604_v48, %v3603_v46  ;;  %v3613_v51 = vadd.f32 %v3612_v49, %v3611_v47  ;;  %3762 = vmatpush.msra.mxu2 %v8229_v6 }
 0xe9f   :  { %3633 = vmatmul.f32.vlgmr.msra.gmra.mxu0 %v3605_v50  ;;  %5953 = vmatmul.msk.f32.vlgmr.msra.gmra.mxu1 %vm2585_vm12, %v3613_v51 }
 0xea0   :  { %3861 = vmatpush.msra.mxu0 %v8257_v17  ;;  %3763 = vmatpush.msra.mxu2 %v8235_v8 }
 0xea2   :  { %3862 = vmatpush.msra.mxu0 %v8263_v19  ;;  %3764 = vmatpush.msra.mxu2 %v8241_v11 }
 0xea4   :  { %3863 = vmatpush.msra.mxu0 %v8269_v31  ;;  %3765 = vmatpush.msra.mxu2 %v8247_v13 }
 0xea6   :  { %3864 = vmatpush.msra.mxu0 %v8277_v21  ;;  %3766 = vmatpush.msra.mxu2 %v8253_v15 }
 0xea8   :  { %3865 = vmatpush.msra.mxu0 %v8285_v23 }
 0xeaa   :  { %3866 = vmatpush.msra.mxu0 %v3588_v53 }
 0xeac   :  { %3867 = vmatpush.msra.mxu0 %v3586_v55 }
 0xeae   :  { %3868 = vmatpush.msra.mxu0 %v3584_v57 }
 0xf1c   :  { %v3634_v62 = vpop.f32.mrf.mxu0  ;;  %v3654_v63 = vpop.f32.mrf.mxu1 }
 0xf1d   :  { %v3655_v2 = vadd.f32 %v3654_v63, %v3634_v62  ;;  %v3925_v62 = vld [vmem:[#allocation6 + $0x10] sm:$0xff]  ;;  %v3928_v63 = vld [vmem:[#allocation6 + $0x28] sm:$0x3] }
 0xf1f   :  { %v3664_v3 = vmul.f32 %v3663_v1, %v3655_v2 }
 0xf21   :  { %5954 = vmatmul.msk.f32.vlgmr.msrb.gmra.mxu2 %vm2585_vm12, %v3664_v3  ;;  %5955 = vmatmul.msk.f32.vlgmr.msrb.gmra.mxu3 %vm2585_vm12, %v3664_v3  ;;  %v3932_v3 = vld [vmem:[#allocation31] sm:$0x3] }
 0xf22   :  { %3841 = vmatpush.msrb.mxu2 %v8255_v16 }
 0xf24   :  { %3842 = vmatpush.msrb.mxu2 %v8261_v18 }
 0xf26   :  { %3843 = vmatpush.msrb.mxu2 %v8267_v20 }
 0xf28   :  { %3844 = vmatpush.msrb.mxu2 %v8275_v33 }
 0xf2a   :  { %3845 = vmatpush.msrb.mxu2 %v8283_v22 }
 0xf2c   :  { %3846 = vmatpush.msrb.mxu2 %v3587_v52 }
 0xf2e   :  { %3847 = vmatpush.msrb.mxu2 %v3585_v54 }
 0xf30   :  { %3848 = vmatpush.msrb.mxu2 %v3583_v56 }
 0xfa4   :  { %v3685_v4 = vpop.f32.mrf.mxu2  ;;  %v3705_v5 = vpop.f32.mrf.mxu3 }
 0xfa5   :  { %v3708_v6 = vperm.slane %v3685_v4, 0  ;;  %v3709_v7 = vperm.slane %v3705_v5, 0 }
 0xfa7   :  { %v3710_v8 = vsub.f32 %v8300_v30, %v3708_v6  ;;  %v3711_v9 = vsub.f32 %v8303_v0, %v3709_v7 }
 0xfa9   :  { %v3712_v11 = vmul.f32 %v3710_v8, %v3710_v8  ;;  %v3713_v12 = vmul.f32 %v3711_v9, %v3711_v9 }
 0xfab   :  { %v3714_v13 = vsel %vm2622_vm8, %v3712_v11, 0.0  ;;  %v3721_v14 = vsel %vm3606_vm4, %v3713_v12, 0.0 }
 0xfac   :  { %v3715_v15 = vrot.slane %v3714_v13, 4  ;;  %v3722_v16 = vrot.slane %v3721_v14, 4 }
 0xfae   :  { %v3716_v17 = vadd.f32 %v3715_v15, %v3714_v13  ;;  %v3723_v18 = vadd.f32 %v3722_v16, %v3721_v14  ;;  %v6540_v14 = vld [vmem:[#allocation33 + $0x118] sm:$0xff] }
 0xfaf   :  { %v4030_v16 = vld [vmem:[#allocation31 + $0x2] sm:$0x3] }
 0xfb0   :  { %v3717_v19 = vrot.slane %v3716_v17, 2  ;;  %v3724_v20 = vrot.slane %v3723_v18, 2 }
 0xfb2   :  { %v3718_v31 = vadd.f32 %v3717_v19, %v3716_v17  ;;  %v3725_v33 = vadd.f32 %v3724_v20, %v3723_v18  ;;  %v6539_v17 = vld [vmem:[#allocation33 + $0x110] sm:$0xff] }
 0xfb4   :  { %v3719_v21 = vrot.slane %v3718_v31, 1  ;;  %v3726_v22 = vrot.slane %v3725_v33, 1 }
 0xfb6   :  { %v3720_v23 = vadd.f32 %v3719_v21, %v3718_v31  ;;  %v3727_v24 = vadd.f32 %v3726_v22, %v3725_v33  ;;  %v6538_v31 = vld [vmem:[#allocation33 + $0x108] sm:$0xff]  ;;  %v6512_v21 = vld [vmem:[#allocation33 + $0x38] sm:$0xff]  ;;  %v6537_v22 = vld [vmem:[#allocation33 + $0x100] sm:$0xff] }
 0xfb8   :  { %3747 = vmatmul.f32.vlgmr.msrb.gmra.mxu1 %v3720_v23  ;;  %5956 = vmatmul.msk.f32.vlgmr.msra.gmra.mxu2 %vm2585_vm12, %v3727_v24  ;;  %v6532_v23 = vld [vmem:[#allocation33 + $0xd8] sm:$0xff]  ;;  %v6531_v24 = vld [vmem:[#allocation33 + $0xd0] sm:$0xff] }
 0xfc0   :  { %5959 = vmatmul.msk.f32.vlgmr.msrb.gmra.mxu2 %vm2585_vm12, %v3829_v25 }
0x1035   :  { %v3748_v26 = vpop.f32.mrf.mxu1 }
0x103b   :  { %v3768_v27 = vpop.f32.mrf.mxu2 }
0x103c   :  { %v3769_v28 = vadd.f32 %v3768_v27, %v3748_v26  ;;  %v6536_v26 = vld [vmem:[#allocation33 + $0xf8] sm:$0xff]  ;;  %v6530_v27 = vld [vmem:[#allocation33 + $0xc8] sm:$0xff] }
0x103e   :  { %v3771_v29 = vmul.f32 %v3769_v28, %v3663_v1  ;;  %v3931_v1 = vpack.c.bf16 %v3928_v63, %v3925_v62  ;;  %v6510_v28 = vld [vmem:[#allocation33 + $0x28] sm:$0xff]  ;;  %v6564_v62 = vld [vmem:[#allocation33 + $0x1d8] sm:$0xff]  ;;  %v6513_v63 = vld [vmem:[#allocation33 + $0x40] sm:$0xff] }
0x1040   :  { %v3772_v30 = vmax.f32 %v3771_v29, 0.0  ;;  %v8358_v2 = vsel %vm3937_vm2, %v3931_v1, 0  ;;  %v6535_v29 = vld [vmem:[#allocation33 + $0xf0] sm:$0xff] }
0x1041   :  { %3980 = vmatpush.bf16.msra.mxu2 %v8358_v2 }
0x1042   :  { %v3773_v0 = vadd.f32 1e-05, %v3772_v30  ;;  %v6529_v30 = vld [vmem:[#allocation33 + $0xc0] sm:$0xff] }
0x1043   :  { %v3850_v43 = vpop.f32.mrf.mxu2 }
0x1044   :  { %6628 = vrsqrt.f32 %v3773_v0  ;;  %vm3780_vm13 = vweird.f32 %v3773_v0  ;;  %v3877_v46 = vperm.slane %v3850_v43, 0  ;;  %5963 = vmatmul.msk.bf16.vlgmr.msra.gmra.mxu2 %vm3933_vm3, %v3932_v3  ;;  %v6525_v43 = vld [vmem:[#allocation33 + $0xa0] sm:$0xff] }
0x1045   :  { %4240 = vmatpush.bf16.msrb.mxu2 %v6532_v23  ;;  %v6557_v23 = vld [vmem:[#allocation33 + $0x1a0] sm:$0xff] }
0x1049   :  { %4241 = vmatpush.bf16.msrb.mxu2 %v6531_v24  ;;  %v6550_v24 = vld [vmem:[#allocation33 + $0x168] sm:$0xff] }
0x104a   :  { %v6629_v32 = vpop.eup %6628 }
0x104b   :  { %v3775_v34 = vmul.f32 %v6629_v32, %v3773_v0  ;;  %vm3781_vm11 = vweird.f32 %v6629_v32  ;;  %v6509_v0 = vld [vmem:[#allocation33 + $0x20] sm:$0xff] }
0x104c   :  { %vm3782_vm15 = vmor %vm3780_vm13, %vm3781_vm11 }
0x104d   :  { %v3776_v35 = vmul.f32 %v6629_v32, %v3775_v34  ;;  %4242 = vmatpush.bf16.msrb.mxu2 %v6530_v27  ;;  %v6528_v34 = vld [vmem:[#allocation33 + $0xb8] sm:$0xff] }
0x104e   :  { %v6548_v27 = vld [vmem:[#allocation33 + $0x158] sm:$0xff] }
0x104f   :  { %v3777_v37 = vmul.f32 0.5, %v3776_v35  ;;  %v6508_v35 = vld [vmem:[#allocation33 + $0x18] sm:$0xff] }
0x1051   :  { %v3778_v38 = vsub.f32 1.5, %v3777_v37  ;;  %4243 = vmatpush.bf16.msrb.mxu2 %v6529_v30  ;;  %v6533_v37 = vld [vmem:[#allocation33 + $0xe0] sm:$0xff] }
0x1052   :  { %v6553_v30 = vld [vmem:[#allocation33 + $0x180] sm:$0xff] }
0x1053   :  { %v3779_v39 = vmul.f32 %v6629_v32, %v3778_v38  ;;  %v6527_v38 = vld [vmem:[#allocation33 + $0xb0] sm:$0xff] }
0x1055   :  { %v3783_v41 = vsel %vm3782_vm15, %v6629_v32, %v3779_v39  ;;  %v6534_v32 = vld [vmem:[#allocation33 + $0xe8] sm:$0xff]  ;;  %4244 = vmatpush.bf16.msrb.mxu2 %v6528_v34  ;;  %v6507_v39 = vld [vmem:[#allocation33 + $0x10] sm:$0xff]  ;;  %v6545_v34 = vld [vmem:[#allocation33 + $0x140] sm:$0xff] }
0x1056   :  { %v3785_v42 = vmul.f32 %v3784_v40, %v3783_v41  ;;  %v6526_v40 = vld [vmem:[#allocation33 + $0xa8] sm:$0xff] }
0x1057   :  { %v6506_v41 = vld [vmem:[#allocation33 + $0x8] sm:$0xff] }
0x1058   :  { %5957 = vmatmul.msk.f32.vlgmr.msrb.gmra.mxu0 %vm2585_vm12, %v3785_v42  ;;  %5958 = vmatmul.msk.f32.vlgmr.msra.gmra.mxu3 %vm2585_vm12, %v3785_v42  ;;  %v6505_v42 = vld [vmem:[#allocation33] sm:$0xff] }
0x1059   :  { %4245 = vmatpush.bf16.msrb.mxu2 %v6527_v38 }
0x105d   :  { %4246 = vmatpush.bf16.msrb.mxu2 %v6526_v40 }
0x1060   :  { %5960 = vmatmul.msk.f32.vlgmr.msra.gmra.mxu0 %vm2585_vm12, %v3829_v25  ;;  %v6511_v25 = vld [vmem:[#allocation33 + $0x30] sm:$0xff] }
0x1061   :  { %4247 = vmatpush.bf16.msrb.mxu2 %v6525_v43 }
0x10d5   :  { %v3806_v44 = vpop.f32.mrf.mxu0 }
0x10d6   :  { %v3873_v45 = vperm.slane %v3806_v44, 0  ;;  %v6544_v44 = vld [vmem:[#allocation33 + $0x138] sm:$0xff] }
0x10d8   :  { %v3875_v47 = vmul.f32 %v3873_v45, %v3710_v8  ;;  %v6524_v45 = vld [vmem:[#allocation33 + $0x98] sm:$0xff] }
0x10d9   :  { %4432 = vmatpush.bf16.msra.mxu2 %v6524_v45  ;;  %v6572_v45 = vld [vmem:[#allocation33 + $0x218] sm:$0xff] }
0x10da   :  { %v3879_v48 = vadd.f32 %v3877_v46, %v3875_v47  ;;  %v6543_v46 = vld [vmem:[#allocation33 + $0x130] sm:$0xff] }
0x10db   :  { %v3826_v49 = vpop.f32.mrf.mxu3  ;;  %v6523_v47 = vld [vmem:[#allocation33 + $0x90] sm:$0xff] }
0x10dc   :  { %v3874_v50 = vperm.slane %v3826_v49, 0  ;;  %vm3881_vm0 = vcmp.ge.f32.partialorder %v3879_v48, 0.0  ;;  %v3883_v51 = vmul.f32 0.2, %v3879_v48  ;;  %v3982_v49 = vpop.f32.mrf.mxu2 }
0x10dd   :  { %v3870_v52 = vpop.f32.mrf.mxu0  ;;  %4433 = vmatpush.bf16.msra.mxu2 %v6523_v47  ;;  %v6571_v47 = vld [vmem:[#allocation33 + $0x210] sm:$0xff] }
0x10de   :  { %v3876_v53 = vmul.f32 %v3874_v50, %v3711_v9  ;;  %v3878_v54 = vperm.slane %v3870_v52, 0  ;;  %v3885_v55 = vsel %vm3881_vm0, %v3879_v48, %v3883_v51  ;;  %v6542_v48 = vld [vmem:[#allocation33 + $0x128] sm:$0xff]  ;;  %v6541_v51 = vld [vmem:[#allocation33 + $0x120] sm:$0xff]  ;;  %v6520_v52 = vld [vmem:[#allocation33 + $0x78] sm:$0xff] }
0x10df   :  { %v3908_v56 = vrot.slane %v3885_v55, 5  ;;  %v3896_v57 = vrot.slane %v3885_v55, 7  ;;  %v6522_v50 = vld [vmem:[#allocation33 + $0x88] sm:$0xff] }
0x10e0   :  { %v3880_v58 = vadd.f32 %v3878_v54, %v3876_v53  ;;  %v6521_v53 = vld [vmem:[#allocation33 + $0x80] sm:$0xff]  ;;  %v6519_v54 = vld [vmem:[#allocation33 + $0x70] sm:$0xff] }
0x10e1   :  { %3910 = vrot.lane.b32.xlu1 %v3908_v56, %s7085_s4  ;;  %3898 = vrot.lane.b32.xlu0 %v3896_v57, %s7085_s4  ;;  %v6518_v56 = vld [vmem:[#allocation33 + $0x68] sm:$0xff]  ;;  %v6517_v57 = vld [vmem:[#allocation33 + $0x60] sm:$0xff] }
0x10e2   :  { %vm3882_vm1 = vcmp.ge.f32.partialorder %v3880_v58, 0.0  ;;  %v3884_v59 = vmul.f32 0.2, %v3880_v58  ;;  %4434 = vmatpush.bf16.msra.mxu2 %v6522_v50 }
0x10e4   :  { %v3886_v60 = vsel %vm3882_vm1, %v3880_v58, %v3884_v59  ;;  %v3984_v55 = vpop.f32.mrf.mxu2  ;;  %v6516_v58 = vld [vmem:[#allocation33 + $0x58] sm:$0xff]  ;;  %v6515_v59 = vld [vmem:[#allocation33 + $0x50] sm:$0xff] }
0x10e5   :  { %v3897_v10 = vrot.slane %v3886_v60, 7  ;;  %v3909_v61 = vrot.slane %v3886_v60, 5 }
0x10e6   :  { %4435 = vmatpush.bf16.msra.mxu2 %v6521_v53 }
0x10e7   :  { %3900 = vrot.lane.b32.xlu2 %v3897_v10, %s7085_s4 }
0x10e9   :  { %3912 = vrot.lane.b32.xlu0 %v3909_v61, %s7085_s4  ;;  %v6514_v61 = vld [vmem:[#allocation33 + $0x48] sm:$0xff] }
0x1141   :  { %v3901_v4 = vpop.permute.xlu2 %3900 }
0x1153   :  { %v3911_v5 = vpop.permute.xlu1 %3910  ;;  %v3899_v6 = vpop.permute.xlu0 %3898 }
0x1154   :  { %3918 = vst.msk [vmem:[#allocation6] sm:$0xc0] %vm3917_vm5, %v3911_v5  ;;  %v3902_v7 = vsel %vm2585_vm12, %v3899_v6, %v3901_v4 }
0x1155   :  { %3921 = vst.msk [vmem:[#allocation6 + $0x18] sm:$0x1] %vm3920_vm6, %v3911_v5 }
0x1156   :  { %3906 = vst.msk [vmem:[#allocation6] sm:$0xe] %vm3905_vm7, %v3899_v6 }
0x1157   :  { %3907 = vst [vmem:[#allocation6 + $0x8] sm:$0xe] %v3902_v7  ;;  %v6562_v7 = vld [vmem:[#allocation33 + $0x1c8] sm:$0xff] }
0x115b   :  { %v3913_v8 = vpop.permute.xlu0 %3912 }
0x115c   :  { %v3914_v9 = vsel %vm2585_vm12, %v3911_v5, %v3913_v8  ;;  %v3926_v11 = vld [vmem:[#allocation6 + $0x18] sm:$0x3]  ;;  %v6563_v5 = vld [vmem:[#allocation33 + $0x1d0] sm:$0xff]  ;;  %v3988_v8 = vpack.c.bf16 %v3982_v49, %v3982_v49 }
0x115d   :  { %3919 = vst [vmem:[#allocation6 + $0x8] sm:$0xc0] %v3914_v9  ;;  %v3923_v12 = vld [vmem:[#allocation6] sm:$0xff] }
0x115e   :  { %3922 = vst [vmem:[#allocation6 + $0x20] sm:$0x1] %v3914_v9  ;;  %v3929_v13 = vpack.c.bf16 %v3926_v11, %v3923_v12  ;;  %v6561_v11 = vld [vmem:[#allocation33 + $0x1c0] sm:$0xff] }
0x1160   :  { %v8365_v15 = vsel %vm3937_vm2, %v3929_v13, 0  ;;  %v4442_v13 = vld [vmem:[#allocation31 + $0x4] sm:$0x3] }
0x1161   :  { %3954 = vmatpush.bf16.msrb.mxu3 %v8365_v15  ;;  %4041 = vmatpush.bf16.msrb.mxu0 %v8365_v15 }
0x1164   :  { %5961 = vmatmul.msk.bf16.vlgmr.msrb.gmra.mxu3 %vm3933_vm3, %v3932_v3  ;;  %5964 = vmatmul.msk.bf16.vlgmr.msrb.gmra.mxu0 %vm3933_vm3, %v4030_v16  ;;  %v3924_v18 = vld [vmem:[#allocation6 + $0x8] sm:$0xff] }
0x1165   :  { %4253 = vmatpush.bf16.msra.mxu0 %v6540_v14  ;;  %v3927_v19 = vld [vmem:[#allocation6 + $0x20] sm:$0x3] }
0x1166   :  { %v3930_v20 = vpack.c.bf16 %v3927_v19, %v3924_v18 }
0x1168   :  { %v8372_v33 = vsel %vm3937_vm2, %v3930_v20, 0 }
0x1169   :  { %4254 = vmatpush.bf16.msra.mxu0 %v6539_v17  ;;  %3967 = vmatpush.bf16.msra.mxu1 %v8372_v33  ;;  %v6560_v17 = vld [vmem:[#allocation33 + $0x1b8] sm:$0xff] }
0x116a   :  { %4054 = vmatpush.bf16.msra.mxu3 %v8372_v33 }
0x116c   :  { %5962 = vmatmul.msk.bf16.vlgmr.msra.gmra.mxu1 %vm3933_vm3, %v3932_v3 }
0x116d   :  { %4255 = vmatpush.bf16.msra.mxu0 %v6538_v31  ;;  %4067 = vmatpush.bf16.msrb.mxu1 %v8358_v2  ;;  %v6559_v31 = vld [vmem:[#allocation33 + $0x1b0] sm:$0xff] }
0x116e   :  { %4270 = vmatpush.bf16.msrb.mxu3 %v6544_v44 }
0x1171   :  { %4402 = vmatpush.bf16.msra.mxu1 %v6512_v21  ;;  %4256 = vmatpush.bf16.msra.mxu0 %v6537_v22  ;;  %v6552_v21 = vld [vmem:[#allocation33 + $0x178] sm:$0xff]  ;;  %v6558_v22 = vld [vmem:[#allocation33 + $0x1a8] sm:$0xff] }
0x1172   :  { %4271 = vmatpush.bf16.msrb.mxu3 %v6543_v46  ;;  %v6580_v46 = vld [vmem:[#allocation33 + $0x258] sm:$0xff] }
0x1174   :  { %5965 = vmatmul.msk.bf16.vlgmr.msra.gmra.mxu3 %vm3933_vm3, %v4030_v16 }
0x1175   :  { %4403 = vmatpush.bf16.msra.mxu1 %v6511_v25  ;;  %4257 = vmatpush.bf16.msra.mxu0 %v6536_v26  ;;  %v6556_v25 = vld [vmem:[#allocation33 + $0x198] sm:$0xff]  ;;  %v6549_v26 = vld [vmem:[#allocation33 + $0x160] sm:$0xff] }
0x1176   :  { %4272 = vmatpush.bf16.msrb.mxu3 %v6542_v48  ;;  %v6579_v48 = vld [vmem:[#allocation33 + $0x250] sm:$0xff] }
0x1179   :  { %4404 = vmatpush.bf16.msra.mxu1 %v6510_v28  ;;  %4258 = vmatpush.bf16.msra.mxu0 %v6535_v29  ;;  %v6554_v28 = vld [vmem:[#allocation33 + $0x188] sm:$0xff]  ;;  %v6547_v29 = vld [vmem:[#allocation33 + $0x150] sm:$0xff] }
0x117a   :  { %4273 = vmatpush.bf16.msrb.mxu3 %v6541_v51 }
0x117c   :  { %5966 = vmatmul.msk.bf16.vlgmr.msrb.gmra.mxu1 %vm3933_vm3, %v4030_v16 }
0x117d   :  { %4405 = vmatpush.bf16.msra.mxu1 %v6509_v0  ;;  %4259 = vmatpush.bf16.msra.mxu0 %v6534_v32  ;;  %v6546_v0 = vld [vmem:[#allocation33 + $0x148] sm:$0xff]  ;;  %v4693_v32 = vld [vmem:[#allocation31 + $0x6] sm:$0x3] }
0x117e   :  { %4415 = vmatpush.bf16.msra.mxu3 %v6520_v52  ;;  %v6570_v52 = vld [vmem:[#allocation33 + $0x208] sm:$0xff] }
0x1181   :  { %4406 = vmatpush.bf16.msra.mxu1 %v6508_v35  ;;  %4260 = vmatpush.bf16.msra.mxu0 %v6533_v37 }
0x1182   :  { %4416 = vmatpush.bf16.msra.mxu3 %v6519_v54  ;;  %v6578_v54 = vld [vmem:[#allocation33 + $0x248] sm:$0xff] }
0x1185   :  { %4453 = vmatpush.bf16.msrb.mxu0 %v8365_v15  ;;  %4407 = vmatpush.bf16.msra.mxu1 %v6507_v39 }
0x1186   :  { %4417 = vmatpush.bf16.msra.mxu3 %v6518_v56 }
0x1189   :  { %4408 = vmatpush.bf16.msra.mxu1 %v6506_v41 }
0x118a   :  { %4418 = vmatpush.bf16.msra.mxu3 %v6517_v57  ;;  %v6569_v57 = vld [vmem:[#allocation33 + $0x200] sm:$0xff] }
0x118d   :  { %4409 = vmatpush.bf16.msra.mxu1 %v6505_v42 }
0x118e   :  { %4419 = vmatpush.bf16.msra.mxu3 %v6516_v58 }
0x1191   :  { %4466 = vmatpush.bf16.msrb.mxu1 %v8372_v33 }
0x1192   :  { %4420 = vmatpush.bf16.msra.mxu3 %v6515_v59 }
0x1196   :  { %4421 = vmatpush.bf16.msra.mxu3 %v6514_v61 }
0x119a   :  { %4422 = vmatpush.bf16.msra.mxu3 %v6513_v63 }
0x11e1   :  { %v4043_v60 = vpop.f32.mrf.mxu0 }
0x11e2   :  { %v4073_v10 = vpack.c.bf16 %v4043_v60, %v4043_v60 }
0x11e4   :  { %4248 = vmatmul.bf16.vlgmr.msrb.gmra.mxu2 %v4073_v10 }
0x11e5   :  { %4479 = vmatpush.bf16.msrb.mxu2 %v8358_v2 }
0x11e7   :  { %v3956_v36 = vpop.f32.mrf.mxu3 }
0x11e8   :  { %v3986_v1 = vpack.c.bf16 %v3956_v36, %v3956_v36  ;;  %v6568_v36 = vld [vmem:[#allocation33 + $0x1f8] sm:$0xff] }
0x11e9   :  { %v3969_v3 = vpop.f32.mrf.mxu1  ;;  %v4045_v4 = vpop.f32.mrf.mxu0 }
0x11ea   :  { %4410 = vmatmul.bf16.vlgmr.msra.gmra.mxu1 %v3986_v1 }
0x11eb   :  { %4682 = vmatpush.bf16.msra.mxu1 %v6564_v62 }
0x11ef   :  { %v3958_v6 = vpop.f32.mrf.mxu3  ;;  %4683 = vmatpush.bf16.msra.mxu1 %v6563_v5 }
0x11f0   :  { %v6567_v6 = vld [vmem:[#allocation33 + $0x1f0] sm:$0xff] }
0x11f1   :  { %v3971_v9 = vpop.f32.mrf.mxu1 }
0x11f2   :  { %v6565_v9 = vld [vmem:[#allocation33 + $0x1e0] sm:$0xff] }
0x11f3   :  { %4684 = vmatpush.bf16.msra.mxu1 %v6562_v7  ;;  %v6566_v7 = vld [vmem:[#allocation33 + $0x1e8] sm:$0xff] }
0x11f4   :  { %6128 = vmatmul.msk.bf16.vlgmr.msra.gmra.mxu2 %vm2585_vm12, %v3988_v8  ;;  %v6577_v8 = vld [vmem:[#allocation33 + $0x240] sm:$0xff] }
0x11f5   :  { %4704 = vmatpush.bf16.msra.mxu2 %v8365_v15  ;;  %v3987_v15 = vpack.c.bf16 %v3969_v3, %v3969_v3 }
0x11f7   :  { %v4056_v12 = vpop.f32.mrf.mxu3  ;;  %4685 = vmatpush.bf16.msra.mxu1 %v6561_v11 }
0x11f8   :  { %v4074_v14 = vpack.c.bf16 %v4056_v12, %v4056_v12 }
0x11f9   :  { %v4069_v16 = vpop.f32.mrf.mxu1 }
0x11fa   :  { %v4075_v18 = vpack.c.bf16 %v4069_v16, %v4069_v16  ;;  %4261 = vmatmul.bf16.vlgmr.msra.gmra.mxu0 %v4074_v14  ;;  %6130 = vmatmul.msk.bf16.vlgmr.msrb.gmra.mxu1 %vm3933_vm3, %v4442_v13  ;;  %v6584_v14 = vld [vmem:[#allocation33 + $0x278] sm:$0xff]  ;;  %v6575_v16 = vld [vmem:[#allocation33 + $0x230] sm:$0xff] }
0x11fb   :  { %4717 = vmatpush.bf16.msrb.mxu1 %v8372_v33  ;;  %4652 = vmatpush.bf16.msra.mxu0 %v6552_v21  ;;  %v6551_v33 = vld [vmem:[#allocation33 + $0x170] sm:$0xff] }
0x11fc   :  { %6047 = vmatmul.msk.bf16.vlgmr.msrb.gmra.mxu3 %vm2585_vm12, %v4075_v18  ;;  %v6574_v18 = vld [vmem:[#allocation33 + $0x228] sm:$0xff] }
0x11fd   :  { %4665 = vmatpush.bf16.msrb.mxu3 %v6560_v17  ;;  %v6583_v17 = vld [vmem:[#allocation33 + $0x270] sm:$0xff] }
0x11ff   :  { %v4058_v19 = vpop.f32.mrf.mxu3  ;;  %4653 = vmatpush.bf16.msra.mxu0 %v6551_v33 }
0x1201   :  { %v4071_v20 = vpop.f32.mrf.mxu1  ;;  %4666 = vmatpush.bf16.msrb.mxu3 %v6559_v31  ;;  %v6581_v31 = vld [vmem:[#allocation33 + $0x260] sm:$0xff] }
0x1202   :  { %v6582_v20 = vld [vmem:[#allocation33 + $0x268] sm:$0xff] }
0x1203   :  { %4654 = vmatpush.bf16.msra.mxu0 %v6550_v24 }
0x1204   :  { %6131 = vmatmul.msk.bf16.vlgmr.msrb.gmra.mxu2 %vm3933_vm3, %v4442_v13 }
0x1205   :  { %4730 = vmatpush.bf16.msrb.mxu2 %v8358_v2  ;;  %4667 = vmatpush.bf16.msrb.mxu3 %v6558_v22  ;;  %v6555_v2 = vld [vmem:[#allocation33 + $0x190] sm:$0xff] }
0x1207   :  { %4655 = vmatpush.bf16.msra.mxu0 %v6549_v26 }
0x1209   :  { %4668 = vmatpush.bf16.msrb.mxu3 %v6557_v23 }
0x120a   :  { %6129 = vmatmul.msk.bf16.vlgmr.msrb.gmra.mxu0 %vm3933_vm3, %v4442_v13  ;;  %v6576_v13 = vld [vmem:[#allocation33 + $0x238] sm:$0xff] }
0x120b   :  { %4656 = vmatpush.bf16.msra.mxu0 %v6548_v27 }
0x120c   :  { %4423 = vmatmul.bf16.vlgmr.msra.gmra.mxu3 %v3987_v15  ;;  %v6573_v15 = vld [vmem:[#allocation33 + $0x220] sm:$0xff] }
0x120d   :  { %4669 = vmatpush.bf16.msrb.mxu3 %v6556_v25 }
0x120f   :  { %4657 = vmatpush.bf16.msra.mxu0 %v6547_v29 }
0x1211   :  { %4670 = vmatpush.bf16.msrb.mxu3 %v6555_v2 }
0x1213   :  { %4658 = vmatpush.bf16.msra.mxu0 %v6546_v0 }
0x1214   :  { %6213 = vmatmul.msk.bf16.vlgmr.msra.gmra.mxu2 %vm3933_vm3, %v4693_v32 }
0x1215   :  { %4671 = vmatpush.bf16.msrb.mxu3 %v6554_v28 }
0x1217   :  { %4659 = vmatpush.bf16.msra.mxu0 %v6545_v34 }
0x1219   :  { %4672 = vmatpush.bf16.msrb.mxu3 %v6553_v30 }
0x121b   :  { %4903 = vmatpush.bf16.msrb.mxu0 %v6572_v45 }
0x121d   :  { %4916 = vmatpush.bf16.msra.mxu3 %v6580_v46 }
0x121f   :  { %4904 = vmatpush.bf16.msrb.mxu0 %v6571_v47 }
0x1221   :  { %4917 = vmatpush.bf16.msra.mxu3 %v6579_v48 }
0x1223   :  { %4905 = vmatpush.bf16.msrb.mxu0 %v6570_v52 }
0x1224   :  { %6215 = vmatmul.msk.bf16.vlgmr.msrb.gmra.mxu2 %vm3933_vm3, %v4693_v32 }
0x1225   :  { %4918 = vmatpush.bf16.msra.mxu3 %v6578_v54 }
0x1227   :  { %4906 = vmatpush.bf16.msrb.mxu0 %v6569_v57 }
0x1229   :  { %4919 = vmatpush.bf16.msra.mxu3 %v6577_v8 }
0x122b   :  { %4907 = vmatpush.bf16.msrb.mxu0 %v6568_v36 }
0x122d   :  { %4920 = vmatpush.bf16.msra.mxu3 %v6576_v13 }
0x122f   :  { %4908 = vmatpush.bf16.msrb.mxu0 %v6567_v6 }
0x1231   :  { %4921 = vmatpush.bf16.msra.mxu3 %v6575_v16 }
0x1233   :  { %4909 = vmatpush.bf16.msrb.mxu0 %v6566_v7 }
0x1235   :  { %4922 = vmatpush.bf16.msra.mxu3 %v6574_v18 }
0x1237   :  { %4910 = vmatpush.bf16.msrb.mxu0 %v6565_v9 }
0x1239   :  { %4923 = vmatpush.bf16.msra.mxu3 %v6573_v15 }
0x1267   :  { %v4249_v35 = vpop.f32.mrf.mxu2  ;;  %v4411_v37 = vpop.f32.mrf.mxu1 }
0x126f   :  { %v4251_v38 = vpop.f32.mrf.mxu2  ;;  %v4413_v39 = vpop.f32.mrf.mxu1 }
0x1277   :  { %v4262_v40 = vpop.f32.mrf.mxu0  ;;  %v4437_v41 = vpop.f32.mrf.mxu2 }
0x1278   :  { %v4263_v42 = vadd.f32 %v4262_v40, %v4249_v35  ;;  %v4468_v43 = vpop.f32.mrf.mxu1 }
0x1279   :  { %v4486_v44 = vpack.c.bf16 %v4468_v43, %v4468_v43  ;;  %v6617_v43 = vld [vmem:[%s8426_s24] ss:$0 sm:$0xff] }
0x127b   :  { %4673 = vmatmul.bf16.vlgmr.msrb.gmra.mxu3 %v4486_v44 }
0x127f   :  { %v4264_v49 = vpop.f32.mrf.mxu0  ;;  %v4439_v50 = vpop.f32.mrf.mxu2 }
0x1280   :  { %v4275_v51 = vpop.f32.mrf.mxu3  ;;  %v4470_v53 = vpop.f32.mrf.mxu1 }
0x1281   :  { %v4276_v55 = vadd.f32 %v4275_v51, %v4263_v42 }
0x1283   :  { %v4412_v56 = vadd.f32 %v4411_v37, %v4276_v55 }
0x1287   :  { %v4455_v58 = vpop.f32.mrf.mxu0  ;;  %v4481_v59 = vpop.f32.mrf.mxu2 }
0x1288   :  { %v4485_v60 = vpack.c.bf16 %v4455_v58, %v4455_v58  ;;  %v4487_v10 = vpack.c.bf16 %v4481_v59, %v4481_v59  ;;  %v4277_v61 = vpop.f32.mrf.mxu3 }
0x128a   :  { %4660 = vmatmul.bf16.vlgmr.msra.gmra.mxu0 %v4485_v60  ;;  %6212 = vmatmul.msk.bf16.vlgmr.msra.gmra.mxu1 %vm2585_vm12, %v4487_v10 }
0x128b   :  { %4933 = vmatpush.bf16.msra.mxu1 %v6584_v14 }
0x128f   :  { %v4483_v62 = vpop.f32.mrf.mxu2  ;;  %v4457_v63 = vpop.f32.mrf.mxu0  ;;  %4934 = vmatpush.bf16.msra.mxu1 %v6583_v17 }
0x1290   :  { %v4424_v1 = vpop.f32.mrf.mxu3 }
0x1291   :  { %v4425_v3 = vadd.f32 %v4424_v1, %v4412_v56 }
0x1293   :  { %v4438_v4 = vadd.f32 %v4437_v41, %v4425_v3  ;;  %4935 = vmatpush.bf16.msra.mxu1 %v6582_v20 }
0x1297   :  { %v4706_v11 = vpop.f32.mrf.mxu2  ;;  %4936 = vmatpush.bf16.msra.mxu1 %v6581_v31 }
0x1298   :  { %v4426_v5 = vpop.f32.mrf.mxu3  ;;  %v4736_v12 = vpack.c.bf16 %v4706_v11, %v4706_v11 }
0x129a   :  { %6214 = vmatmul.msk.bf16.vlgmr.msrb.gmra.mxu1 %vm3933_vm3, %v4693_v32  ;;  %4911 = vmatmul.bf16.vlgmr.msrb.gmra.mxu0 %v4736_v12 }
0x129f   :  { %v4708_v19 = vpop.f32.mrf.mxu2 }
0x12a7   :  { %v4732_v21 = vpop.f32.mrf.mxu2 }
0x12a8   :  { %v4738_v22 = vpack.c.bf16 %v4732_v21, %v4732_v21 }
0x12aa   :  { %6296 = vmatmul.msk.bf16.vlgmr.msra.gmra.mxu1 %vm2585_vm12, %v4738_v22  ;;  %vm4948_vm12 = vcmask 11264  }
0x12af   :  { %v4734_v23 = vpop.f32.mrf.mxu2 }
0x12fe   :  { %v4674_v33 = vpop.f32.mrf.mxu3 }
0x1306   :  { %v4676_v24 = vpop.f32.mrf.mxu3 }
0x1307   :  { %v4661_v25 = vpop.f32.mrf.mxu0  ;;  %v4687_v26 = vpop.f32.mrf.mxu1 }
0x1308   :  { %v4675_v2 = vadd.f32 %v4674_v33, %v4661_v25 }
0x130a   :  { %v4688_v27 = vadd.f32 %v4687_v26, %v4675_v2 }
0x130c   :  { %v4691_v28 = vadd.f32 %v4688_v27, %v4438_v4 }
0x130f   :  { %v4689_v29 = vpop.f32.mrf.mxu1  ;;  %v4663_v30 = vpop.f32.mrf.mxu0 }
0x1317   :  { %v4719_v0 = vpop.f32.mrf.mxu1  ;;  %v4912_v35 = vpop.f32.mrf.mxu0 }
0x1318   :  { %v4737_v32 = vpack.c.bf16 %v4719_v0, %v4719_v0 }
0x131a   :  { %4924 = vmatmul.bf16.vlgmr.msra.gmra.mxu3 %v4737_v32 }
0x131f   :  { %v4721_v34 = vpop.f32.mrf.mxu1  ;;  %v4914_v37 = vpop.f32.mrf.mxu0 }
0x1327   :  { %v4938_v38 = vpop.f32.mrf.mxu1 }
0x132f   :  { %v4940_v39 = vpop.f32.mrf.mxu1 }
0x139d   :  { %v4925_v40 = vpop.f32.mrf.mxu3 }
0x139e   :  { %v4926_v41 = vadd.f32 %v4925_v40, %v4912_v35 }
0x13a0   :  { %v4939_v42 = vadd.f32 %v4938_v38, %v4926_v41 }
0x13a2   :  { %v4942_v44 = vadd.f32 %v4939_v42, %v4691_v28 }
0x13a4   :  { %v4947_v45 = vadd.f32 %v6617_v43, %v4942_v44 }
0x13a5   :  { %v4927_v46 = vpop.f32.mrf.mxu3 }
0x13a6   :  { %4949 = vst.msk [vmem:[#allocation34] sm:$0xf] %vm4948_vm12, %v4947_v45 }
0x13a7   :  { %4960 = dma.vmem_to_hbm [thread:$0]  %s4956_s26, 64, %s4958_s10, [#allocation9]  }
0x13a8   :  { %7082 = dma.done.wait [#allocation9], 64  }
0x13a9   :  { %7083 = vsyncadd [#allocation9], 4294967232 }
0x13aa   :  { %4965 = vsyncpa [#allocation8], 1 }
0x13ab   :  { %4966 = vsyncpa [#allocation11], 1 }
0x13ac   :  { %4967 = vsyncpa [#allocation14], 1 }
0x13ad   :  { %4968 = vsyncpa [#allocation17], 1 }
0x13ae   :  { %4969 = vsyncpa [#allocation20], 1 }
0x13af   :  { %4970 = vsyncpa [#allocation23], 1 }
0x13b0   :  { %4971 = vsyncpa [#allocation26], 1 }
0x13b1   :  { %4972 = vsyncpa [#allocation29], 1 }
0x13b2   :  { %4973 = vsyncpa [#allocation32], 1 }
0x13b3   :  { %4974 = vsyncpa [#allocation9], 1 }

</bundles_post_ra>
